<compile_context>
chip_gen: v5e
topology: v5e:2x2
jax: 0.10.0
libtpu: 0.0.40
codegen_flags: <defaults>
</compile_context>

<pallas_src>
import functools

import jax
import jax.numpy as jnp
from jax.experimental import pallas as pl
from jax.experimental.pallas import tpu as pltpu

_SUBLANE = 8
_LANE = 128


def _round_up(x, m):
    return (x + m - 1) // m * m


# --------------------------------------------------------------------------
# Pass 1: input projection (time-parallel): gates_in = x @ W_ih^T + bias
# --------------------------------------------------------------------------
def _input_proj_kernel(x_ref, w_ref, b_ref, out_ref):
    # x_ref: (row_tile, E_pad)   w_ref: (E_pad, 4*H_pad)   b_ref: (1, 4*H_pad)
    out_ref[...] = (
        jnp.dot(x_ref[...], w_ref[...], preferred_element_type=jnp.float32)
        + b_ref[...]
    ).astype(out_ref.dtype)


# --------------------------------------------------------------------------
# Pass 2: time-chunked recurrence (sequential). One grid step = Tc timesteps.
# --------------------------------------------------------------------------
def _recurrent_kernel(leg_ref, gates_ref, whh_ref, out_ref, h_scr, c_scr):
    """
    leg_ref   : (B_pad, 1) int32   per-row capture timestep (wordLeg-1, -1 => never)
    gates_ref : (Tc, B_pad, 4*H_pad) f32  precomputed x@W_ih^T + bias for this chunk
    whh_ref   : (H_pad, 4*H_pad)    hidden->gates weights (resident)
    out_ref   : (B_pad, H_pad)      captured h per row (resident across the grid)
    h_scr/c_scr: (B_pad, H_pad) f32 carried hidden / cell state across chunks
    """
    chunk = pl.program_id(0)
    Tc, _, H4 = gates_ref.shape
    Hp = H4 // 4

    @pl.when(chunk == 0)
    def _():
        h_scr[...] = jnp.zeros_like(h_scr)
        c_scr[...] = jnp.zeros_like(c_scr)
        out_ref[...] = jnp.zeros_like(out_ref)

    whh = whh_ref[...]        # hoisted: single load, reused every step
    leg = leg_ref[...]        # (B_pad, 1) int32
    t0 = chunk * Tc

    def step(s, carry):
        h, c, out = carry
        g_in = gates_ref[s]                                   # (B_pad, 4*H_pad) f32
        gates = g_in + jnp.dot(h.astype(whh.dtype), whh,
                               preferred_element_type=jnp.float32)
        # PyTorch gate order [i, f, g, o]; each block is 128-lane aligned (H_pad).
        i_g = jax.nn.sigmoid(gates[:, 0 * Hp:1 * Hp])
        f_g = jax.nn.sigmoid(gates[:, 1 * Hp:2 * Hp])
        g_g = jnp.tanh(gates[:, 2 * Hp:3 * Hp])
        o_g = jax.nn.sigmoid(gates[:, 3 * Hp:4 * Hp])
        c = f_g * c + i_g * g_g
        h = o_g * jnp.tanh(c)
        # Capture h only at each sequence's requested timestep (wordLeg-1 / T-1).
        out = jnp.where(leg == (t0 + s), h, out)
        return (h, c, out)

    carry0 = (h_scr[...], c_scr[...], out_ref[...])
    h, c, out = jax.lax.fori_loop(0, Tc, step, carry0, unroll=True)
    h_scr[...] = h
    c_scr[...] = c
    out_ref[...] = out


# --------------------------------------------------------------------------
# Wrapper
# --------------------------------------------------------------------------
@functools.partial(jax.jit,
                   static_argnames=("hidden_dim", "time_chunk", "matmul_dtype"))
def _vis_seq_encoder_impl(word_matrix, leg, w_ih_t, w_hh_t, bias, *,
                          hidden_dim, time_chunk, matmul_dtype):
    B, T, E = word_matrix.shape
    Ep, H4p = w_ih_t.shape
    Hp = H4p // 4

    Bp = _round_up(max(B, _SUBLANE), _SUBLANE)
    Tc = max(1, min(time_chunk, T))
    Tp = _round_up(T, Tc)
    n_chunks = Tp // Tc

    # Time-major, (8,128)-aligned input: (Tp, Bp, Ep). Padding is zeros; padded
    # rows/timesteps never contribute to the captured outputs.
    x_tm = jnp.transpose(word_matrix, (1, 0, 2)).astype(matmul_dtype)
    x_p = jnp.zeros((Tp, Bp, Ep), matmul_dtype).at[:T, :B, :E].set(x_tm)

    # ---- Pass 1: one large parallel matmul over all timesteps --------------
    rows = Tp * Bp
    row_tile = Tc * Bp
    gates2d = pl.pallas_call(
        _input_proj_kernel,
        out_shape=jax.ShapeDtypeStruct((rows, H4p), jnp.float32),
        grid_spec=pltpu.PrefetchScalarGridSpec(
            num_scalar_prefetch=0,
            grid=(n_chunks,),
            in_specs=[
                pl.BlockSpec((row_tile, Ep), lambda i: (i, 0)),
                pl.BlockSpec((Ep, H4p), lambda i: (0, 0)),   # W_ih^T (resident)
                pl.BlockSpec((1, H4p), lambda i: (0, 0)),    # bias   (resident)
            ],
            out_specs=pl.BlockSpec((row_tile, H4p), lambda i: (i, 0)),
        ),
        compiler_params=pltpu.CompilerParams(
            dimension_semantics=("parallel",)),
    )(x_p.reshape(rows, Ep), w_ih_t.astype(matmul_dtype), bias)
    gates = gates2d.reshape(Tp, Bp, H4p)

    # Per-row capture index (wordLeg - 1); padded batch rows get -1 (never hit).
    leg_m1 = jnp.full((Bp, 1), -1, jnp.int32).at[:B, 0].set(leg - 1)

    # ---- Pass 2: sequential recurrence, only (B, H) written to HBM ---------
    out_p = pl.pallas_call(
        _recurrent_kernel,
        out_shape=jax.ShapeDtypeStruct((Bp, Hp), jnp.float32),
        grid_spec=pltpu.PrefetchScalarGridSpec(
            num_scalar_prefetch=0,
            grid=(n_chunks,),
            in_specs=[
                pl.BlockSpec((Bp, 1), lambda c: (0, 0)),           # leg (resident)
                pl.BlockSpec((Tc, Bp, H4p), lambda c: (c, 0, 0)),  # gate chunk
                pl.BlockSpec((Hp, H4p), lambda c: (0, 0)),         # W_hh^T (resident)
            ],
            out_specs=pl.BlockSpec((Bp, Hp), lambda c: (0, 0)),    # resident output
            scratch_shapes=[
                pltpu.VMEM((Bp, Hp), jnp.float32),   # h carry
                pltpu.VMEM((Bp, Hp), jnp.float32),   # c carry
            ],
        ),
        compiler_params=pltpu.CompilerParams(
            dimension_semantics=("arbitrary",)),     # recurrence => sequential
    )(leg_m1, gates, w_hh_t.astype(matmul_dtype))

    return out_p[:B, :hidden_dim]


def vis_seq_encoder_forward(word_matrix, packed, word_leg=None, *,
                            time_chunk=8, matmul_dtype=jnp.float32):
    """word_matrix: (B, T, E) batch_first, like the PyTorch module."""
    B, T, _ = word_matrix.shape
    if word_leg is None:
        # hidden[0].squeeze(): h at the last timestep for every sequence.
        leg = jnp.full((B,), T, dtype=jnp.int32)
    else:
        leg = word_leg.astype(jnp.int32)
    return _vis_seq_encoder_impl(
        word_matrix, leg, packed["w_ih_t"], packed["w_hh_t"], packed["bias"],
        hidden_dim=packed["hidden_dim"], time_chunk=time_chunk,
        matmul_dtype=matmul_dtype)


# --------------------------------------------------------------------------
# Parameter packing: PyTorch layout -> padded, gate-blocked kernel layout.
# --------------------------------------------------------------------------
def pack_params(w_ih, w_hh, b_ih, b_hh):
    """w_ih: (4H, E), w_hh: (4H, H), b_ih/b_hh: (4H,)  [PyTorch nn.LSTM layout]."""
    H4, E = w_ih.shape
    H = H4 // 4
    Hp = _round_up(H, _LANE)
    Ep = _round_up(E, _LANE)
    bias = b_ih + b_hh

    wih_blocks, whh_blocks, b_blocks = [], [], []
    for k in range(4):  # gate order i, f, g, o — each block padded to 128 lanes
        wk = jnp.zeros((Ep, Hp), jnp.float32).at[:E, :H].set(
            w_ih[k * H:(k + 1) * H, :].T)
        uk = jnp.zeros((Hp, Hp), jnp.float32).at[:H, :H].set(
            w_hh[k * H:(k + 1) * H, :].T)
        bk = jnp.zeros((Hp,), jnp.float32).at[:H].set(bias[k * H:(k + 1) * H])
        wih_blocks.append(wk)
        whh_blocks.append(uk)
        b_blocks.append(bk)

    return {
        "w_ih_t": jnp.concatenate(wih_blocks, axis=1),        # (E_pad, 4*H_pad)
        "w_hh_t": jnp.concatenate(whh_blocks, axis=1),        # (H_pad, 4*H_pad)
        "bias": jnp.concatenate(b_blocks).reshape(1, 4 * Hp),  # (1, 4*H_pad)
        "hidden_dim": H,
        "embed_dim": E,
    }


# --------------------------------------------------------------------------
# Pure-JAX reference (lax.scan) for correctness check.
# --------------------------------------------------------------------------
def _reference_lstm(x_bte, w_ih, w_hh, b_ih, b_hh):
    B, T, E = x_bte.shape
    H = w_hh.shape[1]
    w_ih_t, w_hh_t, bias = w_ih.T, w_hh.T, b_ih + b_hh

    def step(carry, x_t):
        h, c = carry
        gates = x_t @ w_ih_t + h @ w_hh_t + bias
        i_g = jax.nn.sigmoid(gates[:, 0:H])
        f_g = jax.nn.sigmoid(gates[:, H:2 * H])
        g_g = jnp.tanh(gates[:, 2 * H:3 * H])
        o_g = jax.nn.sigmoid(gates[:, 3 * H:4 * H])
        c = f_g * c + i_g * g_g
        h = o_g * jnp.tanh(c)
        return (h, c), h

    h0 = jnp.zeros((B, H), jnp.float32)
    c0 = jnp.zeros((B, H), jnp.float32)
    (_, _), hs = jax.lax.scan(step, (h0, c0), jnp.transpose(x_bte, (1, 0, 2)))
    return hs  # (T, B, H)


if __name__ == "__main__":
    B, T, E, H = 2, 8, 32, 32
    key = jax.random.PRNGKey(0)
    k_x, k_w1, k_w2, k_b1, k_b2 = jax.random.split(key, 5)

    bound = 1.0 / (H ** 0.5)
    w_ih = jax.random.uniform(k_w1, (4 * H, E), jnp.float32, -bound, bound)
    w_hh = jax.random.uniform(k_w2, (4 * H, H), jnp.float32, -bound, bound)
    b_ih = jax.random.uniform(k_b1, (4 * H,), jnp.float32, -bound, bound)
    b_hh = jax.random.uniform(k_b2, (4 * H,), jnp.float32, -bound, bound)
    packed = pack_params(w_ih, w_hh, b_ih, b_hh)

    word_matrix = jax.random.normal(k_x, (B, T, E), jnp.float32)
    word_leg = jnp.array([8, 5], dtype=jnp.int32)   # valid lengths per sequence

    # Path 1: wordLeg is None -> hidden[0].squeeze()  (B, H)
    out_final = jax.block_until_ready(
        vis_seq_encoder_forward(word_matrix, packed, None))
    # Path 2: wordLeg given -> lstmOut[i, wordLeg[i]-1, :]  (B, H)
    out_gather = jax.block_until_ready(
        vis_seq_encoder_forward(word_matrix, packed, word_leg))

    # Correctness vs a pure-JAX scan reference.
    ref_all = _reference_lstm(word_matrix, w_ih, w_hh, b_ih, b_hh)  # (T, B, H)
    ref_gather = ref_all[word_leg - 1, jnp.arange(B), :]
    assert out_final.shape == (B, H)
    assert out_gather.shape == (B, H)
    assert jnp.allclose(out_final, ref_all[-1], atol=1e-5, rtol=1e-5)
    assert jnp.allclose(out_gather, ref_gather, atol=1e-5, rtol=1e-5)

    # Optional bf16-matmul path (MXU-native on v6e/v7x); f32 accumulation +
    # f32 elementwise math, so only small rounding differences.
    out_bf16 = jax.block_until_ready(
        vis_seq_encoder_forward(word_matrix, packed, word_leg,
                                matmul_dtype=jnp.bfloat16))
    assert out_bf16.shape == (B, H)
    assert jnp.allclose(out_bf16, ref_gather, atol=5e-2, rtol=5e-2)

    print("KERNEL_OK")
</pallas_src>

<mosaic_0001>
module attributes {stable_mosaic.version = 11 : i64} {
  func.func @_input_proj_kernel(%arg0: i32, %arg1: memref<64x128xf32, #tpu.memory_space<vmem>>, %arg2: memref<128x512xf32, #tpu.memory_space<vmem>>, %arg3: memref<1x512xf32, #tpu.memory_space<vmem>>, %arg4: memref<64x512xf32, #tpu.memory_space<vmem>>) attributes {dimension_semantics = [#tpu.dimension_semantics<parallel>], iteration_bounds = array<i64: 1>, scalar_prefetch = 0 : i64, scratch_operands = 0 : i64, tpu.core_type = #tpu.core_type<tc>, window_params = [{transform_indices = @transform_0, window_bounds = array<i64: 64, 128>}, {pipeline_mode = #tpu.pipeline_mode<synchronous>, transform_indices = @transform_1, window_bounds = array<i64: 128, 512>}, {pipeline_mode = #tpu.pipeline_mode<synchronous>, transform_indices = @transform_2, window_bounds = array<i64: 1, 512>}, {transform_indices = @transform_3, window_bounds = array<i64: 64, 512>}]} {
    %c0 = arith.constant 0 : index
    %c0_0 = arith.constant 0 : index
    %0 = vector.load %arg1[%c0, %c0_0] : memref<64x128xf32, #tpu.memory_space<vmem>>, vector<64x128xf32>
    %c0_1 = arith.constant 0 : index
    %c0_2 = arith.constant 0 : index
    %1 = vector.load %arg2[%c0_1, %c0_2] : memref<128x512xf32, #tpu.memory_space<vmem>>, vector<128x512xf32>
    %cst = arith.constant dense<0.000000e+00> : vector<64x512xf32>
    %2 = tpu.matmul %0, %1, %cst {dimension_numbers = #tpu.dot_dimension_numbers<[1], [0], [0], [1], [0, 0, 1, 1], [], []>} : vector<64x128xf32>, vector<128x512xf32>, vector<64x512xf32> -> vector<64x512xf32>
    %c0_3 = arith.constant 0 : index
    %c0_4 = arith.constant 0 : index
    %3 = vector.load %arg3[%c0_3, %c0_4] : memref<1x512xf32, #tpu.memory_space<vmem>>, vector<1x512xf32>
    %4 = vector.broadcast %3 : vector<1x512xf32> to vector<64x512xf32>
    %5 = arith.addf %2, %4 : vector<64x512xf32>
    %c0_5 = arith.constant 0 : index
    %c0_6 = arith.constant 0 : index
    %6 = vector.load %arg4[%c0_5, %c0_6] : memref<64x512xf32, #tpu.memory_space<vmem>>, vector<64x512xf32>
    tpu.vector_store %arg4[%c0_5, %c0_6], %5 {strides = array<i32>} : memref<64x512xf32, #tpu.memory_space<vmem>>, vector<64x512xf32>,
    return
  }
  func.func @transform_0(%arg0: i32) -> (i32, i32) {
    %c0_i32 = arith.constant 0 : i32
    %c0_i32_0 = arith.constant 0 : i32
    return %arg0, %c0_i32 : i32, i32
  }
  func.func @transform_1(%arg0: i32) -> (i32, i32) {
    %c0_i32 = arith.constant 0 : i32
    %c0_i32_0 = arith.constant 0 : i32
    %c0_i32_1 = arith.constant 0 : i32
    return %c0_i32, %c0_i32_0 : i32, i32
  }
  func.func @transform_2(%arg0: i32) -> (i32, i32) {
    %c0_i32 = arith.constant 0 : i32
    %c0_i32_0 = arith.constant 0 : i32
    %c0_i32_1 = arith.constant 0 : i32
    return %c0_i32, %c0_i32_0 : i32, i32
  }
  func.func @transform_3(%arg0: i32) -> (i32, i32) {
    %c0_i32 = arith.constant 0 : i32
    %c0_i32_0 = arith.constant 0 : i32
    return %arg0, %c0_i32 : i32, i32
  }
}

module attributes {stable_mosaic.version = 11 : i64} {
  func.func @_recurrent_kernel(%arg0: i32, %arg1: memref<8x1xi32, #tpu.memory_space<vmem>>, %arg2: memref<8x8x512xf32, #tpu.memory_space<vmem>>, %arg3: memref<128x512xf32, #tpu.memory_space<vmem>>, %arg4: memref<8x128xf32, #tpu.memory_space<vmem>>, %arg5: memref<8x128xf32, #tpu.memory_space<vmem>>, %arg6: memref<8x128xf32, #tpu.memory_space<vmem>>) attributes {dimension_semantics = [#tpu.dimension_semantics<arbitrary>], iteration_bounds = array<i64: 1>, scalar_prefetch = 0 : i64, scratch_operands = 2 : i64, tpu.core_type = #tpu.core_type<tc>, window_params = [{pipeline_mode = #tpu.pipeline_mode<synchronous>, transform_indices = @transform_0, window_bounds = array<i64: 8, 1>}, {transform_indices = @transform_1, window_bounds = array<i64: 8, 8, 512>}, {pipeline_mode = #tpu.pipeline_mode<synchronous>, transform_indices = @transform_2, window_bounds = array<i64: 128, 512>}, {pipeline_mode = #tpu.pipeline_mode<synchronous>, transform_indices = @transform_3, window_bounds = array<i64: 8, 128>}]} {
    %c0_i32 = arith.constant 0 : i32
    %0 = arith.cmpi eq, %arg0, %c0_i32 : i32
    %1 = arith.extui %0 : i1 to i32
    %c0_i32_0 = arith.constant 0 : i32
    %2 = arith.cmpi ne, %1, %c0_i32_0 : i32
    scf.if %2 {
      %cst_65 = arith.constant 0.000000e+00 : f32
      %300 = vector.broadcast %cst_65 : f32 to vector<8x128xf32>
      %c0_66 = arith.constant 0 : index
      %c0_67 = arith.constant 0 : index
      %301 = vector.load %arg5[%c0_66, %c0_67] : memref<8x128xf32, #tpu.memory_space<vmem>>, vector<8x128xf32>
      tpu.vector_store %arg5[%c0_66, %c0_67], %300 {strides = array<i32>} : memref<8x128xf32, #tpu.memory_space<vmem>>, vector<8x128xf32>,
      %cst_68 = arith.constant 0.000000e+00 : f32
      %302 = vector.broadcast %cst_68 : f32 to vector<8x128xf32>
      %c0_69 = arith.constant 0 : index
      %c0_70 = arith.constant 0 : index
      %303 = vector.load %arg6[%c0_69, %c0_70] : memref<8x128xf32, #tpu.memory_space<vmem>>, vector<8x128xf32>
      tpu.vector_store %arg6[%c0_69, %c0_70], %302 {strides = array<i32>} : memref<8x128xf32, #tpu.memory_space<vmem>>, vector<8x128xf32>,
      %cst_71 = arith.constant 0.000000e+00 : f32
      %304 = vector.broadcast %cst_71 : f32 to vector<8x128xf32>
      %c0_72 = arith.constant 0 : index
      %c0_73 = arith.constant 0 : index
      %305 = vector.load %arg4[%c0_72, %c0_73] : memref<8x128xf32, #tpu.memory_space<vmem>>, vector<8x128xf32>
      tpu.vector_store %arg4[%c0_72, %c0_73], %304 {strides = array<i32>} : memref<8x128xf32, #tpu.memory_space<vmem>>, vector<8x128xf32>,
    } else {
    }
    %c0 = arith.constant 0 : index
    %c0_1 = arith.constant 0 : index
    %3 = vector.load %arg3[%c0, %c0_1] : memref<128x512xf32, #tpu.memory_space<vmem>>, vector<128x512xf32>
    %c0_2 = arith.constant 0 : index
    %c0_3 = arith.constant 0 : index
    %4 = vector.load %arg1[%c0_2, %c0_3] : memref<8x1xi32, #tpu.memory_space<vmem>>, vector<8x1xi32>
    %c8_i32 = arith.constant 8 : i32
    %5 = arith.muli %arg0, %c8_i32 : i32
    %c0_4 = arith.constant 0 : index
    %c0_5 = arith.constant 0 : index
    %6 = vector.load %arg5[%c0_4, %c0_5] : memref<8x128xf32, #tpu.memory_space<vmem>>, vector<8x128xf32>
    %c0_6 = arith.constant 0 : index
    %c0_7 = arith.constant 0 : index
    %7 = vector.load %arg6[%c0_6, %c0_7] : memref<8x128xf32, #tpu.memory_space<vmem>>, vector<8x128xf32>
    %c0_8 = arith.constant 0 : index
    %c0_9 = arith.constant 0 : index
    %8 = vector.load %arg4[%c0_8, %c0_9] : memref<8x128xf32, #tpu.memory_space<vmem>>, vector<8x128xf32>
    %c0_i32_10 = arith.constant 0 : i32
    %9 = arith.index_cast %c0_i32_10 : i32 to index
    %c0_11 = arith.constant 0 : index
    %c0_12 = arith.constant 0 : index
    %10 = vector.load %arg2[%9, %c0_11, %c0_12] : memref<8x8x512xf32, #tpu.memory_space<vmem>>, vector<1x8x512xf32>
    %11 = vector.shape_cast %10 : vector<1x8x512xf32> to vector<8x512xf32>
    %cst = arith.constant dense<0.000000e+00> : vector<8x512xf32>
    %12 = tpu.matmul %6, %3, %cst {dimension_numbers = #tpu.dot_dimension_numbers<[1], [0], [0], [1], [0, 0, 1, 1], [], []>} : vector<8x128xf32>, vector<128x512xf32>, vector<8x512xf32> -> vector<8x512xf32>
    %13 = arith.addf %11, %12 : vector<8x512xf32>
    %14 = vector.extract_strided_slice %13 {offsets = [0, 0], sizes = [8, 128], strides = [1, 1]} : vector<8x512xf32> to vector<8x128xf32>
    %15 = arith.negf %14 : vector<8x128xf32>
    %16 = math.exp %15 : vector<8x128xf32>
    %cst_13 = arith.constant 1.000000e+00 : f32
    %17 = vector.broadcast %cst_13 : f32 to vector<8x128xf32>
    %18 = arith.addf %17, %16 : vector<8x128xf32>
    %19 = arith.divf %17, %18 : vector<8x128xf32>
    %20 = vector.extract_strided_slice %13 {offsets = [0, 128], sizes = [8, 128], strides = [1, 1]} : vector<8x512xf32> to vector<8x128xf32>
    %21 = arith.negf %20 : vector<8x128xf32>
    %22 = math.exp %21 : vector<8x128xf32>
    %cst_14 = arith.constant 1.000000e+00 : f32
    %23 = vector.broadcast %cst_14 : f32 to vector<8x128xf32>
    %24 = arith.addf %23, %22 : vector<8x128xf32>
    %25 = arith.divf %23, %24 : vector<8x128xf32>
    %26 = vector.extract_strided_slice %13 {offsets = [0, 256], sizes = [8, 128], strides = [1, 1]} : vector<8x512xf32> to vector<8x128xf32>
    %27 = math.tanh %26 : vector<8x128xf32>
    %28 = vector.extract_strided_slice %13 {offsets = [0, 384], sizes = [8, 128], strides = [1, 1]} : vector<8x512xf32> to vector<8x128xf32>
    %29 = arith.negf %28 : vector<8x128xf32>
    %30 = math.exp %29 : vector<8x128xf32>
    %cst_15 = arith.constant 1.000000e+00 : f32
    %31 = vector.broadcast %cst_15 : f32 to vector<8x128xf32>
    %32 = arith.addf %31, %30 : vector<8x128xf32>
    %33 = arith.divf %31, %32 : vector<8x128xf32>
    %34 = arith.mulf %25, %7 : vector<8x128xf32>
    %35 = arith.mulf %19, %27 : vector<8x128xf32>
    %36 = arith.addf %34, %35 : vector<8x128xf32>
    %37 = math.tanh %36 : vector<8x128xf32>
    %38 = arith.mulf %33, %37 : vector<8x128xf32>
    %39 = arith.addi %5, %c0_i32_10 : i32
    %40 = vector.broadcast %39 : i32 to vector<8x1xi32>
    %41 = arith.cmpi eq, %4, %40 : vector<8x1xi32>
    %42 = vector.shape_cast %41 : vector<8x1xi1> to vector<8x1xi1>
    %43 = vector.broadcast %42 : vector<8x1xi1> to vector<8x128xi1>
    %44 = arith.select %43, %38, %8 : vector<8x128xi1>, vector<8x128xf32>
    %c1_i32 = arith.constant 1 : i32
    %45 = arith.index_cast %c1_i32 : i32 to index
    %c0_16 = arith.constant 0 : index
    %c0_17 = arith.constant 0 : index
    %46 = vector.load %arg2[%45, %c0_16, %c0_17] : memref<8x8x512xf32, #tpu.memory_space<vmem>>, vector<1x8x512xf32>
    %47 = vector.shape_cast %46 : vector<1x8x512xf32> to vector<8x512xf32>
    %cst_18 = arith.constant dense<0.000000e+00> : vector<8x512xf32>
    %48 = tpu.matmul %38, %3, %cst_18 {dimension_numbers = #tpu.dot_dimension_numbers<[1], [0], [0], [1], [0, 0, 1, 1], [], []>} : vector<8x128xf32>, vector<128x512xf32>, vector<8x512xf32> -> vector<8x512xf32>
    %49 = arith.addf %47, %48 : vector<8x512xf32>
    %50 = vector.extract_strided_slice %49 {offsets = [0, 0], sizes = [8, 128], strides = [1, 1]} : vector<8x512xf32> to vector<8x128xf32>
    %51 = arith.negf %50 : vector<8x128xf32>
    %52 = math.exp %51 : vector<8x128xf32>
    %cst_19 = arith.constant 1.000000e+00 : f32
    %53 = vector.broadcast %cst_19 : f32 to vector<8x128xf32>
    %54 = arith.addf %53, %52 : vector<8x128xf32>
    %55 = arith.divf %53, %54 : vector<8x128xf32>
    %56 = vector.extract_strided_slice %49 {offsets = [0, 128], sizes = [8, 128], strides = [1, 1]} : vector<8x512xf32> to vector<8x128xf32>
    %57 = arith.negf %56 : vector<8x128xf32>
    %58 = math.exp %57 : vector<8x128xf32>
    %cst_20 = arith.constant 1.000000e+00 : f32
    %59 = vector.broadcast %cst_20 : f32 to vector<8x128xf32>
    %60 = arith.addf %59, %58 : vector<8x128xf32>
    %61 = arith.divf %59, %60 : vector<8x128xf32>
    %62 = vector.extract_strided_slice %49 {offsets = [0, 256], sizes = [8, 128], strides = [1, 1]} : vector<8x512xf32> to vector<8x128xf32>
    %63 = math.tanh %62 : vector<8x128xf32>
    %64 = vector.extract_strided_slice %49 {offsets = [0, 384], sizes = [8, 128], strides = [1, 1]} : vector<8x512xf32> to vector<8x128xf32>
    %65 = arith.negf %64 : vector<8x128xf32>
    %66 = math.exp %65 : vector<8x128xf32>
    %cst_21 = arith.constant 1.000000e+00 : f32
    %67 = vector.broadcast %cst_21 : f32 to vector<8x128xf32>
    %68 = arith.addf %67, %66 : vector<8x128xf32>
    %69 = arith.divf %67, %68 : vector<8x128xf32>
    %70 = arith.mulf %61, %36 : vector<8x128xf32>
    %71 = arith.mulf %55, %63 : vector<8x128xf32>
    %72 = arith.addf %70, %71 : vector<8x128xf32>
    %73 = math.tanh %72 : vector<8x128xf32>
    %74 = arith.mulf %69, %73 : vector<8x128xf32>
    %75 = arith.addi %5, %c1_i32 : i32
    %76 = vector.broadcast %75 : i32 to vector<8x1xi32>
    %77 = arith.cmpi eq, %4, %76 : vector<8x1xi32>
    %78 = vector.shape_cast %77 : vector<8x1xi1> to vector<8x1xi1>
    %79 = vector.broadcast %78 : vector<8x1xi1> to vector<8x128xi1>
    %80 = arith.select %79, %74, %44 : vector<8x128xi1>, vector<8x128xf32>
    %c2_i32 = arith.constant 2 : i32
    %81 = arith.index_cast %c2_i32 : i32 to index
    %c0_22 = arith.constant 0 : index
    %c0_23 = arith.constant 0 : index
    %82 = vector.load %arg2[%81, %c0_22, %c0_23] : memref<8x8x512xf32, #tpu.memory_space<vmem>>, vector<1x8x512xf32>
    %83 = vector.shape_cast %82 : vector<1x8x512xf32> to vector<8x512xf32>
    %cst_24 = arith.constant dense<0.000000e+00> : vector<8x512xf32>
    %84 = tpu.matmul %74, %3, %cst_24 {dimension_numbers = #tpu.dot_dimension_numbers<[1], [0], [0], [1], [0, 0, 1, 1], [], []>} : vector<8x128xf32>, vector<128x512xf32>, vector<8x512xf32> -> vector<8x512xf32>
    %85 = arith.addf %83, %84 : vector<8x512xf32>
    %86 = vector.extract_strided_slice %85 {offsets = [0, 0], sizes = [8, 128], strides = [1, 1]} : vector<8x512xf32> to vector<8x128xf32>
    %87 = arith.negf %86 : vector<8x128xf32>
    %88 = math.exp %87 : vector<8x128xf32>
    %cst_25 = arith.constant 1.000000e+00 : f32
    %89 = vector.broadcast %cst_25 : f32 to vector<8x128xf32>
    %90 = arith.addf %89, %88 : vector<8x128xf32>
    %91 = arith.divf %89, %90 : vector<8x128xf32>
    %92 = vector.extract_strided_slice %85 {offsets = [0, 128], sizes = [8, 128], strides = [1, 1]} : vector<8x512xf32> to vector<8x128xf32>
    %93 = arith.negf %92 : vector<8x128xf32>
    %94 = math.exp %93 : vector<8x128xf32>
    %cst_26 = arith.constant 1.000000e+00 : f32
    %95 = vector.broadcast %cst_26 : f32 to vector<8x128xf32>
    %96 = arith.addf %95, %94 : vector<8x128xf32>
    %97 = arith.divf %95, %96 : vector<8x128xf32>
    %98 = vector.extract_strided_slice %85 {offsets = [0, 256], sizes = [8, 128], strides = [1, 1]} : vector<8x512xf32> to vector<8x128xf32>
    %99 = math.tanh %98 : vector<8x128xf32>
    %100 = vector.extract_strided_slice %85 {offsets = [0, 384], sizes = [8, 128], strides = [1, 1]} : vector<8x512xf32> to vector<8x128xf32>
    %101 = arith.negf %100 : vector<8x128xf32>
    %102 = math.exp %101 : vector<8x128xf32>
    %cst_27 = arith.constant 1.000000e+00 : f32
    %103 = vector.broadcast %cst_27 : f32 to vector<8x128xf32>
    %104 = arith.addf %103, %102 : vector<8x128xf32>
    %105 = arith.divf %103, %104 : vector<8x128xf32>
    %106 = arith.mulf %97, %72 : vector<8x128xf32>
    %107 = arith.mulf %91, %99 : vector<8x128xf32>
    %108 = arith.addf %106, %107 : vector<8x128xf32>
    %109 = math.tanh %108 : vector<8x128xf32>
    %110 = arith.mulf %105, %109 : vector<8x128xf32>
    %111 = arith.addi %5, %c2_i32 : i32
    %112 = vector.broadcast %111 : i32 to vector<8x1xi32>
    %113 = arith.cmpi eq, %4, %112 : vector<8x1xi32>
    %114 = vector.shape_cast %113 : vector<8x1xi1> to vector<8x1xi1>
    %115 = vector.broadcast %114 : vector<8x1xi1> to vector<8x128xi1>
    %116 = arith.select %115, %110, %80 : vector<8x128xi1>, vector<8x128xf32>
    %c3_i32 = arith.constant 3 : i32
    %117 = arith.index_cast %c3_i32 : i32 to index
    %c0_28 = arith.constant 0 : index
    %c0_29 = arith.constant 0 : index
    %118 = vector.load %arg2[%117, %c0_28, %c0_29] : memref<8x8x512xf32, #tpu.memory_space<vmem>>, vector<1x8x512xf32>
    %119 = vector.shape_cast %118 : vector<1x8x512xf32> to vector<8x512xf32>
    %cst_30 = arith.constant dense<0.000000e+00> : vector<8x512xf32>
    %120 = tpu.matmul %110, %3, %cst_30 {dimension_numbers = #tpu.dot_dimension_numbers<[1], [0], [0], [1], [0, 0, 1, 1], [], []>} : vector<8x128xf32>, vector<128x512xf32>, vector<8x512xf32> -> vector<8x512xf32>
    %121 = arith.addf %119, %120 : vector<8x512xf32>
    %122 = vector.extract_strided_slice %121 {offsets = [0, 0], sizes = [8, 128], strides = [1, 1]} : vector<8x512xf32> to vector<8x128xf32>
    %123 = arith.negf %122 : vector<8x128xf32>
    %124 = math.exp %123 : vector<8x128xf32>
    %cst_31 = arith.constant 1.000000e+00 : f32
    %125 = vector.broadcast %cst_31 : f32 to vector<8x128xf32>
    %126 = arith.addf %125, %124 : vector<8x128xf32>
    %127 = arith.divf %125, %126 : vector<8x128xf32>
    %128 = vector.extract_strided_slice %121 {offsets = [0, 128], sizes = [8, 128], strides = [1, 1]} : vector<8x512xf32> to vector<8x128xf32>
    %129 = arith.negf %128 : vector<8x128xf32>
    %130 = math.exp %129 : vector<8x128xf32>
    %cst_32 = arith.constant 1.000000e+00 : f32
    %131 = vector.broadcast %cst_32 : f32 to vector<8x128xf32>
    %132 = arith.addf %131, %130 : vector<8x128xf32>
    %133 = arith.divf %131, %132 : vector<8x128xf32>
    %134 = vector.extract_strided_slice %121 {offsets = [0, 256], sizes = [8, 128], strides = [1, 1]} : vector<8x512xf32> to vector<8x128xf32>
    %135 = math.tanh %134 : vector<8x128xf32>
    %136 = vector.extract_strided_slice %121 {offsets = [0, 384], sizes = [8, 128], strides = [1, 1]} : vector<8x512xf32> to vector<8x128xf32>
    %137 = arith.negf %136 : vector<8x128xf32>
    %138 = math.exp %137 : vector<8x128xf32>
    %cst_33 = arith.constant 1.000000e+00 : f32
    %139 = vector.broadcast %cst_33 : f32 to vector<8x128xf32>
    %140 = arith.addf %139, %138 : vector<8x128xf32>
    %141 = arith.divf %139, %140 : vector<8x128xf32>
    %142 = arith.mulf %133, %108 : vector<8x128xf32>
    %143 = arith.mulf %127, %135 : vector<8x128xf32>
    %144 = arith.addf %142, %143 : vector<8x128xf32>
    %145 = math.tanh %144 : vector<8x128xf32>
    %146 = arith.mulf %141, %145 : vector<8x128xf32>
    %147 = arith.addi %5, %c3_i32 : i32
    %148 = vector.broadcast %147 : i32 to vector<8x1xi32>
    %149 = arith.cmpi eq, %4, %148 : vector<8x1xi32>
    %150 = vector.shape_cast %149 : vector<8x1xi1> to vector<8x1xi1>
    %151 = vector.broadcast %150 : vector<8x1xi1> to vector<8x128xi1>
    %152 = arith.select %151, %146, %116 : vector<8x128xi1>, vector<8x128xf32>
    %c4_i32 = arith.constant 4 : i32
    %153 = arith.index_cast %c4_i32 : i32 to index
    %c0_34 = arith.constant 0 : index
    %c0_35 = arith.constant 0 : index
    %154 = vector.load %arg2[%153, %c0_34, %c0_35] : memref<8x8x512xf32, #tpu.memory_space<vmem>>, vector<1x8x512xf32>
    %155 = vector.shape_cast %154 : vector<1x8x512xf32> to vector<8x512xf32>
    %cst_36 = arith.constant dense<0.000000e+00> : vector<8x512xf32>
    %156 = tpu.matmul %146, %3, %cst_36 {dimension_numbers = #tpu.dot_dimension_numbers<[1], [0], [0], [1], [0, 0, 1, 1], [], []>} : vector<8x128xf32>, vector<128x512xf32>, vector<8x512xf32> -> vector<8x512xf32>
    %157 = arith.addf %155, %156 : vector<8x512xf32>
    %158 = vector.extract_strided_slice %157 {offsets = [0, 0], sizes = [8, 128], strides = [1, 1]} : vector<8x512xf32> to vector<8x128xf32>
    %159 = arith.negf %158 : vector<8x128xf32>
    %160 = math.exp %159 : vector<8x128xf32>
    %cst_37 = arith.constant 1.000000e+00 : f32
    %161 = vector.broadcast %cst_37 : f32 to vector<8x128xf32>
    %162 = arith.addf %161, %160 : vector<8x128xf32>
    %163 = arith.divf %161, %162 : vector<8x128xf32>
    %164 = vector.extract_strided_slice %157 {offsets = [0, 128], sizes = [8, 128], strides = [1, 1]} : vector<8x512xf32> to vector<8x128xf32>
    %165 = arith.negf %164 : vector<8x128xf32>
    %166 = math.exp %165 : vector<8x128xf32>
    %cst_38 = arith.constant 1.000000e+00 : f32
    %167 = vector.broadcast %cst_38 : f32 to vector<8x128xf32>
    %168 = arith.addf %167, %166 : vector<8x128xf32>
    %169 = arith.divf %167, %168 : vector<8x128xf32>
    %170 = vector.extract_strided_slice %157 {offsets = [0, 256], sizes = [8, 128], strides = [1, 1]} : vector<8x512xf32> to vector<8x128xf32>
    %171 = math.tanh %170 : vector<8x128xf32>
    %172 = vector.extract_strided_slice %157 {offsets = [0, 384], sizes = [8, 128], strides = [1, 1]} : vector<8x512xf32> to vector<8x128xf32>
    %173 = arith.negf %172 : vector<8x128xf32>
    %174 = math.exp %173 : vector<8x128xf32>
    %cst_39 = arith.constant 1.000000e+00 : f32
    %175 = vector.broadcast %cst_39 : f32 to vector<8x128xf32>
    %176 = arith.addf %175, %174 : vector<8x128xf32>
    %177 = arith.divf %175, %176 : vector<8x128xf32>
    %178 = arith.mulf %169, %144 : vector<8x128xf32>
    %179 = arith.mulf %163, %171 : vector<8x128xf32>
    %180 = arith.addf %178, %179 : vector<8x128xf32>
    %181 = math.tanh %180 : vector<8x128xf32>
    %182 = arith.mulf %177, %181 : vector<8x128xf32>
    %183 = arith.addi %5, %c4_i32 : i32
    %184 = vector.broadcast %183 : i32 to vector<8x1xi32>
    %185 = arith.cmpi eq, %4, %184 : vector<8x1xi32>
    %186 = vector.shape_cast %185 : vector<8x1xi1> to vector<8x1xi1>
    %187 = vector.broadcast %186 : vector<8x1xi1> to vector<8x128xi1>
    %188 = arith.select %187, %182, %152 : vector<8x128xi1>, vector<8x128xf32>
    %c5_i32 = arith.constant 5 : i32
    %189 = arith.index_cast %c5_i32 : i32 to index
    %c0_40 = arith.constant 0 : index
    %c0_41 = arith.constant 0 : index
    %190 = vector.load %arg2[%189, %c0_40, %c0_41] : memref<8x8x512xf32, #tpu.memory_space<vmem>>, vector<1x8x512xf32>
    %191 = vector.shape_cast %190 : vector<1x8x512xf32> to vector<8x512xf32>
    %cst_42 = arith.constant dense<0.000000e+00> : vector<8x512xf32>
    %192 = tpu.matmul %182, %3, %cst_42 {dimension_numbers = #tpu.dot_dimension_numbers<[1], [0], [0], [1], [0, 0, 1, 1], [], []>} : vector<8x128xf32>, vector<128x512xf32>, vector<8x512xf32> -> vector<8x512xf32>
    %193 = arith.addf %191, %192 : vector<8x512xf32>
    %194 = vector.extract_strided_slice %193 {offsets = [0, 0], sizes = [8, 128], strides = [1, 1]} : vector<8x512xf32> to vector<8x128xf32>
    %195 = arith.negf %194 : vector<8x128xf32>
    %196 = math.exp %195 : vector<8x128xf32>
    %cst_43 = arith.constant 1.000000e+00 : f32
    %197 = vector.broadcast %cst_43 : f32 to vector<8x128xf32>
    %198 = arith.addf %197, %196 : vector<8x128xf32>
    %199 = arith.divf %197, %198 : vector<8x128xf32>
    %200 = vector.extract_strided_slice %193 {offsets = [0, 128], sizes = [8, 128], strides = [1, 1]} : vector<8x512xf32> to vector<8x128xf32>
    %201 = arith.negf %200 : vector<8x128xf32>
    %202 = math.exp %201 : vector<8x128xf32>
    %cst_44 = arith.constant 1.000000e+00 : f32
    %203 = vector.broadcast %cst_44 : f32 to vector<8x128xf32>
    %204 = arith.addf %203, %202 : vector<8x128xf32>
    %205 = arith.divf %203, %204 : vector<8x128xf32>
    %206 = vector.extract_strided_slice %193 {offsets = [0, 256], sizes = [8, 128], strides = [1, 1]} : vector<8x512xf32> to vector<8x128xf32>
    %207 = math.tanh %206 : vector<8x128xf32>
    %208 = vector.extract_strided_slice %193 {offsets = [0, 384], sizes = [8, 128], strides = [1, 1]} : vector<8x512xf32> to vector<8x128xf32>
    %209 = arith.negf %208 : vector<8x128xf32>
    %210 = math.exp %209 : vector<8x128xf32>
    %cst_45 = arith.constant 1.000000e+00 : f32
    %211 = vector.broadcast %cst_45 : f32 to vector<8x128xf32>
    %212 = arith.addf %211, %210 : vector<8x128xf32>
    %213 = arith.divf %211, %212 : vector<8x128xf32>
    %214 = arith.mulf %205, %180 : vector<8x128xf32>
    %215 = arith.mulf %199, %207 : vector<8x128xf32>
    %216 = arith.addf %214, %215 : vector<8x128xf32>
    %217 = math.tanh %216 : vector<8x128xf32>
    %218 = arith.mulf %213, %217 : vector<8x128xf32>
    %219 = arith.addi %5, %c5_i32 : i32
    %220 = vector.broadcast %219 : i32 to vector<8x1xi32>
    %221 = arith.cmpi eq, %4, %220 : vector<8x1xi32>
    %222 = vector.shape_cast %221 : vector<8x1xi1> to vector<8x1xi1>
    %223 = vector.broadcast %222 : vector<8x1xi1> to vector<8x128xi1>
    %224 = arith.select %223, %218, %188 : vector<8x128xi1>, vector<8x128xf32>
    %c6_i32 = arith.constant 6 : i32
    %225 = arith.index_cast %c6_i32 : i32 to index
    %c0_46 = arith.constant 0 : index
    %c0_47 = arith.constant 0 : index
    %226 = vector.load %arg2[%225, %c0_46, %c0_47] : memref<8x8x512xf32, #tpu.memory_space<vmem>>, vector<1x8x512xf32>
    %227 = vector.shape_cast %226 : vector<1x8x512xf32> to vector<8x512xf32>
    %cst_48 = arith.constant dense<0.000000e+00> : vector<8x512xf32>
    %228 = tpu.matmul %218, %3, %cst_48 {dimension_numbers = #tpu.dot_dimension_numbers<[1], [0], [0], [1], [0, 0, 1, 1], [], []>} : vector<8x128xf32>, vector<128x512xf32>, vector<8x512xf32> -> vector<8x512xf32>
    %229 = arith.addf %227, %228 : vector<8x512xf32>
    %230 = vector.extract_strided_slice %229 {offsets = [0, 0], sizes = [8, 128], strides = [1, 1]} : vector<8x512xf32> to vector<8x128xf32>
    %231 = arith.negf %230 : vector<8x128xf32>
    %232 = math.exp %231 : vector<8x128xf32>
    %cst_49 = arith.constant 1.000000e+00 : f32
    %233 = vector.broadcast %cst_49 : f32 to vector<8x128xf32>
    %234 = arith.addf %233, %232 : vector<8x128xf32>
    %235 = arith.divf %233, %234 : vector<8x128xf32>
    %236 = vector.extract_strided_slice %229 {offsets = [0, 128], sizes = [8, 128], strides = [1, 1]} : vector<8x512xf32> to vector<8x128xf32>
    %237 = arith.negf %236 : vector<8x128xf32>
    %238 = math.exp %237 : vector<8x128xf32>
    %cst_50 = arith.constant 1.000000e+00 : f32
    %239 = vector.broadcast %cst_50 : f32 to vector<8x128xf32>
    %240 = arith.addf %239, %238 : vector<8x128xf32>
    %241 = arith.divf %239, %240 : vector<8x128xf32>
    %242 = vector.extract_strided_slice %229 {offsets = [0, 256], sizes = [8, 128], strides = [1, 1]} : vector<8x512xf32> to vector<8x128xf32>
    %243 = math.tanh %242 : vector<8x128xf32>
    %244 = vector.extract_strided_slice %229 {offsets = [0, 384], sizes = [8, 128], strides = [1, 1]} : vector<8x512xf32> to vector<8x128xf32>
    %245 = arith.negf %244 : vector<8x128xf32>
    %246 = math.exp %245 : vector<8x128xf32>
    %cst_51 = arith.constant 1.000000e+00 : f32
    %247 = vector.broadcast %cst_51 : f32 to vector<8x128xf32>
    %248 = arith.addf %247, %246 : vector<8x128xf32>
    %249 = arith.divf %247, %248 : vector<8x128xf32>
    %250 = arith.mulf %241, %216 : vector<8x128xf32>
    %251 = arith.mulf %235, %243 : vector<8x128xf32>
    %252 = arith.addf %250, %251 : vector<8x128xf32>
    %253 = math.tanh %252 : vector<8x128xf32>
    %254 = arith.mulf %249, %253 : vector<8x128xf32>
    %255 = arith.addi %5, %c6_i32 : i32
    %256 = vector.broadcast %255 : i32 to vector<8x1xi32>
    %257 = arith.cmpi eq, %4, %256 : vector<8x1xi32>
    %258 = vector.shape_cast %257 : vector<8x1xi1> to vector<8x1xi1>
    %259 = vector.broadcast %258 : vector<8x1xi1> to vector<8x128xi1>
    %260 = arith.select %259, %254, %224 : vector<8x128xi1>, vector<8x128xf32>
    %c7_i32 = arith.constant 7 : i32
    %261 = arith.index_cast %c7_i32 : i32 to index
    %c0_52 = arith.constant 0 : index
    %c0_53 = arith.constant 0 : index
    %262 = vector.load %arg2[%261, %c0_52, %c0_53] : memref<8x8x512xf32, #tpu.memory_space<vmem>>, vector<1x8x512xf32>
    %263 = vector.shape_cast %262 : vector<1x8x512xf32> to vector<8x512xf32>
    %cst_54 = arith.constant dense<0.000000e+00> : vector<8x512xf32>
    %264 = tpu.matmul %254, %3, %cst_54 {dimension_numbers = #tpu.dot_dimension_numbers<[1], [0], [0], [1], [0, 0, 1, 1], [], []>} : vector<8x128xf32>, vector<128x512xf32>, vector<8x512xf32> -> vector<8x512xf32>
    %265 = arith.addf %263, %264 : vector<8x512xf32>
    %266 = vector.extract_strided_slice %265 {offsets = [0, 0], sizes = [8, 128], strides = [1, 1]} : vector<8x512xf32> to vector<8x128xf32>
    %267 = arith.negf %266 : vector<8x128xf32>
    %268 = math.exp %267 : vector<8x128xf32>
    %cst_55 = arith.constant 1.000000e+00 : f32
    %269 = vector.broadcast %cst_55 : f32 to vector<8x128xf32>
    %270 = arith.addf %269, %268 : vector<8x128xf32>
    %271 = arith.divf %269, %270 : vector<8x128xf32>
    %272 = vector.extract_strided_slice %265 {offsets = [0, 128], sizes = [8, 128], strides = [1, 1]} : vector<8x512xf32> to vector<8x128xf32>
    %273 = arith.negf %272 : vector<8x128xf32>
    %274 = math.exp %273 : vector<8x128xf32>
    %cst_56 = arith.constant 1.000000e+00 : f32
    %275 = vector.broadcast %cst_56 : f32 to vector<8x128xf32>
    %276 = arith.addf %275, %274 : vector<8x128xf32>
    %277 = arith.divf %275, %276 : vector<8x128xf32>
    %278 = vector.extract_strided_slice %265 {offsets = [0, 256], sizes = [8, 128], strides = [1, 1]} : vector<8x512xf32> to vector<8x128xf32>
    %279 = math.tanh %278 : vector<8x128xf32>
    %280 = vector.extract_strided_slice %265 {offsets = [0, 384], sizes = [8, 128], strides = [1, 1]} : vector<8x512xf32> to vector<8x128xf32>
    %281 = arith.negf %280 : vector<8x128xf32>
    %282 = math.exp %281 : vector<8x128xf32>
    %cst_57 = arith.constant 1.000000e+00 : f32
    %283 = vector.broadcast %cst_57 : f32 to vector<8x128xf32>
    %284 = arith.addf %283, %282 : vector<8x128xf32>
    %285 = arith.divf %283, %284 : vector<8x128xf32>
    %286 = arith.mulf %277, %252 : vector<8x128xf32>
    %287 = arith.mulf %271, %279 : vector<8x128xf32>
    %288 = arith.addf %286, %287 : vector<8x128xf32>
    %289 = math.tanh %288 : vector<8x128xf32>
    %290 = arith.mulf %285, %289 : vector<8x128xf32>
    %291 = arith.addi %5, %c7_i32 : i32
    %292 = vector.broadcast %291 : i32 to vector<8x1xi32>
    %293 = arith.cmpi eq, %4, %292 : vector<8x1xi32>
    %294 = vector.shape_cast %293 : vector<8x1xi1> to vector<8x1xi1>
    %295 = vector.broadcast %294 : vector<8x1xi1> to vector<8x128xi1>
    %296 = arith.select %295, %290, %260 : vector<8x128xi1>, vector<8x128xf32>
    %c8_i32_58 = arith.constant 8 : i32
    %c0_59 = arith.constant 0 : index
    %c0_60 = arith.constant 0 : index
    %297 = vector.load %arg5[%c0_59, %c0_60] : memref<8x128xf32, #tpu.memory_space<vmem>>, vector<8x128xf32>
    tpu.vector_store %arg5[%c0_59, %c0_60], %290 {strides = array<i32>} : memref<8x128xf32, #tpu.memory_space<vmem>>, vector<8x128xf32>,
    %c0_61 = arith.constant 0 : index
    %c0_62 = arith.constant 0 : index
    %298 = vector.load %arg6[%c0_61, %c0_62] : memref<8x128xf32, #tpu.memory_space<vmem>>, vector<8x128xf32>
    tpu.vector_store %arg6[%c0_61, %c0_62], %288 {strides = array<i32>} : memref<8x128xf32, #tpu.memory_space<vmem>>, vector<8x128xf32>,
    %c0_63 = arith.constant 0 : index
    %c0_64 = arith.constant 0 : index
    %299 = vector.load %arg4[%c0_63, %c0_64] : memref<8x128xf32, #tpu.memory_space<vmem>>, vector<8x128xf32>
    tpu.vector_store %arg4[%c0_63, %c0_64], %296 {strides = array<i32>} : memref<8x128xf32, #tpu.memory_space<vmem>>, vector<8x128xf32>,
    return
  }
  func.func @transform_0(%arg0: i32) -> (i32, i32) {
    %c0_i32 = arith.constant 0 : i32
    %c0_i32_0 = arith.constant 0 : i32
    %c0_i32_1 = arith.constant 0 : i32
    return %c0_i32, %c0_i32_0 : i32, i32
  }
  func.func @transform_1(%arg0: i32) -> (i32, i32, i32) {
    %c0_i32 = arith.constant 0 : i32
    %c0_i32_0 = arith.constant 0 : i32
    %c0_i32_1 = arith.constant 0 : i32
    return %arg0, %c0_i32, %c0_i32_0 : i32, i32, i32
  }
  func.func @transform_2(%arg0: i32) -> (i32, i32) {
    %c0_i32 = arith.constant 0 : i32
    %c0_i32_0 = arith.constant 0 : i32
    %c0_i32_1 = arith.constant 0 : i32
    return %c0_i32, %c0_i32_0 : i32, i32
  }
  func.func @transform_3(%arg0: i32) -> (i32, i32) {
    %c0_i32 = arith.constant 0 : i32
    %c0_i32_0 = arith.constant 0 : i32
    %c0_i32_1 = arith.constant 0 : i32
    return %c0_i32, %c0_i32_0 : i32, i32
  }
}

</mosaic_0001>

<bundles_post_ra>
// kernel: _vis_seq_encoder_impl.2
= control target key start
LH: loop header
LB: loop body
LE: loop exit
PB: predicated region body
PF: predicated region fallthrough
CT: control target
= control target key end

     0   :  { %8 = vsyncpa [#allocation3], 0  ;;  %s342_s15 = smov [#allocation2]   ;;  %s343_s17 = smov 512   ;;  %s531_s0 = inlined_call_operand.vmem [shape: f32[64,128], index: 0, kind: input, shape index: {}]   ;;  %s532_s1 = inlined_call_operand.hbm [shape: f32[128,512], index: 1, kind: input, shape index: {}]   ;;  %s533_s2 = inlined_call_operand.vmem [shape: f32[1,512], index: 2, kind: input, shape index: {}]   ;;  %s534_s3 = inlined_call_operand.vmem [shape: f32[64,512], index: 3, kind: output, shape index: {}]  }
   0x1   :  { %s15_s14 = sshll.u32 %s532_s1, 4  ;;  %s17_s16 = sshll.u32 %s342_s15, 4  ;;  %s16_s14 = int_to_ptr.hbm [resolvable:$true] %s15_s14  ;;  %s18_s16 = int_to_ptr.vmem [resolvable:$true] %s17_s16 }
   0x2   :  { %s344_s18 = smov 32  }
   0x3   :  { %23 = dma.hbm_to_vmem [thread:$0]  %s16_s14, 8192, %s18_s16, [#allocation3], %s343_s17, %s343_s17, %s344_s18  }
   0x4   :  { %340 = dma.done.wait [#allocation3], 8192  }
   0x5   :  { %341 = vsyncadd [#allocation3], 4294959104  ;;  %v100_v0 = vld [vmem:[#allocation2 + $0x1f0] sm:$0xff]  ;;  %v101_v1 = vld [vmem:[#allocation2 + $0x1f8] sm:$0xff] }
   0x6   :  { %v96_v2 = vld [vmem:[#allocation2 + $0x1d0] sm:$0xff]  ;;  %194 = vmatpush.msra.mxu2 %v100_v0  ;;  %235 = vmatpush.msra.mxu3 %v101_v1  ;;  %v97_v3 = vld [vmem:[#allocation2 + $0x1d8] sm:$0xff]  ;;  %v98_v6 = vld [vmem:[#allocation2 + $0x1e0] sm:$0xff] }
   0x7   :  { %v92_v4 = vld [vmem:[#allocation2 + $0x1b0] sm:$0xff]  ;;  %v93_v5 = vld [vmem:[#allocation2 + $0x1b8] sm:$0xff]  ;;  %v99_v7 = vld [vmem:[#allocation2 + $0x1e8] sm:$0xff]  ;;  %112 = vmatpush.msra.mxu0 %v98_v6 }
   0x8   :  { %195 = vmatpush.msra.mxu2 %v96_v2  ;;  %236 = vmatpush.msra.mxu3 %v97_v3  ;;  %v94_v8 = vld [vmem:[#allocation2 + $0x1c0] sm:$0xff]  ;;  %v95_v9 = vld [vmem:[#allocation2 + $0x1c8] sm:$0xff]  ;;  %v88_v10 = vld [vmem:[#allocation2 + $0x190] sm:$0xff] }
   0x9   :  { %153 = vmatpush.msra.mxu1 %v99_v7  ;;  %v89_v11 = vld [vmem:[#allocation2 + $0x198] sm:$0xff]  ;;  %v90_v12 = vld [vmem:[#allocation2 + $0x1a0] sm:$0xff]  ;;  %v91_v13 = vld [vmem:[#allocation2 + $0x1a8] sm:$0xff]  ;;  %113 = vmatpush.msra.mxu0 %v94_v8 }
   0xa   :  { %196 = vmatpush.msra.mxu2 %v92_v4  ;;  %237 = vmatpush.msra.mxu3 %v93_v5  ;;  %v84_v14 = vld [vmem:[#allocation2 + $0x170] sm:$0xff]  ;;  %v85_v15 = vld [vmem:[#allocation2 + $0x178] sm:$0xff]  ;;  %v86_v16 = vld [vmem:[#allocation2 + $0x180] sm:$0xff] }
   0xb   :  { %154 = vmatpush.msra.mxu1 %v95_v9  ;;  %v87_v17 = vld [vmem:[#allocation2 + $0x188] sm:$0xff]  ;;  %114 = vmatpush.msra.mxu0 %v90_v12  ;;  %v80_v18 = vld [vmem:[#allocation2 + $0x150] sm:$0xff]  ;;  %v81_v19 = vld [vmem:[#allocation2 + $0x158] sm:$0xff] }
   0xc   :  { %197 = vmatpush.msra.mxu2 %v88_v10  ;;  %238 = vmatpush.msra.mxu3 %v89_v11  ;;  %v82_v20 = vld [vmem:[#allocation2 + $0x160] sm:$0xff]  ;;  %v83_v21 = vld [vmem:[#allocation2 + $0x168] sm:$0xff]  ;;  %v76_v22 = vld [vmem:[#allocation2 + $0x130] sm:$0xff] }
   0xd   :  { %155 = vmatpush.msra.mxu1 %v91_v13  ;;  %115 = vmatpush.msra.mxu0 %v86_v16  ;;  %v77_v23 = vld [vmem:[#allocation2 + $0x138] sm:$0xff]  ;;  %v78_v24 = vld [vmem:[#allocation2 + $0x140] sm:$0xff]  ;;  %v79_v25 = vld [vmem:[#allocation2 + $0x148] sm:$0xff] }
   0xe   :  { %198 = vmatpush.msra.mxu2 %v84_v14  ;;  %239 = vmatpush.msra.mxu3 %v85_v15  ;;  %v72_v26 = vld [vmem:[#allocation2 + $0x110] sm:$0xff]  ;;  %v73_v27 = vld [vmem:[#allocation2 + $0x118] sm:$0xff]  ;;  %v74_v28 = vld [vmem:[#allocation2 + $0x120] sm:$0xff] }
   0xf   :  { %156 = vmatpush.msra.mxu1 %v87_v17  ;;  %116 = vmatpush.msra.mxu0 %v82_v20  ;;  %v75_v29 = vld [vmem:[#allocation2 + $0x128] sm:$0xff]  ;;  %v68_v30 = vld [vmem:[#allocation2 + $0xf0] sm:$0xff]  ;;  %v69_v31 = vld [vmem:[#allocation2 + $0xf8] sm:$0xff] }
  0x10   :  { %199 = vmatpush.msra.mxu2 %v80_v18  ;;  %240 = vmatpush.msra.mxu3 %v81_v19  ;;  %v70_v32 = vld [vmem:[#allocation2 + $0x100] sm:$0xff]  ;;  %v71_v33 = vld [vmem:[#allocation2 + $0x108] sm:$0xff]  ;;  %v64_v34 = vld [vmem:[#allocation2 + $0xd0] sm:$0xff] }
  0x11   :  { %157 = vmatpush.msra.mxu1 %v83_v21  ;;  %117 = vmatpush.msra.mxu0 %v78_v24  ;;  %v65_v35 = vld [vmem:[#allocation2 + $0xd8] sm:$0xff]  ;;  %v66_v36 = vld [vmem:[#allocation2 + $0xe0] sm:$0xff]  ;;  %v67_v37 = vld [vmem:[#allocation2 + $0xe8] sm:$0xff] }
  0x12   :  { %200 = vmatpush.msra.mxu2 %v76_v22  ;;  %241 = vmatpush.msra.mxu3 %v77_v23  ;;  %v60_v38 = vld [vmem:[#allocation2 + $0xb0] sm:$0xff]  ;;  %v61_v39 = vld [vmem:[#allocation2 + $0xb8] sm:$0xff]  ;;  %v62_v40 = vld [vmem:[#allocation2 + $0xc0] sm:$0xff] }
  0x13   :  { %158 = vmatpush.msra.mxu1 %v79_v25  ;;  %118 = vmatpush.msra.mxu0 %v74_v28  ;;  %v63_v41 = vld [vmem:[#allocation2 + $0xc8] sm:$0xff]  ;;  %v56_v42 = vld [vmem:[#allocation2 + $0x90] sm:$0xff]  ;;  %v57_v43 = vld [vmem:[#allocation2 + $0x98] sm:$0xff] }
  0x14   :  { %201 = vmatpush.msra.mxu2 %v72_v26  ;;  %242 = vmatpush.msra.mxu3 %v73_v27  ;;  %v58_v44 = vld [vmem:[#allocation2 + $0xa0] sm:$0xff]  ;;  %v59_v45 = vld [vmem:[#allocation2 + $0xa8] sm:$0xff]  ;;  %v52_v46 = vld [vmem:[#allocation2 + $0x70] sm:$0xff] }
  0x15   :  { %159 = vmatpush.msra.mxu1 %v75_v29  ;;  %119 = vmatpush.msra.mxu0 %v70_v32  ;;  %v53_v47 = vld [vmem:[#allocation2 + $0x78] sm:$0xff]  ;;  %v54_v48 = vld [vmem:[#allocation2 + $0x80] sm:$0xff]  ;;  %v55_v49 = vld [vmem:[#allocation2 + $0x88] sm:$0xff] }
  0x16   :  { %202 = vmatpush.msra.mxu2 %v68_v30  ;;  %243 = vmatpush.msra.mxu3 %v69_v31  ;;  %v48_v50 = vld [vmem:[#allocation2 + $0x50] sm:$0xff]  ;;  %v49_v51 = vld [vmem:[#allocation2 + $0x58] sm:$0xff]  ;;  %v50_v52 = vld [vmem:[#allocation2 + $0x60] sm:$0xff] }
  0x17   :  { %160 = vmatpush.msra.mxu1 %v71_v33  ;;  %120 = vmatpush.msra.mxu0 %v66_v36  ;;  %v51_v53 = vld [vmem:[#allocation2 + $0x68] sm:$0xff]  ;;  %v44_v54 = vld [vmem:[#allocation2 + $0x30] sm:$0xff]  ;;  %v45_v55 = vld [vmem:[#allocation2 + $0x38] sm:$0xff] }
  0x18   :  { %203 = vmatpush.msra.mxu2 %v64_v34  ;;  %244 = vmatpush.msra.mxu3 %v65_v35  ;;  %v46_v56 = vld [vmem:[#allocation2 + $0x40] sm:$0xff]  ;;  %v47_v57 = vld [vmem:[#allocation2 + $0x48] sm:$0xff]  ;;  %v40_v58 = vld [vmem:[#allocation2 + $0x10] sm:$0xff] }
  0x19   :  { %161 = vmatpush.msra.mxu1 %v67_v37  ;;  %121 = vmatpush.msra.mxu0 %v62_v40  ;;  %v41_v59 = vld [vmem:[#allocation2 + $0x18] sm:$0xff]  ;;  %v30_v60 = vld [vmem:[%s531_s0] sm:$0xff]  ;;  %v43_v62 = vld [vmem:[#allocation2 + $0x28] sm:$0xff] }
  0x1a   :  { %204 = vmatpush.msra.mxu2 %v60_v38  ;;  %245 = vmatpush.msra.mxu3 %v61_v39  ;;  %v42_v61 = vld [vmem:[#allocation2 + $0x20] sm:$0xff]  ;;  %v39_v0 = vld [vmem:[#allocation2 + $0x8] sm:$0xff]  ;;  %v32_v2 = vld [vmem:[%s531_s0 + $0x10] sm:$0xff] }
  0x1b   :  { %162 = vmatpush.msra.mxu1 %v63_v41  ;;  %122 = vmatpush.msra.mxu0 %v58_v44  ;;  %v38_v63 = vld [vmem:[#allocation2] sm:$0xff]  ;;  %v31_v1 = vld [vmem:[%s531_s0 + $0x8] sm:$0xff]  ;;  %v33_v3 = vld [vmem:[%s531_s0 + $0x18] sm:$0xff] }
  0x1c   :  { %205 = vmatpush.msra.mxu2 %v56_v42  ;;  %246 = vmatpush.msra.mxu3 %v57_v43  ;;  %v34_v4 = vld [vmem:[%s531_s0 + $0x20] sm:$0xff]  ;;  %v35_v5 = vld [vmem:[%s531_s0 + $0x28] sm:$0xff]  ;;  %v36_v6 = vld [vmem:[%s531_s0 + $0x30] sm:$0xff] }
  0x1d   :  { %163 = vmatpush.msra.mxu1 %v59_v45  ;;  %123 = vmatpush.msra.mxu0 %v54_v48  ;;  %v37_v7 = vld [vmem:[%s531_s0 + $0x38] sm:$0xff]  ;;  %v102_v8 = vld [vmem:[%s533_s2] sm:$0xf] }
  0x1e   :  { %206 = vmatpush.msra.mxu2 %v52_v46  ;;  %247 = vmatpush.msra.mxu3 %v53_v47  ;;  %v395_v9 = vperm.slane %v102_v8, 0  ;;  %v397_v10 = vperm.slane %v102_v8, 1  ;;  %v399_v11 = vperm.slane %v102_v8, 2  ;;  %v401_v12 = vperm.slane %v102_v8, 3 }
  0x1f   :  { %164 = vmatpush.msra.mxu1 %v55_v49  ;;  %124 = vmatpush.msra.mxu0 %v50_v52 }
  0x20   :  { %207 = vmatpush.msra.mxu2 %v48_v50  ;;  %248 = vmatpush.msra.mxu3 %v49_v51 }
  0x21   :  { %165 = vmatpush.msra.mxu1 %v51_v53  ;;  %125 = vmatpush.msra.mxu0 %v46_v56 }
  0x22   :  { %208 = vmatpush.msra.mxu2 %v44_v54  ;;  %249 = vmatpush.msra.mxu3 %v45_v55 }
  0x23   :  { %166 = vmatpush.msra.mxu1 %v47_v57  ;;  %126 = vmatpush.msra.mxu0 %v42_v61 }
  0x24   :  { %209 = vmatpush.msra.mxu2 %v40_v58  ;;  %250 = vmatpush.msra.mxu3 %v41_v59 }
  0x25   :  { %210 = vmatmul.f32.vlgmr.msra.gmra.mxu2 %v30_v60  ;;  %251 = vmatmul.f32.vlgmr.msra.gmra.mxu3 %v30_v60 }
  0x26   :  { %167 = vmatpush.msra.mxu1 %v43_v62  ;;  %127 = vmatpush.msra.mxu0 %v38_v63 }
  0x27   :  { %128 = vmatmul.f32.vlgmr.msra.gmra.mxu0 %v30_v60 }
  0x28   :  { %168 = vmatpush.msra.mxu1 %v39_v0 }
  0x29   :  { %169 = vmatmul.f32.vlgmr.msra.gmra.mxu1 %v30_v60 }
  0x2d   :  { %213 = vmatmul.f32.gmra.mxu2 %v31_v1  ;;  %254 = vmatmul.f32.gmra.mxu3 %v31_v1 }
  0x2f   :  { %131 = vmatmul.f32.gmra.mxu0 %v31_v1 }
  0x31   :  { %172 = vmatmul.f32.gmra.mxu1 %v31_v1 }
  0x35   :  { %216 = vmatmul.f32.gmra.mxu2 %v32_v2  ;;  %257 = vmatmul.f32.gmra.mxu3 %v32_v2 }
  0x37   :  { %134 = vmatmul.f32.gmra.mxu0 %v32_v2 }
  0x39   :  { %175 = vmatmul.f32.gmra.mxu1 %v32_v2 }
  0x3d   :  { %219 = vmatmul.f32.gmra.mxu2 %v33_v3  ;;  %260 = vmatmul.f32.gmra.mxu3 %v33_v3 }
  0x3f   :  { %137 = vmatmul.f32.gmra.mxu0 %v33_v3 }
  0x41   :  { %178 = vmatmul.f32.gmra.mxu1 %v33_v3 }
  0x45   :  { %222 = vmatmul.f32.gmra.mxu2 %v34_v4  ;;  %263 = vmatmul.f32.gmra.mxu3 %v34_v4 }
  0x47   :  { %140 = vmatmul.f32.gmra.mxu0 %v34_v4 }
  0x49   :  { %181 = vmatmul.f32.gmra.mxu1 %v34_v4 }
  0x4d   :  { %225 = vmatmul.f32.gmra.mxu2 %v35_v5  ;;  %266 = vmatmul.f32.gmra.mxu3 %v35_v5 }
  0x4f   :  { %143 = vmatmul.f32.gmra.mxu0 %v35_v5 }
  0x51   :  { %184 = vmatmul.f32.gmra.mxu1 %v35_v5 }
  0x55   :  { %228 = vmatmul.f32.gmra.mxu2 %v36_v6  ;;  %269 = vmatmul.f32.gmra.mxu3 %v36_v6 }
  0x57   :  { %146 = vmatmul.f32.gmra.mxu0 %v36_v6 }
  0x59   :  { %187 = vmatmul.f32.gmra.mxu1 %v36_v6 }
  0x5d   :  { %231 = vmatmul.f32.gmra.mxu2 %v37_v7  ;;  %272 = vmatmul.f32.gmra.mxu3 %v37_v7 }
  0x5f   :  { %149 = vmatmul.f32.gmra.mxu0 %v37_v7 }
  0x61   :  { %190 = vmatmul.f32.gmra.mxu1 %v37_v7 }
  0xa4   :  { %v129_v13 = vpop.f32.mrf.mxu0 }
  0xa5   :  { %v130_v15 = vadd.f32 %v129_v13, %v395_v9 }
  0xa6   :  { %v170_v14 = vpop.f32.mrf.mxu1 }
  0xa7   :  { %v171_v16 = vadd.f32 %v170_v14, %v397_v10  ;;  %276 = vst [vmem:[%s534_s3] sm:$0xff] %v130_v15 }
  0xa8   :  { %v211_v17 = vpop.f32.mrf.mxu2  ;;  %v252_v18 = vpop.f32.mrf.mxu3 }
  0xa9   :  { %v212_v19 = vadd.f32 %v211_v17, %v399_v11  ;;  %v253_v20 = vadd.f32 %v252_v18, %v401_v12  ;;  %277 = vst [vmem:[%s534_s3 + $0x8] sm:$0xff] %v171_v16 }
  0xab   :  { %278 = vst [vmem:[%s534_s3 + $0x10] sm:$0xff] %v212_v19 }
  0xac   :  { %279 = vst [vmem:[%s534_s3 + $0x18] sm:$0xff] %v253_v20  ;;  %v132_v21 = vpop.f32.mrf.mxu0 }
  0xad   :  { %v133_v23 = vadd.f32 %v132_v21, %v395_v9 }
  0xae   :  { %v173_v22 = vpop.f32.mrf.mxu1 }
  0xaf   :  { %v174_v24 = vadd.f32 %v173_v22, %v397_v10  ;;  %280 = vst [vmem:[%s534_s3 + $0x20] sm:$0xff] %v133_v23 }
  0xb0   :  { %v214_v25 = vpop.f32.mrf.mxu2  ;;  %v255_v26 = vpop.f32.mrf.mxu3 }
  0xb1   :  { %v215_v27 = vadd.f32 %v214_v25, %v399_v11  ;;  %v256_v28 = vadd.f32 %v255_v26, %v401_v12  ;;  %281 = vst [vmem:[%s534_s3 + $0x28] sm:$0xff] %v174_v24 }
  0xb3   :  { %282 = vst [vmem:[%s534_s3 + $0x30] sm:$0xff] %v215_v27 }
  0xb4   :  { %283 = vst [vmem:[%s534_s3 + $0x38] sm:$0xff] %v256_v28  ;;  %v135_v29 = vpop.f32.mrf.mxu0 }
  0xb5   :  { %v136_v31 = vadd.f32 %v135_v29, %v395_v9 }
  0xb6   :  { %v176_v30 = vpop.f32.mrf.mxu1 }
  0xb7   :  { %v177_v32 = vadd.f32 %v176_v30, %v397_v10  ;;  %284 = vst [vmem:[%s534_s3 + $0x40] sm:$0xff] %v136_v31 }
  0xb8   :  { %v217_v33 = vpop.f32.mrf.mxu2  ;;  %v258_v34 = vpop.f32.mrf.mxu3 }
  0xb9   :  { %v218_v35 = vadd.f32 %v217_v33, %v399_v11  ;;  %v259_v36 = vadd.f32 %v258_v34, %v401_v12  ;;  %285 = vst [vmem:[%s534_s3 + $0x48] sm:$0xff] %v177_v32 }
  0xbb   :  { %286 = vst [vmem:[%s534_s3 + $0x50] sm:$0xff] %v218_v35 }
  0xbc   :  { %287 = vst [vmem:[%s534_s3 + $0x58] sm:$0xff] %v259_v36  ;;  %v138_v37 = vpop.f32.mrf.mxu0 }
  0xbd   :  { %v139_v39 = vadd.f32 %v138_v37, %v395_v9 }
  0xbe   :  { %v179_v38 = vpop.f32.mrf.mxu1 }
  0xbf   :  { %v180_v40 = vadd.f32 %v179_v38, %v397_v10  ;;  %288 = vst [vmem:[%s534_s3 + $0x60] sm:$0xff] %v139_v39 }
  0xc0   :  { %v220_v41 = vpop.f32.mrf.mxu2  ;;  %v261_v42 = vpop.f32.mrf.mxu3 }
  0xc1   :  { %v221_v43 = vadd.f32 %v220_v41, %v399_v11  ;;  %v262_v44 = vadd.f32 %v261_v42, %v401_v12  ;;  %289 = vst [vmem:[%s534_s3 + $0x68] sm:$0xff] %v180_v40 }
  0xc3   :  { %290 = vst [vmem:[%s534_s3 + $0x70] sm:$0xff] %v221_v43 }
  0xc4   :  { %291 = vst [vmem:[%s534_s3 + $0x78] sm:$0xff] %v262_v44  ;;  %v141_v45 = vpop.f32.mrf.mxu0 }
  0xc5   :  { %v142_v47 = vadd.f32 %v141_v45, %v395_v9 }
  0xc6   :  { %v182_v46 = vpop.f32.mrf.mxu1 }
  0xc7   :  { %v183_v48 = vadd.f32 %v182_v46, %v397_v10  ;;  %292 = vst [vmem:[%s534_s3 + $0x80] sm:$0xff] %v142_v47 }
  0xc8   :  { %v223_v49 = vpop.f32.mrf.mxu2  ;;  %v264_v50 = vpop.f32.mrf.mxu3 }
  0xc9   :  { %v224_v51 = vadd.f32 %v223_v49, %v399_v11  ;;  %v265_v52 = vadd.f32 %v264_v50, %v401_v12  ;;  %293 = vst [vmem:[%s534_s3 + $0x88] sm:$0xff] %v183_v48 }
  0xcb   :  { %294 = vst [vmem:[%s534_s3 + $0x90] sm:$0xff] %v224_v51 }
  0xcc   :  { %295 = vst [vmem:[%s534_s3 + $0x98] sm:$0xff] %v265_v52  ;;  %v144_v53 = vpop.f32.mrf.mxu0 }
  0xcd   :  { %v145_v55 = vadd.f32 %v144_v53, %v395_v9 }
  0xce   :  { %v185_v54 = vpop.f32.mrf.mxu1 }
  0xcf   :  { %v186_v56 = vadd.f32 %v185_v54, %v397_v10  ;;  %296 = vst [vmem:[%s534_s3 + $0xa0] sm:$0xff] %v145_v55 }
  0xd0   :  { %v226_v57 = vpop.f32.mrf.mxu2  ;;  %v267_v58 = vpop.f32.mrf.mxu3 }
  0xd1   :  { %v227_v59 = vadd.f32 %v226_v57, %v399_v11  ;;  %v268_v60 = vadd.f32 %v267_v58, %v401_v12  ;;  %297 = vst [vmem:[%s534_s3 + $0xa8] sm:$0xff] %v186_v56 }
  0xd3   :  { %298 = vst [vmem:[%s534_s3 + $0xb0] sm:$0xff] %v227_v59 }
  0xd4   :  { %299 = vst [vmem:[%s534_s3 + $0xb8] sm:$0xff] %v268_v60  ;;  %v147_v61 = vpop.f32.mrf.mxu0 }
  0xd5   :  { %v148_v63 = vadd.f32 %v147_v61, %v395_v9 }
  0xd6   :  { %v188_v62 = vpop.f32.mrf.mxu1 }
  0xd7   :  { %v189_v0 = vadd.f32 %v188_v62, %v397_v10  ;;  %300 = vst [vmem:[%s534_s3 + $0xc0] sm:$0xff] %v148_v63 }
  0xd8   :  { %v229_v1 = vpop.f32.mrf.mxu2  ;;  %v270_v2 = vpop.f32.mrf.mxu3 }
  0xd9   :  { %v230_v3 = vadd.f32 %v229_v1, %v399_v11  ;;  %v271_v4 = vadd.f32 %v270_v2, %v401_v12  ;;  %301 = vst [vmem:[%s534_s3 + $0xc8] sm:$0xff] %v189_v0 }
  0xdb   :  { %302 = vst [vmem:[%s534_s3 + $0xd0] sm:$0xff] %v230_v3 }
  0xdc   :  { %303 = vst [vmem:[%s534_s3 + $0xd8] sm:$0xff] %v271_v4  ;;  %v150_v5 = vpop.f32.mrf.mxu0 }
  0xdd   :  { %v151_v7 = vadd.f32 %v150_v5, %v395_v9 }
  0xde   :  { %v191_v6 = vpop.f32.mrf.mxu1 }
  0xdf   :  { %v192_v8 = vadd.f32 %v191_v6, %v397_v10  ;;  %304 = vst [vmem:[%s534_s3 + $0xe0] sm:$0xff] %v151_v7 }
  0xe0   :  { %v232_v13 = vpop.f32.mrf.mxu2  ;;  %v273_v14 = vpop.f32.mrf.mxu3 }
  0xe1   :  { %v233_v15 = vadd.f32 %v232_v13, %v399_v11  ;;  %v274_v16 = vadd.f32 %v273_v14, %v401_v12  ;;  %305 = vst [vmem:[%s534_s3 + $0xe8] sm:$0xff] %v192_v8 }
  0xe3   :  { %306 = vst [vmem:[%s534_s3 + $0xf0] sm:$0xff] %v233_v15 }
  0xe4   :  { %307 = vst [vmem:[%s534_s3 + $0xf8] sm:$0xff] %v274_v16 }
  0xe5   :  { %312 = vsyncpa [#allocation3], 1 }

// kernel: _vis_seq_encoder_impl.3
= control target key start
LH: loop header
LB: loop body
LE: loop exit
PB: predicated region body
PF: predicated region fallthrough
CT: control target
= control target key end

     0   :  { %8 = vsyncpa [#allocation5], 0  ;;  %s1679_s15 = smov [#allocation4]   ;;  %s1680_s17 = smov 512   ;;  %s2656_s0 = inlined_call_operand.vmem [shape: s32[8,1], index: 0, kind: input, shape index: {}]   ;;  %s2657_s1 = inlined_call_operand.vmem [shape: f32[8,8,512], index: 1, kind: input, shape index: {}]   ;;  %s2658_s2 = inlined_call_operand.hbm [shape: f32[128,512], index: 2, kind: input, shape index: {}]   ;;  %s2659_s3 = inlined_call_operand.vmem [shape: f32[8,128], index: 3, kind: output, shape index: {}]  }
   0x1   :  { %s17_s14 = sshll.u32 %s2658_s2, 4  ;;  %s19_s16 = sshll.u32 %s1679_s15, 4  ;;  %s18_s14 = int_to_ptr.hbm [resolvable:$true] %s17_s14  ;;  %s20_s16 = int_to_ptr.vmem [resolvable:$true] %s19_s16 }
   0x2   :  { %s1681_s18 = smov 32  }
   0x3   :  { %25 = dma.hbm_to_vmem [thread:$0]  %s18_s14, 8192, %s20_s16, [#allocation5], %s1680_s17, %s1680_s17, %s1681_s18  }
   0x4   :  { %1677 = dma.done.wait [#allocation5], 8192  }
   0x5   :  { %1678 = vsyncadd [#allocation5], 4294959104  ;;  %v1707_v0 = vld [vmem:[#allocation4 + $0x1e0] sm:$0xff]  ;;  %v1709_v1 = vld [vmem:[#allocation4 + $0x1e8] sm:$0xff]  ;;  %v1682_v61 = vmov 0.0   ;;  %v2666_v62 = vmov 0  }
   0x6   :  { %v1711_v2 = vld [vmem:[#allocation4 + $0x1f8] sm:$0xff]  ;;  %110 = vmatpush.msra.mxu0 %v1707_v0  ;;  %130 = vmatpush.msra.mxu1 %v1709_v1  ;;  %v1715_v3 = vld [vmem:[#allocation4 + $0x1c0] sm:$0xff]  ;;  %v1717_v4 = vld [vmem:[#allocation4 + $0x1c8] sm:$0xff] }
   0x7   :  { %v1719_v5 = vld [vmem:[#allocation4 + $0x1d8] sm:$0xff]  ;;  %170 = vmatpush.msra.mxu3 %v1711_v2  ;;  %v1722_v6 = vld [vmem:[#allocation4 + $0x1a0] sm:$0xff]  ;;  %v1724_v7 = vld [vmem:[#allocation4 + $0x1a8] sm:$0xff]  ;;  %1457 = vset.pattern.permute.xlu0 %v2666_v62 }
   0x8   :  { %111 = vmatpush.msra.mxu0 %v1715_v3  ;;  %131 = vmatpush.msra.mxu1 %v1717_v4  ;;  %v1728_v8 = vld [vmem:[#allocation4 + $0x1b8] sm:$0xff]  ;;  %v1731_v9 = vld [vmem:[#allocation4 + $0x180] sm:$0xff]  ;;  %v1733_v10 = vld [vmem:[#allocation4 + $0x188] sm:$0xff] }
   0x9   :  { %171 = vmatpush.msra.mxu3 %v1719_v5  ;;  %v1737_v11 = vld [vmem:[#allocation4 + $0x198] sm:$0xff]  ;;  %v1740_v12 = vld [vmem:[#allocation4 + $0x160] sm:$0xff]  ;;  %v1742_v13 = vld [vmem:[#allocation4 + $0x168] sm:$0xff] }
   0xa   :  { %112 = vmatpush.msra.mxu0 %v1722_v6  ;;  %132 = vmatpush.msra.mxu1 %v1724_v7  ;;  %v1746_v14 = vld [vmem:[#allocation4 + $0x178] sm:$0xff]  ;;  %v1749_v15 = vld [vmem:[#allocation4 + $0x140] sm:$0xff]  ;;  %v1751_v16 = vld [vmem:[#allocation4 + $0x148] sm:$0xff] }
   0xb   :  { %172 = vmatpush.msra.mxu3 %v1728_v8  ;;  %v1753_v17 = vld [vmem:[#allocation4 + $0x1f0] sm:$0xff]  ;;  %v1757_v18 = vld [vmem:[#allocation4 + $0x158] sm:$0xff]  ;;  %v1762_v20 = vld [vmem:[#allocation4 + $0x120] sm:$0xff] }
   0xc   :  { %113 = vmatpush.msra.mxu0 %v1731_v9  ;;  %133 = vmatpush.msra.mxu1 %v1733_v10  ;;  %v1759_v19 = vld [vmem:[#allocation4 + $0x1d0] sm:$0xff]  ;;  %v1764_v21 = vld [vmem:[#allocation4 + $0x128] sm:$0xff]  ;;  %v1769_v22 = vld [vmem:[#allocation4 + $0x138] sm:$0xff] }
   0xd   :  { %173 = vmatpush.msra.mxu3 %v1737_v11  ;;  %150 = vmatpush.msra.mxu2 %v1753_v17  ;;  %v1771_v23 = vld [vmem:[#allocation4 + $0x1b0] sm:$0xff]  ;;  %v1774_v24 = vld [vmem:[#allocation4 + $0x100] sm:$0xff]  ;;  %v1776_v25 = vld [vmem:[#allocation4 + $0x108] sm:$0xff] }
   0xe   :  { %114 = vmatpush.msra.mxu0 %v1740_v12  ;;  %134 = vmatpush.msra.mxu1 %v1742_v13  ;;  %v1781_v26 = vld [vmem:[#allocation4 + $0x118] sm:$0xff]  ;;  %v1783_v27 = vld [vmem:[#allocation4 + $0x190] sm:$0xff]  ;;  %v1786_v28 = vld [vmem:[#allocation4 + $0xe0] sm:$0xff] }
   0xf   :  { %174 = vmatpush.msra.mxu3 %v1746_v14  ;;  %151 = vmatpush.msra.mxu2 %v1759_v19  ;;  %v1788_v29 = vld [vmem:[#allocation4 + $0xe8] sm:$0xff]  ;;  %v1793_v30 = vld [vmem:[#allocation4 + $0xf8] sm:$0xff]  ;;  %v1795_v31 = vld [vmem:[#allocation4 + $0x170] sm:$0xff] }
  0x10   :  { %115 = vmatpush.msra.mxu0 %v1749_v15  ;;  %135 = vmatpush.msra.mxu1 %v1751_v16  ;;  %v1798_v32 = vld [vmem:[#allocation4 + $0xc0] sm:$0xff]  ;;  %v1800_v33 = vld [vmem:[#allocation4 + $0xc8] sm:$0xff]  ;;  %v1805_v34 = vld [vmem:[#allocation4 + $0xd8] sm:$0xff] }
  0x11   :  { %175 = vmatpush.msra.mxu3 %v1757_v18  ;;  %152 = vmatpush.msra.mxu2 %v1771_v23  ;;  %2777 = vst [vmem:[#allocation7_spill] sm:$0xff] %v1800_v33  ;;  %v1807_v35 = vld [vmem:[#allocation4 + $0x150] sm:$0xff]  ;;  %v1810_v36 = vld [vmem:[#allocation4 + $0xa0] sm:$0xff]  ;;  %v1812_v37 = vld [vmem:[#allocation4 + $0xa8] sm:$0xff] }
  0x12   :  { %116 = vmatpush.msra.mxu0 %v1762_v20  ;;  %136 = vmatpush.msra.mxu1 %v1764_v21  ;;  %2778 = vst [vmem:[#allocation8_spill] sm:$0xff] %v1805_v34  ;;  %v1817_v38 = vld [vmem:[#allocation4 + $0xb8] sm:$0xff]  ;;  %v1819_v39 = vld [vmem:[#allocation4 + $0x130] sm:$0xff]  ;;  %v1822_v40 = vld [vmem:[#allocation4 + $0x80] sm:$0xff] }
  0x13   :  { %176 = vmatpush.msra.mxu3 %v1769_v22  ;;  %153 = vmatpush.msra.mxu2 %v1783_v27  ;;  %2779 = vst [vmem:[#allocation9_spill] sm:$0xff] %v1810_v36  ;;  %v1824_v41 = vld [vmem:[#allocation4 + $0x88] sm:$0xff]  ;;  %v1829_v42 = vld [vmem:[#allocation4 + $0x98] sm:$0xff]  ;;  %v1831_v43 = vld [vmem:[#allocation4 + $0x110] sm:$0xff] }
  0x14   :  { %117 = vmatpush.msra.mxu0 %v1774_v24  ;;  %137 = vmatpush.msra.mxu1 %v1776_v25  ;;  %2780 = vst [vmem:[#allocation10_spill] sm:$0xff] %v1812_v37  ;;  %v1834_v44 = vld [vmem:[#allocation4 + $0x60] sm:$0xff]  ;;  %v1836_v45 = vld [vmem:[#allocation4 + $0x68] sm:$0xff]  ;;  %v1841_v46 = vld [vmem:[#allocation4 + $0x78] sm:$0xff] }
  0x15   :  { %177 = vmatpush.msra.mxu3 %v1781_v26  ;;  %154 = vmatpush.msra.mxu2 %v1795_v31  ;;  %2781 = vst [vmem:[#allocation11_spill] sm:$0xff] %v1817_v38  ;;  %v1843_v47 = vld [vmem:[#allocation4 + $0xf0] sm:$0xff]  ;;  %v1846_v48 = vld [vmem:[#allocation4 + $0x40] sm:$0xff]  ;;  %v1848_v49 = vld [vmem:[#allocation4 + $0x48] sm:$0xff] }
  0x16   :  { %118 = vmatpush.msra.mxu0 %v1786_v28  ;;  %138 = vmatpush.msra.mxu1 %v1788_v29  ;;  %2782 = vst [vmem:[#allocation12_spill] sm:$0xff] %v1822_v40  ;;  %v1853_v50 = vld [vmem:[#allocation4 + $0x58] sm:$0xff]  ;;  %v1855_v51 = vld [vmem:[#allocation4 + $0xd0] sm:$0xff]  ;;  %v1858_v52 = vld [vmem:[#allocation4 + $0x20] sm:$0xff] }
  0x17   :  { %178 = vmatpush.msra.mxu3 %v1793_v30  ;;  %2783 = vst [vmem:[#allocation13_spill] sm:$0xff] %v1824_v41  ;;  %155 = vmatpush.msra.mxu2 %v1807_v35  ;;  %v1860_v53 = vld [vmem:[#allocation4 + $0x28] sm:$0xff]  ;;  %v1866_v54 = vld [vmem:[%s2656_s0] sm:$0xff]  ;;  %v1870_v55 = vld [vmem:[#allocation4 + $0x38] sm:$0xff] }
  0x18   :  { %119 = vmatpush.msra.mxu0 %v1798_v32  ;;  %139 = vmatpush.msra.mxu1 %v1800_v33  ;;  %2784 = vst [vmem:[#allocation14_spill] sm:$0xff] %v1829_v42  ;;  %v1872_v56 = vld [vmem:[#allocation4 + $0xb0] sm:$0xff]  ;;  %v1875_v57 = vld [vmem:[#allocation4] sm:$0xff]  ;;  %v1877_v58 = vld [vmem:[#allocation4 + $0x8] sm:$0xff]  ;;  %vm258_vm0 = vcmp.eq.s32.totalorder %v1866_v54, 0 }
  0x19   :  { %179 = vmatpush.msra.mxu3 %v1805_v34  ;;  %2785 = vst [vmem:[#allocation15_spill] sm:$0xff] %v1834_v44  ;;  %156 = vmatpush.msra.mxu2 %v1819_v39  ;;  %v1882_v59 = vld [vmem:[#allocation4 + $0x18] sm:$0xff]  ;;  %v1889_v60 = vld [vmem:[#allocation4 + $0x90] sm:$0xff]  ;;  %v259_v63 = vsel %vm258_vm0, 1, %v2666_v62 }
  0x1a   :  { %120 = vmatpush.msra.mxu0 %v1810_v36  ;;  %140 = vmatpush.msra.mxu1 %v1812_v37  ;;  %2786 = vst [vmem:[#allocation16_spill] sm:$0xff] %v1836_v45  ;;  %v1908_v62 = vld [vmem:[#allocation4 + $0x10] sm:$0xff] }
  0x1b   :  { %180 = vmatpush.msra.mxu3 %v1817_v38  ;;  %2787 = vst [vmem:[#allocation17_spill] sm:$0xff] %v1841_v46  ;;  %157 = vmatpush.msra.mxu2 %v1831_v43 }
  0x1c   :  { %121 = vmatpush.msra.mxu0 %v1822_v40  ;;  %141 = vmatpush.msra.mxu1 %v1824_v41  ;;  %2788 = vst [vmem:[#allocation18_spill] sm:$0xff] %v1846_v48 }
  0x1d   :  { %181 = vmatpush.msra.mxu3 %v1829_v42  ;;  %2789 = vst [vmem:[#allocation19_spill] sm:$0xff] %v1848_v49  ;;  %158 = vmatpush.msra.mxu2 %v1843_v47 }
  0x1e   :  { %122 = vmatpush.msra.mxu0 %v1834_v44  ;;  %142 = vmatpush.msra.mxu1 %v1836_v45  ;;  %2790 = vst [vmem:[#allocation20_spill] sm:$0xff] %v1853_v50 }
  0x1f   :  { %2791 = vst [vmem:[#allocation21_spill] sm:$0xff] %v1855_v51  ;;  %182 = vmatpush.msra.mxu3 %v1841_v46  ;;  %159 = vmatpush.msra.mxu2 %v1855_v51 }
  0x20   :  { %2792 = vst [vmem:[#allocation22_spill] sm:$0xff] %v1858_v52  ;;  %123 = vmatpush.msra.mxu0 %v1846_v48  ;;  %143 = vmatpush.msra.mxu1 %v1848_v49 }
  0x21   :  { %2793 = vst [vmem:[#allocation23_spill] sm:$0xff] %v1860_v53  ;;  %183 = vmatpush.msra.mxu3 %v1853_v50  ;;  %160 = vmatpush.msra.mxu2 %v1872_v56 }
  0x22   :  { %2794 = vst [vmem:[#allocation24_spill] sm:$0xff] %v1866_v54  ;;  %124 = vmatpush.msra.mxu0 %v1858_v52  ;;  %144 = vmatpush.msra.mxu1 %v1860_v53  ;;  %v1893_v54 = vld [vmem:[#allocation4 + $0x70] sm:$0xff] }
  0x23   :  { %2795 = vst [vmem:[#allocation25_spill] sm:$0xff] %v1870_v55  ;;  %184 = vmatpush.msra.mxu3 %v1870_v55  ;;  %161 = vmatpush.msra.mxu2 %v1889_v60 }
  0x24   :  { %2796 = vst [vmem:[#allocation26_spill] sm:$0xff] %v1872_v56  ;;  %125 = vmatpush.msra.mxu0 %v1875_v57  ;;  %145 = vmatpush.msra.mxu1 %v1877_v58 }
  0x25   :  { %2797 = vst [vmem:[#allocation27_spill] sm:$0xff] %v1875_v57  ;;  %185 = vmatpush.msra.mxu3 %v1882_v59  ;;  %126 = vmatmul.f32.vlgmr.msra.gmra.mxu0 %v1682_v61  ;;  %v1897_v57 = vld [vmem:[#allocation4 + $0x50] sm:$0xff] }
  0x26   :  { %2798 = vst [vmem:[#allocation28_spill] sm:$0xff] %v1877_v58  ;;  %146 = vmatmul.f32.vlgmr.msra.gmra.mxu1 %v1682_v61  ;;  %186 = vmatmul.f32.vlgmr.msra.gmra.mxu3 %v1682_v61 }
  0x27   :  { %2799 = vst [vmem:[#allocation29_spill] sm:$0xff] %v1882_v59  ;;  %261 = vperm.xlu0 %1457, %v259_v63   ;;  %270 = vmatpush.msrb.mxu0 %v1707_v0  ;;  %v1902_v59 = vld [vmem:[#allocation4 + $0x30] sm:$0xff] }
  0x28   :  { %2800 = vst [vmem:[#allocation30_spill] sm:$0xff] %v1889_v60  ;;  %162 = vmatpush.msra.mxu2 %v1893_v54  ;;  %290 = vmatpush.msrb.mxu1 %v1709_v1 }
  0x29   :  { %2801 = vst [vmem:[#allocation31_spill] sm:$0xff] %v1893_v54  ;;  %330 = vmatpush.msrb.mxu3 %v1711_v2  ;;  %271 = vmatpush.msrb.mxu0 %v1715_v3 }
  0x2a   :  { %2802 = vst [vmem:[#allocation32_spill] sm:$0xff] %v1897_v57  ;;  %163 = vmatpush.msra.mxu2 %v1897_v57  ;;  %291 = vmatpush.msrb.mxu1 %v1717_v4 }
  0x2b   :  { %2803 = vst [vmem:[#allocation33_spill] sm:$0xff] %v1902_v59  ;;  %331 = vmatpush.msrb.mxu3 %v1719_v5  ;;  %272 = vmatpush.msrb.mxu0 %v1722_v6 }
  0x2c   :  { %2804 = vst [vmem:[#allocation34_spill] sm:$0xff] %v1908_v62  ;;  %164 = vmatpush.msra.mxu2 %v1902_v59  ;;  %292 = vmatpush.msrb.mxu1 %v1724_v7 }
  0x2d   :  { %332 = vmatpush.msrb.mxu3 %v1728_v8  ;;  %273 = vmatpush.msrb.mxu0 %v1731_v9 }
  0x2e   :  { %165 = vmatpush.msra.mxu2 %v1908_v62  ;;  %293 = vmatpush.msrb.mxu1 %v1733_v10  ;;  %v2806_v63 = vld [vmem:[#allocation29_spill] sm:$0xff] }
  0x2f   :  { %166 = vmatmul.f32.vlgmr.msra.gmra.mxu2 %v1682_v61  ;;  %333 = vmatpush.msrb.mxu3 %v1737_v11  ;;  %v2805_v61 = vld [vmem:[#allocation27_spill] sm:$0xff] }
  0x30   :  { %310 = vmatpush.msrb.mxu2 %v1753_v17  ;;  %274 = vmatpush.msrb.mxu0 %v1740_v12 }
  0x31   :  { %294 = vmatpush.msrb.mxu1 %v1742_v13  ;;  %334 = vmatpush.msrb.mxu3 %v1746_v14 }
  0x32   :  { %311 = vmatpush.msrb.mxu2 %v1759_v19  ;;  %275 = vmatpush.msrb.mxu0 %v1749_v15 }
  0x33   :  { %295 = vmatpush.msrb.mxu1 %v1751_v16  ;;  %335 = vmatpush.msrb.mxu3 %v1757_v18 }
  0x34   :  { %312 = vmatpush.msrb.mxu2 %v1771_v23  ;;  %276 = vmatpush.msrb.mxu0 %v1762_v20 }
  0x35   :  { %296 = vmatpush.msrb.mxu1 %v1764_v21  ;;  %336 = vmatpush.msrb.mxu3 %v1769_v22 }
  0x36   :  { %313 = vmatpush.msrb.mxu2 %v1783_v27  ;;  %277 = vmatpush.msrb.mxu0 %v1774_v24 }
  0x37   :  { %297 = vmatpush.msrb.mxu1 %v1776_v25  ;;  %337 = vmatpush.msrb.mxu3 %v1781_v26 }
  0x38   :  { %314 = vmatpush.msrb.mxu2 %v1795_v31  ;;  %278 = vmatpush.msrb.mxu0 %v1786_v28 }
  0x39   :  { %298 = vmatpush.msrb.mxu1 %v1788_v29  ;;  %338 = vmatpush.msrb.mxu3 %v1793_v30 }
  0x3a   :  { %315 = vmatpush.msrb.mxu2 %v1807_v35  ;;  %279 = vmatpush.msrb.mxu0 %v1798_v32 }
  0x3b   :  { %299 = vmatpush.msrb.mxu1 %v1800_v33  ;;  %339 = vmatpush.msrb.mxu3 %v1805_v34 }
  0x3c   :  { %316 = vmatpush.msrb.mxu2 %v1819_v39  ;;  %280 = vmatpush.msrb.mxu0 %v1810_v36 }
  0x3d   :  { %300 = vmatpush.msrb.mxu1 %v1812_v37  ;;  %340 = vmatpush.msrb.mxu3 %v1817_v38 }
  0x3e   :  { %317 = vmatpush.msrb.mxu2 %v1831_v43  ;;  %281 = vmatpush.msrb.mxu0 %v1822_v40 }
  0x3f   :  { %301 = vmatpush.msrb.mxu1 %v1824_v41  ;;  %341 = vmatpush.msrb.mxu3 %v1829_v42 }
  0x40   :  { %318 = vmatpush.msrb.mxu2 %v1843_v47  ;;  %282 = vmatpush.msrb.mxu0 %v1834_v44 }
  0x41   :  { %302 = vmatpush.msrb.mxu1 %v1836_v45  ;;  %342 = vmatpush.msrb.mxu3 %v1841_v46 }
  0x42   :  { %319 = vmatpush.msrb.mxu2 %v1855_v51  ;;  %283 = vmatpush.msrb.mxu0 %v1846_v48 }
  0x43   :  { %303 = vmatpush.msrb.mxu1 %v1848_v49  ;;  %343 = vmatpush.msrb.mxu3 %v1853_v50 }
  0x44   :  { %320 = vmatpush.msrb.mxu2 %v1872_v56  ;;  %284 = vmatpush.msrb.mxu0 %v1858_v52 }
  0x45   :  { %304 = vmatpush.msrb.mxu1 %v1860_v53  ;;  %344 = vmatpush.msrb.mxu3 %v1870_v55 }
  0x46   :  { %321 = vmatpush.msrb.mxu2 %v1889_v60  ;;  %285 = vmatpush.msrb.mxu0 %v2805_v61 }
  0x47   :  { %305 = vmatpush.msrb.mxu1 %v1877_v58  ;;  %345 = vmatpush.msrb.mxu3 %v2806_v63 }
  0x48   :  { %322 = vmatpush.msrb.mxu2 %v1893_v54  ;;  %431 = vmatpush.msra.mxu0 %v1707_v0 }
  0x49   :  { %451 = vmatpush.msra.mxu1 %v1709_v1  ;;  %491 = vmatpush.msra.mxu3 %v1711_v2 }
  0x4a   :  { %323 = vmatpush.msrb.mxu2 %v1897_v57  ;;  %432 = vmatpush.msra.mxu0 %v1715_v3 }
  0x4b   :  { %452 = vmatpush.msra.mxu1 %v1717_v4  ;;  %492 = vmatpush.msra.mxu3 %v1719_v5 }
  0x4c   :  { %324 = vmatpush.msrb.mxu2 %v1902_v59  ;;  %433 = vmatpush.msra.mxu0 %v1722_v6 }
  0x4d   :  { %453 = vmatpush.msra.mxu1 %v1724_v7  ;;  %493 = vmatpush.msra.mxu3 %v1728_v8 }
  0x4e   :  { %325 = vmatpush.msrb.mxu2 %v1908_v62  ;;  %434 = vmatpush.msra.mxu0 %v1731_v9 }
  0x4f   :  { %454 = vmatpush.msra.mxu1 %v1733_v10  ;;  %494 = vmatpush.msra.mxu3 %v1737_v11 }
  0x50   :  { %471 = vmatpush.msra.mxu2 %v1753_v17  ;;  %435 = vmatpush.msra.mxu0 %v1740_v12 }
  0x51   :  { %455 = vmatpush.msra.mxu1 %v1742_v13  ;;  %495 = vmatpush.msra.mxu3 %v1746_v14 }
  0x52   :  { %472 = vmatpush.msra.mxu2 %v1759_v19  ;;  %436 = vmatpush.msra.mxu0 %v1749_v15 }
  0x53   :  { %456 = vmatpush.msra.mxu1 %v1751_v16  ;;  %496 = vmatpush.msra.mxu3 %v1757_v18 }
  0x54   :  { %473 = vmatpush.msra.mxu2 %v1771_v23  ;;  %437 = vmatpush.msra.mxu0 %v1762_v20 }
  0x55   :  { %457 = vmatpush.msra.mxu1 %v1764_v21  ;;  %497 = vmatpush.msra.mxu3 %v1769_v22 }
  0x56   :  { %474 = vmatpush.msra.mxu2 %v1783_v27  ;;  %438 = vmatpush.msra.mxu0 %v1774_v24 }
  0x57   :  { %458 = vmatpush.msra.mxu1 %v1776_v25  ;;  %498 = vmatpush.msra.mxu3 %v1781_v26 }
  0x58   :  { %475 = vmatpush.msra.mxu2 %v1795_v31  ;;  %439 = vmatpush.msra.mxu0 %v1786_v28 }
  0x59   :  { %459 = vmatpush.msra.mxu1 %v1788_v29  ;;  %499 = vmatpush.msra.mxu3 %v1793_v30 }
  0x5a   :  { %476 = vmatpush.msra.mxu2 %v1807_v35  ;;  %440 = vmatpush.msra.mxu0 %v1798_v32 }
  0x5b   :  { %460 = vmatpush.msra.mxu1 %v1800_v33  ;;  %500 = vmatpush.msra.mxu3 %v1805_v34 }
  0x5c   :  { %477 = vmatpush.msra.mxu2 %v1819_v39  ;;  %441 = vmatpush.msra.mxu0 %v1810_v36 }
  0x5d   :  { %461 = vmatpush.msra.mxu1 %v1812_v37  ;;  %501 = vmatpush.msra.mxu3 %v1817_v38 }
  0x5e   :  { %478 = vmatpush.msra.mxu2 %v1831_v43  ;;  %442 = vmatpush.msra.mxu0 %v1822_v40 }
  0x5f   :  { %462 = vmatpush.msra.mxu1 %v1824_v41  ;;  %502 = vmatpush.msra.mxu3 %v1829_v42 }
  0x60   :  { %479 = vmatpush.msra.mxu2 %v1843_v47  ;;  %443 = vmatpush.msra.mxu0 %v1834_v44 }
  0x61   :  { %463 = vmatpush.msra.mxu1 %v1836_v45  ;;  %503 = vmatpush.msra.mxu3 %v1841_v46 }
  0x62   :  { %480 = vmatpush.msra.mxu2 %v1855_v51  ;;  %444 = vmatpush.msra.mxu0 %v1846_v48  ;;  %v2807_v48 = vmov 0  }
  0x63   :  { %464 = vmatpush.msra.mxu1 %v1848_v49  ;;  %504 = vmatpush.msra.mxu3 %v1853_v50 }
  0x64   :  { %481 = vmatpush.msra.mxu2 %v1872_v56  ;;  %445 = vmatpush.msra.mxu0 %v1858_v52 }
  0x65   :  { %465 = vmatpush.msra.mxu1 %v1860_v53  ;;  %505 = vmatpush.msra.mxu3 %v1870_v55 }
  0x66   :  { %482 = vmatpush.msra.mxu2 %v1889_v60  ;;  %446 = vmatpush.msra.mxu0 %v2805_v61  ;;  %v106_v61 = vld [vmem:[%s2657_s1] sm:$0xff] }
  0x67   :  { %466 = vmatpush.msra.mxu1 %v1877_v58  ;;  %506 = vmatpush.msra.mxu3 %v2806_v63  ;;  %v107_v58 = vld [vmem:[%s2657_s1 + $0x8] sm:$0xff] }
  0x68   :  { %483 = vmatpush.msra.mxu2 %v1893_v54  ;;  %1458 = vset.pattern.permute.xlu1 %v2807_v48 }
  0x69   :  { %1459 = vset.pattern.permute.xlu2 %v2807_v48 }
  0x6a   :  { %484 = vmatpush.msra.mxu2 %v1897_v57 }
  0x6c   :  { %485 = vmatpush.msra.mxu2 %v1902_v59  ;;  %v109_v59 = vld [vmem:[%s2657_s1 + $0x18] sm:$0xff] }
  0x6e   :  { %486 = vmatpush.msra.mxu2 %v1908_v62 }
  0xa2   :  { %v127_v55 = vpop.f32.mrf.mxu0 }
  0xa3   :  { %v190_v63 = vadd.f32 %v127_v55, %v106_v61  ;;  %v147_v53 = vpop.f32.mrf.mxu1 }
  0xa4   :  { %v191_v52 = vadd.f32 %v147_v53, %v107_v58 }
  0xa5   :  { %v1400_v50 = vmul.f32 -1.442695, %v190_v63 }
  0xa6   :  { %v1401_v57 = vmul.f32 -1.442695, %v191_v52  ;;  %v108_v52 = vld [vmem:[%s2657_s1 + $0x10] sm:$0xff] }
  0xa7   :  { %1460 = vpow2.f32 %v1400_v50  ;;  %v2808_v50 = vld [vmem:[#allocation24_spill] sm:$0xff] }
  0xa8   :  { %1462 = vpow2.f32 %v1401_v57  ;;  %vm419_vm1 = vcmp.eq.s32.totalorder %v2808_v50, 1 }
  0xa9   :  { %v187_v62 = vpop.f32.mrf.mxu3  ;;  %v420_v55 = vsel %vm419_vm1, 1, %v2807_v48 }
  0xaa   :  { %v193_v49 = vadd.f32 %v187_v62, %v109_v59  ;;  %422 = vperm.xlu0 %1457, %v420_v55  }
  0xac   :  { %v1402_v46 = vmul.f32 -1.442695, %v193_v49 }
  0xad   :  { %v1461_v54 = vpop.eup %1460 }
  0xae   :  { %v1463_v45 = vpop.eup %1462  ;;  %v197_v44 = vadd.f32 1.0, %v1461_v54  ;;  %1464 = vpow2.f32 %v1402_v46 }
  0xaf   :  { %v216_v42 = vadd.f32 1.0, %v1463_v45 }
  0xb0   :  { %1466 = vrcp.f32 %v197_v44  ;;  %v209_v63 = vand.u32 2147483648, %v197_v44  ;;  %v207_v50 = vand.u32 2147483647, %v197_v44  ;;  %vm203_vm4 = vweird.f32 %v197_v44 }
  0xb1   :  { %1468 = vrcp.f32 %v216_v42  ;;  %v228_v60 = vand.u32 2147483648, %v216_v42  ;;  %v226_v48 = vand.u32 2147483647, %v216_v42  ;;  %vm222_vm5 = vweird.f32 %v216_v42 }
  0xb2   :  { %v167_v53 = vpop.f32.mrf.mxu2  ;;  %vm208_vm7 = vcmp.eq.f32.partialorder %v207_v50, 8.507059e+37 }
  0xb3   :  { %v192_v58 = vadd.f32 %v167_v53, %v108_v52  ;;  %vm227_vm9 = vcmp.eq.f32.partialorder %v226_v48, 8.507059e+37 }
  0xb4   :  { %v1465_v57 = vpop.eup %1464 }
  0xb5   :  { %v236_v49 = vadd.f32 1.0, %v1465_v57  ;;  %v210_v57 = vor.u32 1.1754944e-38, %v209_v63  ;;  %v2816_v63 = vld [vmem:[#allocation13_spill] sm:$0xff] }
  0xb6   :  { %v1467_v59 = vpop.eup %1466 }
  0xb7   :  { %v1469_v62 = vpop.eup %1468  ;;  %v199_v54 = vmul.f32 %v1467_v59, %v197_v44  ;;  %1470 = vrcp.f32 %v236_v49  ;;  %vm204_vm2 = vweird.f32 %v1467_v59  ;;  %vm242_vm11 = vweird.f32 %v236_v49 }
  0xb8   :  { %v218_v45 = vmul.f32 %v1469_v62, %v216_v42  ;;  %1472 = vtanh.f32 %v192_v58  ;;  %vm223_vm3 = vweird.f32 %v1469_v62  ;;  %vm205_vm6 = vmor %vm203_vm4, %vm204_vm2  ;;  %v229_v58 = vor.u32 1.1754944e-38, %v228_v60 }
  0xb9   :  { %v200_v46 = vsub.f32 1.0, %v199_v54  ;;  %vm224_vm8 = vmor %vm222_vm5, %vm223_vm3  ;;  %v248_v42 = vand.u32 2147483648, %v236_v49 }
  0xba   :  { %v219_v61 = vsub.f32 1.0, %v218_v45 }
  0xbb   :  { %v201_v41 = vmul.f32 %v1467_v59, %v200_v46  ;;  %v249_v50 = vor.u32 1.1754944e-38, %v248_v42  ;;  %v2827_v42 = vld [vmem:[#allocation22_spill] sm:$0xff] }
  0xbc   :  { %v220_v40 = vmul.f32 %v1469_v62, %v219_v61 }
  0xbd   :  { %v1471_v38 = vpop.eup %1470  ;;  %v202_v52 = vadd.f32 %v1467_v59, %v201_v41 }
  0xbe   :  { %v1473_v53 = vpop.eup %1472  ;;  %v238_v55 = vmul.f32 %v1471_v38, %v236_v49  ;;  %v221_v56 = vadd.f32 %v1469_v62, %v220_v40  ;;  %vm243_vm10 = vweird.f32 %v1471_v38  ;;  %v246_v40 = vand.u32 2147483647, %v236_v49  ;;  %v2814_v49 = vld [vmem:[#allocation11_spill] sm:$0xff] }
  0xbf   :  { %v206_v54 = vsel %vm205_vm6, %v1467_v59, %v202_v52  ;;  %vm244_vm12 = vmor %vm242_vm11, %vm243_vm10  ;;  %v2817_v52 = vld [vmem:[#allocation30_spill] sm:$0xff] }
  0xc0   :  { %v239_v45 = vsub.f32 1.0, %v238_v55  ;;  %v211_v46 = vsel %vm208_vm7, %v210_v57, %v206_v54  ;;  %v225_v37 = vsel %vm224_vm8, %v1469_v62, %v221_v56  ;;  %vm247_vm13 = vcmp.eq.f32.partialorder %v246_v40, 8.507059e+37  ;;  %v2815_v62 = vld [vmem:[#allocation12_spill] sm:$0xff]  ;;  %v2819_v55 = vld [vmem:[#allocation15_spill] sm:$0xff]  ;;  %v2822_v54 = vld [vmem:[#allocation17_spill] sm:$0xff] }
  0xc1   :  { %v230_v61 = vsel %vm227_vm9, %v229_v58, %v225_v37  ;;  %v253_v36 = vmul.f32 %v1473_v53, %v211_v46  ;;  %v2811_v37 = vld [vmem:[#allocation9_spill] sm:$0xff]  ;;  %v2818_v53 = vld [vmem:[#allocation14_spill] sm:$0xff]  ;;  %v2820_v57 = vld [vmem:[#allocation16_spill] sm:$0xff] }
  0xc2   :  { %v240_v34 = vmul.f32 %v1471_v38, %v239_v45  ;;  %v252_v51 = vmul.f32 0.0, %v230_v61  ;;  %v2821_v58 = vld [vmem:[#allocation31_spill] sm:$0xff]  ;;  %v2823_v45 = vld [vmem:[#allocation18_spill] sm:$0xff]  ;;  %v2825_v61 = vld [vmem:[#allocation32_spill] sm:$0xff] }
  0xc3   :  { %v2824_v46 = vld [vmem:[#allocation19_spill] sm:$0xff] }
  0xc4   :  { %v2051_v41 = vadd.f32 %v253_v36, %v252_v51  ;;  %v241_v44 = vadd.f32 %v1471_v38, %v240_v34  ;;  %v2809_v34 = vld [vmem:[#allocation21_spill] sm:$0xff]  ;;  %v2810_v36 = vld [vmem:[#allocation8_spill] sm:$0xff]  ;;  %v2813_v51 = vld [vmem:[#allocation26_spill] sm:$0xff] }
  0xc5   :  { %v2828_v40 = vld [vmem:[#allocation23_spill] sm:$0xff] }
  0xc6   :  { %1474 = vtanh.f32 %v2051_v41  ;;  %v245_v60 = vsel %vm244_vm12, %v1471_v38, %v241_v44  ;;  %v2812_v38 = vld [vmem:[#allocation10_spill] sm:$0xff]  ;;  %v2826_v44 = vld [vmem:[#allocation20_spill] sm:$0xff] }
  0xc7   :  { %v250_v56 = vsel %vm247_vm13, %v249_v50, %v245_v60  ;;  %v2829_v60 = vld [vmem:[#allocation33_spill] sm:$0xff] }
  0xc8   :  { %v2830_v50 = vld [vmem:[#allocation25_spill] sm:$0xff] }
  0xcc   :  { %v1475_v59 = vpop.eup %1474 }
  0xcd   :  { %v2054_v48 = vmul.f32 %v1475_v59, %v250_v56  ;;  %v2831_v59 = vld [vmem:[#allocation27_spill] sm:$0xff]  ;;  %v2832_v56 = vld [vmem:[#allocation28_spill] sm:$0xff] }
  0xcf   :  { %286 = vmatmul.f32.vlgmr.msrb.gmra.mxu0 %v2054_v48  ;;  %306 = vmatmul.f32.vlgmr.msrb.gmra.mxu1 %v2054_v48 }
  0xd0   :  { %326 = vmatmul.f32.vlgmr.msrb.gmra.mxu2 %v2054_v48  ;;  %346 = vmatmul.f32.vlgmr.msrb.gmra.mxu3 %v2054_v48 }
  0xd1   :  { %592 = vmatpush.msrb.mxu0 %v1707_v0  ;;  %612 = vmatpush.msrb.mxu1 %v1709_v1 }
  0xd2   :  { %632 = vmatpush.msrb.mxu2 %v1753_v17  ;;  %652 = vmatpush.msrb.mxu3 %v1711_v2 }
  0xd3   :  { %593 = vmatpush.msrb.mxu0 %v1715_v3  ;;  %613 = vmatpush.msrb.mxu1 %v1717_v4 }
  0xd4   :  { %633 = vmatpush.msrb.mxu2 %v1759_v19  ;;  %653 = vmatpush.msrb.mxu3 %v1719_v5 }
  0xd5   :  { %594 = vmatpush.msrb.mxu0 %v1722_v6  ;;  %614 = vmatpush.msrb.mxu1 %v1724_v7 }
  0xd6   :  { %634 = vmatpush.msrb.mxu2 %v1771_v23  ;;  %654 = vmatpush.msrb.mxu3 %v1728_v8 }
  0xd7   :  { %595 = vmatpush.msrb.mxu0 %v1731_v9  ;;  %615 = vmatpush.msrb.mxu1 %v1733_v10 }
  0xd8   :  { %635 = vmatpush.msrb.mxu2 %v1783_v27  ;;  %655 = vmatpush.msrb.mxu3 %v1737_v11 }
  0xd9   :  { %596 = vmatpush.msrb.mxu0 %v1740_v12  ;;  %616 = vmatpush.msrb.mxu1 %v1742_v13 }
  0xda   :  { %636 = vmatpush.msrb.mxu2 %v1795_v31  ;;  %656 = vmatpush.msrb.mxu3 %v1746_v14 }
  0xdb   :  { %597 = vmatpush.msrb.mxu0 %v1749_v15  ;;  %617 = vmatpush.msrb.mxu1 %v1751_v16 }
  0xdc   :  { %637 = vmatpush.msrb.mxu2 %v1807_v35  ;;  %657 = vmatpush.msrb.mxu3 %v1757_v18 }
  0xdd   :  { %598 = vmatpush.msrb.mxu0 %v1762_v20  ;;  %618 = vmatpush.msrb.mxu1 %v1764_v21 }
  0xde   :  { %638 = vmatpush.msrb.mxu2 %v1819_v39  ;;  %658 = vmatpush.msrb.mxu3 %v1769_v22 }
  0xdf   :  { %599 = vmatpush.msrb.mxu0 %v1774_v24  ;;  %619 = vmatpush.msrb.mxu1 %v1776_v25 }
  0xe0   :  { %639 = vmatpush.msrb.mxu2 %v1831_v43  ;;  %659 = vmatpush.msrb.mxu3 %v1781_v26 }
  0xe1   :  { %600 = vmatpush.msrb.mxu0 %v1786_v28  ;;  %620 = vmatpush.msrb.mxu1 %v1788_v29 }
  0xe2   :  { %640 = vmatpush.msrb.mxu2 %v1843_v47  ;;  %660 = vmatpush.msrb.mxu3 %v1793_v30 }
  0xe3   :  { %601 = vmatpush.msrb.mxu0 %v1798_v32  ;;  %621 = vmatpush.msrb.mxu1 %v1800_v33 }
  0xe4   :  { %641 = vmatpush.msrb.mxu2 %v2809_v34  ;;  %661 = vmatpush.msrb.mxu3 %v2810_v36 }
  0xe5   :  { %602 = vmatpush.msrb.mxu0 %v2811_v37  ;;  %622 = vmatpush.msrb.mxu1 %v2812_v38 }
  0xe6   :  { %642 = vmatpush.msrb.mxu2 %v2813_v51  ;;  %662 = vmatpush.msrb.mxu3 %v2814_v49 }
  0xe7   :  { %603 = vmatpush.msrb.mxu0 %v2815_v62  ;;  %623 = vmatpush.msrb.mxu1 %v2816_v63 }
  0xe8   :  { %643 = vmatpush.msrb.mxu2 %v2817_v52  ;;  %663 = vmatpush.msrb.mxu3 %v2818_v53 }
  0xe9   :  { %604 = vmatpush.msrb.mxu0 %v2819_v55  ;;  %624 = vmatpush.msrb.mxu1 %v2820_v57 }
  0xea   :  { %644 = vmatpush.msrb.mxu2 %v2821_v58  ;;  %664 = vmatpush.msrb.mxu3 %v2822_v54  ;;  %v2833_v54 = vld [vmem:[#allocation34_spill] sm:$0xff] }
  0xeb   :  { %605 = vmatpush.msrb.mxu0 %v2823_v45  ;;  %625 = vmatpush.msrb.mxu1 %v2824_v46  ;;  %v2834_v45 = vld [vmem:[#allocation29_spill] sm:$0xff] }
  0xec   :  { %645 = vmatpush.msrb.mxu2 %v2825_v61  ;;  %665 = vmatpush.msrb.mxu3 %v2826_v44  ;;  %v1403_v44 = vld [vmem:[%s2657_s1 + $0x20] sm:$0xff] }
  0xed   :  { %606 = vmatpush.msrb.mxu0 %v2827_v42  ;;  %626 = vmatpush.msrb.mxu1 %v2828_v40  ;;  %v1404_v40 = vld [vmem:[%s2657_s1 + $0x28] sm:$0xff] }
  0xee   :  { %646 = vmatpush.msrb.mxu2 %v2829_v60  ;;  %666 = vmatpush.msrb.mxu3 %v2830_v50 }
  0xef   :  { %607 = vmatpush.msrb.mxu0 %v2831_v59  ;;  %627 = vmatpush.msrb.mxu1 %v2832_v56 }
  0xf0   :  { %647 = vmatpush.msrb.mxu2 %v2833_v54  ;;  %667 = vmatpush.msrb.mxu3 %v2834_v45  ;;  %v1406_v54 = vld [vmem:[%s2657_s1 + $0x38] sm:$0xff] }
 0x14c   :  { %v287_v42 = vpop.f32.mrf.mxu0  ;;  %v307_v60 = vpop.f32.mrf.mxu1 }
 0x14d   :  { %v350_v61 = vadd.f32 %v1403_v44, %v287_v42  ;;  %v351_v50 = vadd.f32 %v1404_v40, %v307_v60  ;;  %v2835_v44 = vld [vmem:[#allocation24_spill] sm:$0xff]  ;;  %v2836_v42 = vmov 0  }
 0x14e   :  { %vm580_vm14 = vcmp.eq.s32.totalorder %v2835_v44, 2 }
 0x14f   :  { %v1407_v46 = vmul.f32 -1.442695, %v350_v61  ;;  %v1408_v59 = vmul.f32 -1.442695, %v351_v50  ;;  %v581_v40 = vsel %vm580_vm14, 1, %v2836_v42 }
 0x150   :  { %583 = vperm.xlu1 %1458, %v581_v40  }
 0x151   :  { %1476 = vpow2.f32 %v1407_v46  ;;  %v1405_v46 = vld [vmem:[%s2657_s1 + $0x30] sm:$0xff] }
 0x152   :  { %1478 = vpow2.f32 %v1408_v59 }
 0x153   :  { %v347_v45 = vpop.f32.mrf.mxu3  ;;  %v327_v61 = vpop.f32.mrf.mxu2 }
 0x154   :  { %v353_v56 = vadd.f32 %v1406_v54, %v347_v45  ;;  %v352_v50 = vadd.f32 %v1405_v46, %v327_v61 }
 0x156   :  { %v1409_v58 = vmul.f32 -1.442695, %v353_v56 }
 0x157   :  { %v1477_v57 = vpop.eup %1476 }
 0x158   :  { %v1479_v55 = vpop.eup %1478  ;;  %v357_v53 = vadd.f32 1.0, %v1477_v57  ;;  %1480 = vpow2.f32 %v1409_v58 }
 0x159   :  { %v376_v52 = vadd.f32 1.0, %v1479_v55 }
 0x15a   :  { %1482 = vrcp.f32 %v357_v53  ;;  %v369_v63 = vand.u32 2147483648, %v357_v53  ;;  %v367_v49 = vand.u32 2147483647, %v357_v53  ;;  %vm363_vm1 = vweird.f32 %v357_v53 }
 0x15b   :  { %1484 = vrcp.f32 %v376_v52  ;;  %v388_v44 = vand.u32 2147483648, %v376_v52  ;;  %v386_v42 = vand.u32 2147483647, %v376_v52  ;;  %vm382_vm2 = vweird.f32 %v376_v52 }
 0x15c   :  { %v370_v46 = vor.u32 1.1754944e-38, %v369_v63  ;;  %vm368_vm5 = vcmp.eq.f32.partialorder %v367_v49, 8.507059e+37 }
 0x15d   :  { %vm387_vm6 = vcmp.eq.f32.partialorder %v386_v42, 8.507059e+37 }
 0x15e   :  { %v1481_v60 = vpop.eup %1480 }
 0x15f   :  { %v396_v54 = vadd.f32 1.0, %v1481_v60 }
 0x160   :  { %v1483_v45 = vpop.eup %1482 }
 0x161   :  { %v1485_v59 = vpop.eup %1484  ;;  %v359_v57 = vmul.f32 %v1483_v45, %v357_v53  ;;  %1486 = vrcp.f32 %v396_v54  ;;  %vm364_vm15 = vweird.f32 %v1483_v45  ;;  %vm402_vm8 = vweird.f32 %v396_v54 }
 0x162   :  { %v378_v55 = vmul.f32 %v1485_v59, %v376_v52  ;;  %1488 = vtanh.f32 %v352_v50  ;;  %vm383_vm0 = vweird.f32 %v1485_v59  ;;  %vm365_vm3 = vmor %vm363_vm1, %vm364_vm15  ;;  %v406_v49 = vand.u32 2147483647, %v396_v54 }
 0x163   :  { %v360_v58 = vsub.f32 1.0, %v359_v57  ;;  %vm384_vm4 = vmor %vm382_vm2, %vm383_vm0  ;;  %v389_v57 = vor.u32 1.1754944e-38, %v388_v44 }
 0x164   :  { %v379_v56 = vsub.f32 1.0, %v378_v55  ;;  %vm407_vm11 = vcmp.eq.f32.partialorder %v406_v49, 8.507059e+37 }
 0x165   :  { %v361_v62 = vmul.f32 %v1483_v45, %v360_v58 }
 0x166   :  { %v380_v51 = vmul.f32 %v1485_v59, %v379_v56  ;;  %v262_v56 = vpop.permute.xlu0 %261 }
 0x167   :  { %v1487_v38 = vpop.eup %1486  ;;  %v362_v40 = vadd.f32 %v1483_v45, %v361_v62  ;;  %vm263_vm10 = vcmp.eq.s32.totalorder %v262_v56, 1 }
 0x168   :  { %v381_v61 = vadd.f32 %v1485_v59, %v380_v51  ;;  %v398_v60 = vmul.f32 %v1487_v38, %v396_v54  ;;  %v1489_v50 = vpop.eup %1488  ;;  %vm403_vm7 = vweird.f32 %v1487_v38  ;;  %v408_v51 = vand.u32 2147483648, %v396_v54 }
 0x169   :  { %v366_v55 = vsel %vm365_vm3, %v1483_v45, %v362_v40  ;;  %vm404_vm9 = vmor %vm402_vm8, %vm403_vm7 }
 0x16a   :  { %v371_v37 = vsel %vm368_vm5, %v370_v46, %v366_v55  ;;  %v385_v58 = vsel %vm384_vm4, %v1485_v59, %v381_v61  ;;  %v399_v36 = vsub.f32 1.0, %v398_v60  ;;  %v409_v42 = vor.u32 1.1754944e-38, %v408_v51  ;;  %v2864_v61 = vld [vmem:[#allocation24_spill] sm:$0xff]  ;;  %v1412_v60 = vld [vmem:[%s2657_s1 + $0x50] sm:$0xff] }
 0x16b   :  { %v390_v34 = vsel %vm387_vm6, %v389_v57, %v385_v58  ;;  %v413_v33 = vmul.f32 %v1489_v50, %v371_v37  ;;  %vm741_vm13 = vcmp.eq.s32.totalorder %v2864_v61, 3  ;;  %v2865_v55 = vmov 0   ;;  %v2284_v61 = vld [vmem:[#allocation4 + $0x170] sm:$0xff] }
 0x16c   :  { %v412_v62 = vmul.f32 %v390_v34, %v2051_v41  ;;  %v400_v53 = vmul.f32 %v1487_v38, %v399_v36  ;;  %v742_v50 = vsel %vm741_vm13, 1, %v2865_v55 }
 0x16d   :  { %744 = vperm.xlu1 %1458, %v742_v50   ;;  %v2293_v50 = vld [vmem:[#allocation4 + $0x148] sm:$0xff] }
 0x16e   :  { %v2139_v52 = vadd.f32 %v413_v33, %v412_v62  ;;  %v401_v63 = vadd.f32 %v1487_v38, %v400_v53  ;;  %v423_v44 = vpop.permute.xlu0 %422  ;;  %v264_v33 = vsel %vm263_vm10, %v2054_v48, 0.0 }
 0x16f   :  { %vm424_vm12 = vcmp.eq.s32.totalorder %v423_v44, 1 }
 0x170   :  { %1490 = vtanh.f32 %v2139_v52  ;;  %v405_v45 = vsel %vm404_vm9, %v1487_v38, %v401_v63 }
 0x171   :  { %v410_v37 = vsel %vm407_vm11, %v409_v42, %v405_v45 }
 0x176   :  { %v1491_v59 = vpop.eup %1490 }
 0x177   :  { %v416_v41 = vmul.f32 %v1491_v59, %v410_v37 }
 0x179   :  { %v2143_v34 = vsel %vm424_vm12, %v416_v41, %v264_v33  ;;  %447 = vmatmul.f32.vlgmr.msra.gmra.mxu0 %v416_v41  ;;  %467 = vmatmul.f32.vlgmr.msra.gmra.mxu1 %v416_v41 }
 0x17a   :  { %487 = vmatmul.f32.vlgmr.msra.gmra.mxu2 %v416_v41  ;;  %507 = vmatmul.f32.vlgmr.msra.gmra.mxu3 %v416_v41 }
 0x17b   :  { %753 = vmatpush.msra.mxu0 %v1707_v0  ;;  %773 = vmatpush.msra.mxu1 %v1709_v1  ;;  %v2837_v0 = vld [vmem:[#allocation7_spill] sm:$0xff]  ;;  %v2838_v1 = vld [vmem:[#allocation21_spill] sm:$0xff] }
 0x17c   :  { %793 = vmatpush.msra.mxu2 %v1753_v17  ;;  %813 = vmatpush.msra.mxu3 %v1711_v2  ;;  %v2839_v2 = vld [vmem:[#allocation8_spill] sm:$0xff] }
 0x17d   :  { %754 = vmatpush.msra.mxu0 %v1715_v3  ;;  %774 = vmatpush.msra.mxu1 %v1717_v4  ;;  %v2840_v3 = vld [vmem:[#allocation9_spill] sm:$0xff]  ;;  %v2841_v4 = vld [vmem:[#allocation10_spill] sm:$0xff]  ;;  %v2854_v17 = vld [vmem:[#allocation32_spill] sm:$0xff] }
 0x17e   :  { %794 = vmatpush.msra.mxu2 %v1759_v19  ;;  %814 = vmatpush.msra.mxu3 %v1719_v5  ;;  %v2842_v5 = vld [vmem:[#allocation26_spill] sm:$0xff] }
 0x17f   :  { %755 = vmatpush.msra.mxu0 %v1722_v6  ;;  %775 = vmatpush.msra.mxu1 %v1724_v7  ;;  %v2843_v6 = vld [vmem:[#allocation11_spill] sm:$0xff]  ;;  %v2844_v7 = vld [vmem:[#allocation12_spill] sm:$0xff]  ;;  %v2856_v19 = vld [vmem:[#allocation22_spill] sm:$0xff] }
 0x180   :  { %795 = vmatpush.msra.mxu2 %v1771_v23  ;;  %815 = vmatpush.msra.mxu3 %v1728_v8  ;;  %v2845_v8 = vld [vmem:[#allocation13_spill] sm:$0xff]  ;;  %v2860_v23 = vld [vmem:[#allocation27_spill] sm:$0xff] }
 0x181   :  { %756 = vmatpush.msra.mxu0 %v1731_v9  ;;  %776 = vmatpush.msra.mxu1 %v1733_v10  ;;  %v2846_v9 = vld [vmem:[#allocation30_spill] sm:$0xff] }
 0x182   :  { %796 = vmatpush.msra.mxu2 %v1783_v27  ;;  %816 = vmatpush.msra.mxu3 %v1737_v11  ;;  %v2847_v10 = vld [vmem:[#allocation14_spill] sm:$0xff]  ;;  %v2848_v11 = vld [vmem:[#allocation15_spill] sm:$0xff] }
 0x183   :  { %757 = vmatpush.msra.mxu0 %v1740_v12  ;;  %777 = vmatpush.msra.mxu1 %v1742_v13  ;;  %v2849_v12 = vld [vmem:[#allocation16_spill] sm:$0xff]  ;;  %v2850_v13 = vld [vmem:[#allocation31_spill] sm:$0xff] }
 0x184   :  { %797 = vmatpush.msra.mxu2 %v1795_v31  ;;  %817 = vmatpush.msra.mxu3 %v1746_v14  ;;  %v2851_v14 = vld [vmem:[#allocation17_spill] sm:$0xff]  ;;  %v1410_v27 = vld [vmem:[%s2657_s1 + $0x40] sm:$0xff] }
 0x185   :  { %758 = vmatpush.msra.mxu0 %v1749_v15  ;;  %778 = vmatpush.msra.mxu1 %v1751_v16  ;;  %v2852_v15 = vld [vmem:[#allocation18_spill] sm:$0xff]  ;;  %v2853_v16 = vld [vmem:[#allocation19_spill] sm:$0xff] }
 0x186   :  { %798 = vmatpush.msra.mxu2 %v1807_v35  ;;  %818 = vmatpush.msra.mxu3 %v1757_v18  ;;  %v2855_v18 = vld [vmem:[#allocation20_spill] sm:$0xff] }
 0x187   :  { %759 = vmatpush.msra.mxu0 %v1762_v20  ;;  %779 = vmatpush.msra.mxu1 %v1764_v21  ;;  %v2857_v20 = vld [vmem:[#allocation23_spill] sm:$0xff]  ;;  %v2858_v21 = vld [vmem:[#allocation33_spill] sm:$0xff] }
 0x188   :  { %799 = vmatpush.msra.mxu2 %v1819_v39  ;;  %819 = vmatpush.msra.mxu3 %v1769_v22  ;;  %v2859_v22 = vld [vmem:[#allocation25_spill] sm:$0xff] }
 0x189   :  { %760 = vmatpush.msra.mxu0 %v1774_v24  ;;  %780 = vmatpush.msra.mxu1 %v1776_v25  ;;  %v2861_v24 = vld [vmem:[#allocation28_spill] sm:$0xff]  ;;  %v2862_v25 = vld [vmem:[#allocation34_spill] sm:$0xff] }
 0x18a   :  { %800 = vmatpush.msra.mxu2 %v1831_v43  ;;  %820 = vmatpush.msra.mxu3 %v1781_v26  ;;  %v2863_v26 = vld [vmem:[#allocation29_spill] sm:$0xff]  ;;  %v1413_v43 = vld [vmem:[%s2657_s1 + $0x58] sm:$0xff] }
 0x18b   :  { %761 = vmatpush.msra.mxu0 %v1786_v28  ;;  %781 = vmatpush.msra.mxu1 %v1788_v29  ;;  %v1411_v28 = vld [vmem:[%s2657_s1 + $0x48] sm:$0xff] }
 0x18c   :  { %801 = vmatpush.msra.mxu2 %v1843_v47  ;;  %821 = vmatpush.msra.mxu3 %v1793_v30 }
 0x18d   :  { %762 = vmatpush.msra.mxu0 %v1798_v32  ;;  %782 = vmatpush.msra.mxu1 %v2837_v0 }
 0x18e   :  { %802 = vmatpush.msra.mxu2 %v2838_v1  ;;  %822 = vmatpush.msra.mxu3 %v2839_v2 }
 0x18f   :  { %763 = vmatpush.msra.mxu0 %v2840_v3  ;;  %783 = vmatpush.msra.mxu1 %v2841_v4 }
 0x190   :  { %803 = vmatpush.msra.mxu2 %v2842_v5  ;;  %823 = vmatpush.msra.mxu3 %v2843_v6 }
 0x191   :  { %764 = vmatpush.msra.mxu0 %v2844_v7  ;;  %784 = vmatpush.msra.mxu1 %v2845_v8 }
 0x192   :  { %804 = vmatpush.msra.mxu2 %v2846_v9  ;;  %824 = vmatpush.msra.mxu3 %v2847_v10 }
 0x193   :  { %765 = vmatpush.msra.mxu0 %v2848_v11  ;;  %785 = vmatpush.msra.mxu1 %v2849_v12 }
 0x194   :  { %805 = vmatpush.msra.mxu2 %v2850_v13  ;;  %825 = vmatpush.msra.mxu3 %v2851_v14 }
 0x195   :  { %766 = vmatpush.msra.mxu0 %v2852_v15  ;;  %786 = vmatpush.msra.mxu1 %v2853_v16 }
 0x196   :  { %806 = vmatpush.msra.mxu2 %v2854_v17  ;;  %826 = vmatpush.msra.mxu3 %v2855_v18 }
 0x197   :  { %767 = vmatpush.msra.mxu0 %v2856_v19  ;;  %787 = vmatpush.msra.mxu1 %v2857_v20 }
 0x198   :  { %807 = vmatpush.msra.mxu2 %v2858_v21  ;;  %827 = vmatpush.msra.mxu3 %v2859_v22 }
 0x199   :  { %768 = vmatpush.msra.mxu0 %v2860_v23  ;;  %788 = vmatpush.msra.mxu1 %v2861_v24 }
 0x19a   :  { %808 = vmatpush.msra.mxu2 %v2862_v25  ;;  %828 = vmatpush.msra.mxu3 %v2863_v26  ;;  %v2230_v26 = vld [vmem:[#allocation4 + $0x1e0] sm:$0xff] }
 0x1c2   :  { %v584_v20 = vpop.permute.xlu1 %583 }
 0x1c3   :  { %vm585_vm10 = vcmp.eq.s32.totalorder %v584_v20, 1  ;;  %v2395_v20 = vld [vmem:[#allocation4 + $0x58] sm:$0xff] }
 0x1c4   :  { %2884 = vst [vmem:[#allocation20_spill] sm:$0xff] %v2395_v20 }
 0x1f6   :  { %v448_v29 = vpop.f32.mrf.mxu0  ;;  %v468_v30 = vpop.f32.mrf.mxu1 }
 0x1f7   :  { %v511_v31 = vadd.f32 %v1410_v27, %v448_v29  ;;  %v512_v32 = vadd.f32 %v1411_v28, %v468_v30  ;;  %v2233_v27 = vld [vmem:[#allocation4 + $0x1e8] sm:$0xff]  ;;  %v2236_v28 = vld [vmem:[#allocation4 + $0x1f0] sm:$0xff]  ;;  %v2239_v29 = vld [vmem:[#allocation4 + $0x1f8] sm:$0xff] }
 0x1f8   :  { %v2245_v30 = vld [vmem:[#allocation4 + $0x1c8] sm:$0xff] }
 0x1f9   :  { %v1414_v35 = vmul.f32 -1.442695, %v511_v31  ;;  %v1415_v39 = vmul.f32 -1.442695, %v512_v32  ;;  %v2248_v31 = vld [vmem:[#allocation4 + $0x1d0] sm:$0xff]  ;;  %v2251_v32 = vld [vmem:[#allocation4 + $0x1d8] sm:$0xff] }
 0x1fb   :  { %1492 = vpow2.f32 %v1414_v35  ;;  %v2254_v35 = vld [vmem:[#allocation4 + $0x1a0] sm:$0xff] }
 0x1fc   :  { %1494 = vpow2.f32 %v1415_v39  ;;  %v2257_v39 = vld [vmem:[#allocation4 + $0x1a8] sm:$0xff] }
 0x1fd   :  { %v508_v47 = vpop.f32.mrf.mxu3  ;;  %v488_v57 = vpop.f32.mrf.mxu2 }
 0x1fe   :  { %v514_v48 = vadd.f32 %v1413_v43, %v508_v47  ;;  %v513_v53 = vadd.f32 %v1412_v60, %v488_v57  ;;  %v2260_v43 = vld [vmem:[#allocation4 + $0x1b0] sm:$0xff]  ;;  %v2263_v47 = vld [vmem:[#allocation4 + $0x1b8] sm:$0xff]  ;;  %v2290_v57 = vld [vmem:[#allocation4 + $0x140] sm:$0xff] }
 0x1ff   :  { %v2287_v60 = vld [vmem:[#allocation4 + $0x178] sm:$0xff] }
 0x200   :  { %v1416_v36 = vmul.f32 -1.442695, %v514_v48  ;;  %v2266_v48 = vld [vmem:[#allocation4 + $0x180] sm:$0xff] }
 0x201   :  { %v1493_v38 = vpop.eup %1492 }
 0x202   :  { %v1495_v54 = vpop.eup %1494  ;;  %v518_v40 = vadd.f32 1.0, %v1493_v38  ;;  %1496 = vpow2.f32 %v1416_v36  ;;  %v2269_v36 = vld [vmem:[#allocation4 + $0x188] sm:$0xff]  ;;  %v2272_v38 = vld [vmem:[#allocation4 + $0x190] sm:$0xff] }
 0x203   :  { %v537_v46 = vadd.f32 1.0, %v1495_v54  ;;  %v2275_v54 = vld [vmem:[#allocation4 + $0x198] sm:$0xff] }
 0x204   :  { %1498 = vrcp.f32 %v518_v40  ;;  %v530_v42 = vand.u32 2147483648, %v518_v40  ;;  %v528_v41 = vand.u32 2147483647, %v518_v40  ;;  %vm524_vm0 = vweird.f32 %v518_v40 }
 0x205   :  { %1500 = vrcp.f32 %v537_v46  ;;  %v549_v59 = vand.u32 2147483648, %v537_v46  ;;  %v547_v0 = vand.u32 2147483647, %v537_v46  ;;  %vm543_vm1 = vweird.f32 %v537_v46 }
 0x206   :  { %v531_v3 = vor.u32 1.1754944e-38, %v530_v42  ;;  %vm529_vm4 = vcmp.eq.f32.partialorder %v528_v41, 8.507059e+37  ;;  %v2323_v42 = vld [vmem:[#allocation4 + $0x118] sm:$0xff]  ;;  %v2332_v41 = vld [vmem:[#allocation4 + $0xf0] sm:$0xff] }
 0x207   :  { %v550_v6 = vor.u32 1.1754944e-38, %v549_v59  ;;  %vm548_vm5 = vcmp.eq.f32.partialorder %v547_v0, 8.507059e+37  ;;  %v2326_v59 = vld [vmem:[#allocation4 + $0xe0] sm:$0xff] }
 0x208   :  { %v1497_v58 = vpop.eup %1496  ;;  %v2338_v0 = vld [vmem:[#allocation4 + $0xc0] sm:$0xff] }
 0x209   :  { %v557_v56 = vadd.f32 1.0, %v1497_v58  ;;  %v2296_v58 = vld [vmem:[#allocation4 + $0x150] sm:$0xff] }
 0x20a   :  { %v1499_v62 = vpop.eup %1498 }
 0x20b   :  { %v1501_v63 = vpop.eup %1500  ;;  %v520_v51 = vmul.f32 %v1499_v62, %v518_v40  ;;  %1502 = vrcp.f32 %v557_v56  ;;  %vm525_vm14 = vweird.f32 %v1499_v62  ;;  %v569_v18 = vand.u32 2147483648, %v557_v56  ;;  %v2278_v40 = vld [vmem:[#allocation4 + $0x160] sm:$0xff] }
 0x20c   :  { %v539_v49 = vmul.f32 %v1501_v63, %v537_v46  ;;  %1504 = vtanh.f32 %v513_v53  ;;  %vm544_vm15 = vweird.f32 %v1501_v63  ;;  %vm526_vm2 = vmor %vm524_vm0, %vm525_vm14  ;;  %vm563_vm7 = vweird.f32 %v557_v56  ;;  %v2281_v46 = vld [vmem:[#allocation4 + $0x168] sm:$0xff] }
 0x20d   :  { %v521_v44 = vsub.f32 1.0, %v520_v51  ;;  %vm545_vm3 = vmor %vm543_vm1, %vm544_vm15  ;;  %v567_v19 = vand.u32 2147483647, %v557_v56  ;;  %v570_v22 = vor.u32 1.1754944e-38, %v569_v18  ;;  %v2305_v53 = vld [vmem:[#allocation4 + $0x128] sm:$0xff]  ;;  %v2311_v51 = vld [vmem:[#allocation4 + $0x138] sm:$0xff] }
 0x20e   :  { %v540_v45 = vsub.f32 1.0, %v539_v49  ;;  %v2314_v49 = vld [vmem:[#allocation4 + $0x100] sm:$0xff]  ;;  %v2389_v18 = vld [vmem:[#allocation4 + $0x48] sm:$0xff] }
 0x20f   :  { %v522_v37 = vmul.f32 %v1499_v62, %v521_v44  ;;  %vm568_vm9 = vcmp.eq.f32.partialorder %v567_v19, 8.507059e+37  ;;  %v2317_v44 = vld [vmem:[#allocation4 + $0x108] sm:$0xff]  ;;  %2882 = vst [vmem:[#allocation19_spill] sm:$0xff] %v2389_v18  ;;  %v2392_v19 = vld [vmem:[#allocation4 + $0x50] sm:$0xff] }
 0x210   :  { %v541_v33 = vmul.f32 %v1501_v63, %v540_v45  ;;  %v2320_v45 = vld [vmem:[#allocation4 + $0x110] sm:$0xff]  ;;  %2883 = vst [vmem:[#allocation32_spill] sm:$0xff] %v2392_v19 }
 0x211   :  { %v1503_v1 = vpop.eup %1502  ;;  %v523_v2 = vadd.f32 %v1499_v62, %v522_v37  ;;  %v2329_v37 = vld [vmem:[#allocation4 + $0xe8] sm:$0xff] }
 0x212   :  { %v542_v4 = vadd.f32 %v1501_v63, %v541_v33  ;;  %v559_v5 = vmul.f32 %v1503_v1, %v557_v56  ;;  %v1505_v8 = vpop.eup %1504  ;;  %vm564_vm6 = vweird.f32 %v1503_v1  ;;  %v2299_v56 = vld [vmem:[#allocation4 + $0x158] sm:$0xff] }
 0x213   :  { %v527_v7 = vsel %vm526_vm2, %v1499_v62, %v523_v2  ;;  %vm565_vm8 = vmor %vm563_vm7, %vm564_vm6  ;;  %v2302_v62 = vld [vmem:[#allocation4 + $0x120] sm:$0xff]  ;;  %v2335_v33 = vld [vmem:[#allocation4 + $0xf8] sm:$0xff] }
 0x214   :  { %v532_v9 = vsel %vm529_vm4, %v531_v3, %v527_v7  ;;  %v546_v10 = vsel %vm545_vm3, %v1501_v63, %v542_v4  ;;  %v560_v11 = vsub.f32 1.0, %v559_v5  ;;  %v2308_v63 = vld [vmem:[#allocation4 + $0x130] sm:$0xff]  ;;  %v2347_v3 = vld [vmem:[#allocation4 + $0xd8] sm:$0xff]  ;;  %v2350_v4 = vld [vmem:[#allocation4 + $0xa0] sm:$0xff] }
 0x215   :  { %v551_v12 = vsel %vm548_vm5, %v550_v6, %v546_v10  ;;  %v574_v13 = vmul.f32 %v1505_v8, %v532_v9  ;;  %v2344_v2 = vld [vmem:[#allocation4 + $0xd0] sm:$0xff]  ;;  %2868 = vst [vmem:[#allocation8_spill] sm:$0xff] %v2347_v3  ;;  %v2353_v5 = vld [vmem:[#allocation4 + $0xa8] sm:$0xff]  ;;  %v2359_v7 = vld [vmem:[#allocation4 + $0xb8] sm:$0xff] }
 0x216   :  { %v573_v14 = vmul.f32 %v551_v12, %v2139_v52  ;;  %v561_v15 = vmul.f32 %v1503_v1, %v560_v11  ;;  %2867 = vst [vmem:[#allocation21_spill] sm:$0xff] %v2344_v2  ;;  %v2356_v6 = vld [vmem:[#allocation4 + $0xb0] sm:$0xff]  ;;  %v2362_v8 = vld [vmem:[#allocation4 + $0x80] sm:$0xff]  ;;  %v2365_v9 = vld [vmem:[#allocation4 + $0x88] sm:$0xff] }
 0x217   :  { %2869 = vst [vmem:[#allocation9_spill] sm:$0xff] %v2350_v4  ;;  %v2368_v10 = vld [vmem:[#allocation4 + $0x90] sm:$0xff]  ;;  %v2371_v11 = vld [vmem:[#allocation4 + $0x98] sm:$0xff]  ;;  %v2374_v12 = vld [vmem:[#allocation4 + $0x60] sm:$0xff] }
 0x218   :  { %v2224_v16 = vadd.f32 %v574_v13, %v573_v14  ;;  %v562_v17 = vadd.f32 %v1503_v1, %v561_v15  ;;  %2870 = vst [vmem:[#allocation10_spill] sm:$0xff] %v2353_v5  ;;  %v2377_v13 = vld [vmem:[#allocation4 + $0x68] sm:$0xff]  ;;  %v2380_v14 = vld [vmem:[#allocation4 + $0x70] sm:$0xff]  ;;  %v2383_v15 = vld [vmem:[#allocation4 + $0x78] sm:$0xff] }
 0x219   :  { %2871 = vst [vmem:[#allocation26_spill] sm:$0xff] %v2356_v6 }
 0x21a   :  { %1506 = vtanh.f32 %v2224_v16  ;;  %v566_v21 = vsel %vm565_vm8, %v1503_v1, %v562_v17  ;;  %v2341_v1 = vld [vmem:[#allocation4 + $0xc8] sm:$0xff]  ;;  %2872 = vst [vmem:[#allocation11_spill] sm:$0xff] %v2359_v7  ;;  %v2386_v17 = vld [vmem:[#allocation4 + $0x40] sm:$0xff] }
 0x21b   :  { %v571_v24 = vsel %vm568_vm9, %v570_v22, %v566_v21  ;;  %2866 = vst [vmem:[#allocation7_spill] sm:$0xff] %v2341_v1  ;;  %v2398_v21 = vld [vmem:[#allocation4 + $0x20] sm:$0xff]  ;;  %v2401_v22 = vld [vmem:[#allocation4 + $0x28] sm:$0xff] }
 0x21c   :  { %2873 = vst [vmem:[#allocation12_spill] sm:$0xff] %v2362_v8 }
 0x21d   :  { %2874 = vst [vmem:[#allocation13_spill] sm:$0xff] %v2365_v9 }
 0x21e   :  { %2875 = vst [vmem:[#allocation30_spill] sm:$0xff] %v2368_v10 }
 0x21f   :  { %2876 = vst [vmem:[#allocation14_spill] sm:$0xff] %v2371_v11 }
 0x220   :  { %v1507_v23 = vpop.eup %1506  ;;  %2877 = vst [vmem:[#allocation15_spill] sm:$0xff] %v2374_v12 }
 0x221   :  { %v577_v25 = vmul.f32 %v1507_v23, %v571_v24  ;;  %2878 = vst [vmem:[#allocation16_spill] sm:$0xff] %v2377_v13  ;;  %v2404_v23 = vld [vmem:[#allocation4 + $0x30] sm:$0xff]  ;;  %v2407_v24 = vld [vmem:[#allocation4 + $0x38] sm:$0xff] }
 0x222   :  { %2879 = vst [vmem:[#allocation31_spill] sm:$0xff] %v2380_v14 }
 0x223   :  { %v2228_v52 = vsel %vm585_vm10, %v577_v25, %v2143_v34  ;;  %608 = vmatmul.f32.vlgmr.msrb.gmra.mxu0 %v577_v25  ;;  %628 = vmatmul.f32.vlgmr.msrb.gmra.mxu1 %v577_v25  ;;  %v2242_v34 = vld [vmem:[#allocation4 + $0x1c0] sm:$0xff]  ;;  %2880 = vst [vmem:[#allocation17_spill] sm:$0xff] %v2383_v15 }
 0x224   :  { %648 = vmatmul.f32.vlgmr.msrb.gmra.mxu2 %v577_v25  ;;  %668 = vmatmul.f32.vlgmr.msrb.gmra.mxu3 %v577_v25  ;;  %2881 = vst [vmem:[#allocation18_spill] sm:$0xff] %v2386_v17  ;;  %v2410_v25 = vld [vmem:[#allocation4] sm:$0xff] }
 0x225   :  { %914 = vmatpush.msrb.mxu0 %v2230_v26  ;;  %934 = vmatpush.msrb.mxu1 %v2233_v27  ;;  %2885 = vst [vmem:[#allocation22_spill] sm:$0xff] %v2398_v21 }
 0x226   :  { %954 = vmatpush.msrb.mxu2 %v2236_v28  ;;  %974 = vmatpush.msrb.mxu3 %v2239_v29  ;;  %2886 = vst [vmem:[#allocation23_spill] sm:$0xff] %v2401_v22 }
 0x227   :  { %915 = vmatpush.msrb.mxu0 %v2242_v34  ;;  %935 = vmatpush.msrb.mxu1 %v2245_v30  ;;  %2887 = vst [vmem:[#allocation33_spill] sm:$0xff] %v2404_v23 }
 0x228   :  { %955 = vmatpush.msrb.mxu2 %v2248_v31  ;;  %975 = vmatpush.msrb.mxu3 %v2251_v32  ;;  %2888 = vst [vmem:[#allocation25_spill] sm:$0xff] %v2407_v24 }
 0x229   :  { %916 = vmatpush.msrb.mxu0 %v2254_v35  ;;  %936 = vmatpush.msrb.mxu1 %v2257_v39  ;;  %2889 = vst [vmem:[#allocation27_spill] sm:$0xff] %v2410_v25 }
 0x22a   :  { %956 = vmatpush.msrb.mxu2 %v2260_v43  ;;  %976 = vmatpush.msrb.mxu3 %v2263_v47 }
 0x22b   :  { %917 = vmatpush.msrb.mxu0 %v2266_v48  ;;  %937 = vmatpush.msrb.mxu1 %v2269_v36 }
 0x22c   :  { %957 = vmatpush.msrb.mxu2 %v2272_v38  ;;  %977 = vmatpush.msrb.mxu3 %v2275_v54 }
 0x22d   :  { %918 = vmatpush.msrb.mxu0 %v2278_v40  ;;  %938 = vmatpush.msrb.mxu1 %v2281_v46 }
 0x22e   :  { %958 = vmatpush.msrb.mxu2 %v2284_v61  ;;  %978 = vmatpush.msrb.mxu3 %v2287_v60 }
 0x22f   :  { %919 = vmatpush.msrb.mxu0 %v2290_v57  ;;  %939 = vmatpush.msrb.mxu1 %v2293_v50 }
 0x230   :  { %959 = vmatpush.msrb.mxu2 %v2296_v58  ;;  %979 = vmatpush.msrb.mxu3 %v2299_v56 }
 0x231   :  { %920 = vmatpush.msrb.mxu0 %v2302_v62  ;;  %940 = vmatpush.msrb.mxu1 %v2305_v53 }
 0x232   :  { %960 = vmatpush.msrb.mxu2 %v2308_v63  ;;  %980 = vmatpush.msrb.mxu3 %v2311_v51 }
 0x233   :  { %921 = vmatpush.msrb.mxu0 %v2314_v49  ;;  %941 = vmatpush.msrb.mxu1 %v2317_v44 }
 0x234   :  { %961 = vmatpush.msrb.mxu2 %v2320_v45  ;;  %981 = vmatpush.msrb.mxu3 %v2323_v42 }
 0x235   :  { %922 = vmatpush.msrb.mxu0 %v2326_v59  ;;  %942 = vmatpush.msrb.mxu1 %v2329_v37 }
 0x236   :  { %962 = vmatpush.msrb.mxu2 %v2332_v41  ;;  %982 = vmatpush.msrb.mxu3 %v2335_v33 }
 0x237   :  { %923 = vmatpush.msrb.mxu0 %v2338_v0  ;;  %943 = vmatpush.msrb.mxu1 %v2341_v1 }
 0x238   :  { %963 = vmatpush.msrb.mxu2 %v2344_v2  ;;  %983 = vmatpush.msrb.mxu3 %v2347_v3 }
 0x239   :  { %924 = vmatpush.msrb.mxu0 %v2350_v4  ;;  %944 = vmatpush.msrb.mxu1 %v2353_v5 }
 0x23a   :  { %964 = vmatpush.msrb.mxu2 %v2356_v6  ;;  %984 = vmatpush.msrb.mxu3 %v2359_v7 }
 0x23b   :  { %925 = vmatpush.msrb.mxu0 %v2362_v8  ;;  %945 = vmatpush.msrb.mxu1 %v2365_v9 }
 0x23c   :  { %965 = vmatpush.msrb.mxu2 %v2368_v10  ;;  %985 = vmatpush.msrb.mxu3 %v2371_v11 }
 0x23d   :  { %926 = vmatpush.msrb.mxu0 %v2374_v12  ;;  %946 = vmatpush.msrb.mxu1 %v2377_v13 }
 0x23e   :  { %966 = vmatpush.msrb.mxu2 %v2380_v14  ;;  %986 = vmatpush.msrb.mxu3 %v2383_v15 }
 0x23f   :  { %927 = vmatpush.msrb.mxu0 %v2386_v17  ;;  %947 = vmatpush.msrb.mxu1 %v2389_v18 }
 0x240   :  { %967 = vmatpush.msrb.mxu2 %v2392_v19  ;;  %987 = vmatpush.msrb.mxu3 %v2395_v20  ;;  %v2413_v20 = vld [vmem:[#allocation4 + $0x8] sm:$0xff] }
 0x241   :  { %928 = vmatpush.msrb.mxu0 %v2398_v21  ;;  %948 = vmatpush.msrb.mxu1 %v2401_v22  ;;  %2890 = vst [vmem:[#allocation28_spill] sm:$0xff] %v2413_v20  ;;  %v2416_v21 = vld [vmem:[#allocation4 + $0x10] sm:$0xff]  ;;  %v2419_v22 = vld [vmem:[#allocation4 + $0x18] sm:$0xff] }
 0x242   :  { %968 = vmatpush.msrb.mxu2 %v2404_v23  ;;  %988 = vmatpush.msrb.mxu3 %v2407_v24  ;;  %2891 = vst [vmem:[#allocation34_spill] sm:$0xff] %v2416_v21  ;;  %v1417_v24 = vld [vmem:[%s2657_s1 + $0x60] sm:$0xff] }
 0x243   :  { %929 = vmatpush.msrb.mxu0 %v2410_v25  ;;  %949 = vmatpush.msrb.mxu1 %v2413_v20  ;;  %2892 = vst [vmem:[#allocation29_spill] sm:$0xff] %v2419_v22  ;;  %v1418_v25 = vld [vmem:[%s2657_s1 + $0x68] sm:$0xff] }
 0x244   :  { %969 = vmatpush.msrb.mxu2 %v2416_v21  ;;  %989 = vmatpush.msrb.mxu3 %v2419_v22  ;;  %v1420_v21 = vld [vmem:[%s2657_s1 + $0x78] sm:$0xff] }
 0x2a0   :  { %v609_v23 = vpop.f32.mrf.mxu0  ;;  %v629_v19 = vpop.f32.mrf.mxu1 }
 0x2a1   :  { %v672_v18 = vadd.f32 %v1417_v24, %v609_v23  ;;  %v673_v20 = vadd.f32 %v1418_v25, %v629_v19 }
 0x2a3   :  { %v1421_v17 = vmul.f32 -1.442695, %v672_v18  ;;  %v1422_v15 = vmul.f32 -1.442695, %v673_v20  ;;  %v2434_v18 = vld [vmem:[%s2656_s0] sm:$0xff] }
 0x2a4   :  { %2893 = vst [vmem:[#allocation24_spill] sm:$0xff] %v2434_v18  ;;  %vm902_vm11 = vcmp.eq.s32.totalorder %v2434_v18, 4 }
 0x2a5   :  { %1508 = vpow2.f32 %v1421_v17 }
 0x2a6   :  { %1510 = vpow2.f32 %v1422_v15  ;;  %v1419_v15 = vld [vmem:[%s2657_s1 + $0x70] sm:$0xff] }
 0x2a7   :  { %v669_v22 = vpop.f32.mrf.mxu3  ;;  %v649_v17 = vpop.f32.mrf.mxu2 }
 0x2a8   :  { %v675_v14 = vadd.f32 %v1420_v21, %v669_v22 }
 0x2aa   :  { %v1423_v13 = vmul.f32 -1.442695, %v675_v14  ;;  %v903_v14 = vsel %vm902_vm11, 1, %v2865_v55 }
 0x2ab   :  { %v1509_v12 = vpop.eup %1508  ;;  %905 = vperm.xlu2 %1459, %v903_v14  }
 0x2ac   :  { %v1511_v11 = vpop.eup %1510  ;;  %v679_v10 = vadd.f32 1.0, %v1509_v12  ;;  %1512 = vpow2.f32 %v1423_v13  ;;  %v674_v13 = vadd.f32 %v1419_v15, %v649_v17 }
 0x2ad   :  { %v698_v9 = vadd.f32 1.0, %v1511_v11 }
 0x2ae   :  { %1514 = vrcp.f32 %v679_v10  ;;  %v691_v25 = vand.u32 2147483648, %v679_v10  ;;  %v689_v7 = vand.u32 2147483647, %v679_v10  ;;  %vm685_vm14 = vweird.f32 %v679_v10 }
 0x2af   :  { %1516 = vrcp.f32 %v698_v9  ;;  %v710_v18 = vand.u32 2147483648, %v698_v9  ;;  %v708_v55 = vand.u32 2147483647, %v698_v9  ;;  %vm704_vm15 = vweird.f32 %v698_v9 }
 0x2b0   :  { %v692_v15 = vor.u32 1.1754944e-38, %v691_v25  ;;  %vm690_vm2 = vcmp.eq.f32.partialorder %v689_v7, 8.507059e+37  ;;  %v745_v7 = vpop.permute.xlu1 %744 }
 0x2b1   :  { %vm709_vm3 = vcmp.eq.f32.partialorder %v708_v55, 8.507059e+37  ;;  %vm746_vm8 = vcmp.eq.s32.totalorder %v745_v7, 1  ;;  %v2913_v7 = vld [vmem:[#allocation22_spill] sm:$0xff] }
 0x2b2   :  { %v1513_v19 = vpop.eup %1512 }
 0x2b3   :  { %v718_v12 = vadd.f32 1.0, %v1513_v19 }
 0x2b4   :  { %v1515_v11 = vpop.eup %1514 }
 0x2b5   :  { %v1517_v20 = vpop.eup %1516  ;;  %v681_v21 = vmul.f32 %v1515_v11, %v679_v10  ;;  %1518 = vrcp.f32 %v718_v12  ;;  %vm686_vm12 = vweird.f32 %v1515_v11  ;;  %vm724_vm5 = vweird.f32 %v718_v12 }
 0x2b6   :  { %v700_v22 = vmul.f32 %v1517_v20, %v698_v9  ;;  %1520 = vtanh.f32 %v674_v13  ;;  %vm705_vm13 = vweird.f32 %v1517_v20  ;;  %vm687_vm0 = vmor %vm685_vm14, %vm686_vm12 }
 0x2b7   :  { %v682_v23 = vsub.f32 1.0, %v681_v21  ;;  %vm706_vm1 = vmor %vm704_vm15, %vm705_vm13  ;;  %v711_v21 = vor.u32 1.1754944e-38, %v710_v18  ;;  %v728_v18 = vand.u32 2147483647, %v718_v12 }
 0x2b8   :  { %v701_v24 = vsub.f32 1.0, %v700_v22 }
 0x2b9   :  { %v683_v8 = vmul.f32 %v1515_v11, %v682_v23  ;;  %vm729_vm7 = vcmp.eq.f32.partialorder %v728_v18, 8.507059e+37  ;;  %v2912_v18 = vld [vmem:[#allocation20_spill] sm:$0xff] }
 0x2ba   :  { %v702_v6 = vmul.f32 %v1517_v20, %v701_v24 }
 0x2bb   :  { %v1519_v5 = vpop.eup %1518  ;;  %v684_v14 = vadd.f32 %v1515_v11, %v683_v8 }
 0x2bc   :  { %v703_v17 = vadd.f32 %v1517_v20, %v702_v6  ;;  %v720_v19 = vmul.f32 %v1519_v5, %v718_v12  ;;  %v1521_v13 = vpop.eup %1520  ;;  %vm725_vm4 = vweird.f32 %v1519_v5  ;;  %v730_v6 = vand.u32 2147483648, %v718_v12  ;;  %v2899_v12 = vld [vmem:[#allocation26_spill] sm:$0xff] }
 0x2bd   :  { %v688_v22 = vsel %vm687_vm0, %v1515_v11, %v684_v14  ;;  %vm726_vm6 = vmor %vm724_vm5, %vm725_vm4  ;;  %v2900_v14 = vld [vmem:[#allocation11_spill] sm:$0xff] }
 0x2be   :  { %v693_v4 = vsel %vm690_vm2, %v692_v15, %v688_v22  ;;  %v707_v23 = vsel %vm706_vm1, %v1517_v20, %v703_v17  ;;  %v721_v3 = vsub.f32 1.0, %v720_v19  ;;  %v731_v20 = vor.u32 1.1754944e-38, %v730_v6  ;;  %v2901_v15 = vld [vmem:[#allocation12_spill] sm:$0xff]  ;;  %v2902_v17 = vld [vmem:[#allocation13_spill] sm:$0xff]  ;;  %v2903_v19 = vld [vmem:[#allocation30_spill] sm:$0xff] }
 0x2bf   :  { %v712_v24 = vsel %vm709_vm3, %v711_v21, %v707_v23  ;;  %v735_v2 = vmul.f32 %v1521_v13, %v693_v4  ;;  %v2904_v21 = vld [vmem:[#allocation14_spill] sm:$0xff]  ;;  %v2905_v22 = vld [vmem:[#allocation15_spill] sm:$0xff]  ;;  %v2906_v13 = vld [vmem:[#allocation16_spill] sm:$0xff] }
 0x2c0   :  { %v734_v1 = vmul.f32 %v712_v24, %v2224_v16  ;;  %v722_v8 = vmul.f32 %v1519_v5, %v721_v3  ;;  %v2897_v3 = vld [vmem:[#allocation9_spill] sm:$0xff]  ;;  %v2907_v23 = vld [vmem:[#allocation31_spill] sm:$0xff]  ;;  %v2911_v6 = vld [vmem:[#allocation32_spill] sm:$0xff] }
 0x2c1   :  { %v2908_v24 = vld [vmem:[#allocation17_spill] sm:$0xff] }
 0x2c2   :  { %v2442_v10 = vadd.f32 %v735_v2, %v734_v1  ;;  %v723_v9 = vadd.f32 %v1519_v5, %v722_v8  ;;  %v2895_v1 = vld [vmem:[#allocation21_spill] sm:$0xff]  ;;  %v2896_v2 = vld [vmem:[#allocation8_spill] sm:$0xff]  ;;  %v2909_v8 = vld [vmem:[#allocation18_spill] sm:$0xff] }
 0x2c4   :  { %1522 = vtanh.f32 %v2442_v10  ;;  %v727_v11 = vsel %vm726_vm6, %v1519_v5, %v723_v9  ;;  %v2898_v5 = vld [vmem:[#allocation10_spill] sm:$0xff]  ;;  %v2910_v9 = vld [vmem:[#allocation19_spill] sm:$0xff] }
 0x2c5   :  { %v732_v25 = vsel %vm729_vm7, %v731_v20, %v727_v11  ;;  %v2914_v11 = vld [vmem:[#allocation23_spill] sm:$0xff]  ;;  %v2915_v20 = vld [vmem:[#allocation33_spill] sm:$0xff] }
 0x2ca   :  { %v1523_v55 = vpop.eup %1522 }
 0x2cb   :  { %v738_v4 = vmul.f32 %v1523_v55, %v732_v25  ;;  %v2916_v55 = vld [vmem:[#allocation25_spill] sm:$0xff]  ;;  %v2917_v25 = vld [vmem:[#allocation27_spill] sm:$0xff] }
 0x2cd   :  { %v2446_v16 = vsel %vm746_vm8, %v738_v4, %v2228_v52  ;;  %769 = vmatmul.f32.vlgmr.msra.gmra.mxu0 %v738_v4  ;;  %789 = vmatmul.f32.vlgmr.msra.gmra.mxu1 %v738_v4  ;;  %v2894_v52 = vld [vmem:[#allocation7_spill] sm:$0xff] }
 0x2ce   :  { %809 = vmatmul.f32.vlgmr.msra.gmra.mxu2 %v738_v4  ;;  %829 = vmatmul.f32.vlgmr.msra.gmra.mxu3 %v738_v4  ;;  %v2918_v4 = vld [vmem:[#allocation28_spill] sm:$0xff] }
 0x2cf   :  { %1075 = vmatpush.msra.mxu0 %v2230_v26  ;;  %1095 = vmatpush.msra.mxu1 %v2233_v27 }
 0x2d0   :  { %1115 = vmatpush.msra.mxu2 %v2236_v28  ;;  %1135 = vmatpush.msra.mxu3 %v2239_v29 }
 0x2d1   :  { %1076 = vmatpush.msra.mxu0 %v2242_v34  ;;  %1096 = vmatpush.msra.mxu1 %v2245_v30 }
 0x2d2   :  { %1116 = vmatpush.msra.mxu2 %v2248_v31  ;;  %1136 = vmatpush.msra.mxu3 %v2251_v32 }
 0x2d3   :  { %1077 = vmatpush.msra.mxu0 %v2254_v35  ;;  %1097 = vmatpush.msra.mxu1 %v2257_v39 }
 0x2d4   :  { %1117 = vmatpush.msra.mxu2 %v2260_v43  ;;  %1137 = vmatpush.msra.mxu3 %v2263_v47 }
 0x2d5   :  { %1078 = vmatpush.msra.mxu0 %v2266_v48  ;;  %1098 = vmatpush.msra.mxu1 %v2269_v36 }
 0x2d6   :  { %1118 = vmatpush.msra.mxu2 %v2272_v38  ;;  %1138 = vmatpush.msra.mxu3 %v2275_v54 }
 0x2d7   :  { %1079 = vmatpush.msra.mxu0 %v2278_v40  ;;  %1099 = vmatpush.msra.mxu1 %v2281_v46 }
 0x2d8   :  { %1119 = vmatpush.msra.mxu2 %v2284_v61  ;;  %1139 = vmatpush.msra.mxu3 %v2287_v60 }
 0x2d9   :  { %1080 = vmatpush.msra.mxu0 %v2290_v57  ;;  %1100 = vmatpush.msra.mxu1 %v2293_v50 }
 0x2da   :  { %1120 = vmatpush.msra.mxu2 %v2296_v58  ;;  %1140 = vmatpush.msra.mxu3 %v2299_v56 }
 0x2db   :  { %1081 = vmatpush.msra.mxu0 %v2302_v62  ;;  %1101 = vmatpush.msra.mxu1 %v2305_v53 }
 0x2dc   :  { %1121 = vmatpush.msra.mxu2 %v2308_v63  ;;  %1141 = vmatpush.msra.mxu3 %v2311_v51 }
 0x2dd   :  { %1082 = vmatpush.msra.mxu0 %v2314_v49  ;;  %1102 = vmatpush.msra.mxu1 %v2317_v44 }
 0x2de   :  { %1122 = vmatpush.msra.mxu2 %v2320_v45  ;;  %1142 = vmatpush.msra.mxu3 %v2323_v42 }
 0x2df   :  { %1083 = vmatpush.msra.mxu0 %v2326_v59  ;;  %1103 = vmatpush.msra.mxu1 %v2329_v37 }
 0x2e0   :  { %1123 = vmatpush.msra.mxu2 %v2332_v41  ;;  %1143 = vmatpush.msra.mxu3 %v2335_v33 }
 0x2e1   :  { %1084 = vmatpush.msra.mxu0 %v2338_v0  ;;  %1104 = vmatpush.msra.mxu1 %v2894_v52 }
 0x2e2   :  { %1124 = vmatpush.msra.mxu2 %v2895_v1  ;;  %1144 = vmatpush.msra.mxu3 %v2896_v2 }
 0x2e3   :  { %1085 = vmatpush.msra.mxu0 %v2897_v3  ;;  %1105 = vmatpush.msra.mxu1 %v2898_v5 }
 0x2e4   :  { %1125 = vmatpush.msra.mxu2 %v2899_v12  ;;  %1145 = vmatpush.msra.mxu3 %v2900_v14 }
 0x2e5   :  { %1086 = vmatpush.msra.mxu0 %v2901_v15  ;;  %1106 = vmatpush.msra.mxu1 %v2902_v17 }
 0x2e6   :  { %1126 = vmatpush.msra.mxu2 %v2903_v19  ;;  %1146 = vmatpush.msra.mxu3 %v2904_v21 }
 0x2e7   :  { %1087 = vmatpush.msra.mxu0 %v2905_v22  ;;  %1107 = vmatpush.msra.mxu1 %v2906_v13 }
 0x2e8   :  { %1127 = vmatpush.msra.mxu2 %v2907_v23  ;;  %1147 = vmatpush.msra.mxu3 %v2908_v24  ;;  %v2919_v24 = vld [vmem:[#allocation34_spill] sm:$0xff] }
 0x2e9   :  { %1088 = vmatpush.msra.mxu0 %v2909_v8  ;;  %1108 = vmatpush.msra.mxu1 %v2910_v9  ;;  %v2920_v8 = vld [vmem:[#allocation29_spill] sm:$0xff] }
 0x2ea   :  { %1128 = vmatpush.msra.mxu2 %v2911_v6  ;;  %1148 = vmatpush.msra.mxu3 %v2912_v18  ;;  %v1424_v18 = vld [vmem:[%s2657_s1 + $0x80] sm:$0xff] }
 0x2eb   :  { %1089 = vmatpush.msra.mxu0 %v2913_v7  ;;  %1109 = vmatpush.msra.mxu1 %v2914_v11  ;;  %v1425_v11 = vld [vmem:[%s2657_s1 + $0x88] sm:$0xff] }
 0x2ec   :  { %1129 = vmatpush.msra.mxu2 %v2915_v20  ;;  %1149 = vmatpush.msra.mxu3 %v2916_v55 }
 0x2ed   :  { %1090 = vmatpush.msra.mxu0 %v2917_v25  ;;  %1110 = vmatpush.msra.mxu1 %v2918_v4 }
 0x2ee   :  { %1130 = vmatpush.msra.mxu2 %v2919_v24  ;;  %1150 = vmatpush.msra.mxu3 %v2920_v8  ;;  %v1427_v24 = vld [vmem:[%s2657_s1 + $0x98] sm:$0xff] }
 0x34a   :  { %v770_v7 = vpop.f32.mrf.mxu0  ;;  %v790_v20 = vpop.f32.mrf.mxu1 }
 0x34b   :  { %v833_v6 = vadd.f32 %v1424_v18, %v770_v7  ;;  %v834_v55 = vadd.f32 %v1425_v11, %v790_v20  ;;  %v2921_v18 = vld [vmem:[#allocation24_spill] sm:$0xff]  ;;  %v2922_v7 = vmov 0  }
 0x34c   :  { %vm1063_vm9 = vcmp.eq.s32.totalorder %v2921_v18, 5 }
 0x34d   :  { %v1428_v9 = vmul.f32 -1.442695, %v833_v6  ;;  %v1429_v25 = vmul.f32 -1.442695, %v834_v55  ;;  %v1064_v11 = vsel %vm1063_vm9, 1, %v2922_v7 }
 0x34e   :  { %1066 = vperm.xlu2 %1459, %v1064_v11  }
 0x34f   :  { %1524 = vpow2.f32 %v1428_v9  ;;  %v1426_v9 = vld [vmem:[%s2657_s1 + $0x90] sm:$0xff] }
 0x350   :  { %1526 = vpow2.f32 %v1429_v25 }
 0x351   :  { %v830_v8 = vpop.f32.mrf.mxu3  ;;  %v810_v6 = vpop.f32.mrf.mxu2 }
 0x352   :  { %v836_v4 = vadd.f32 %v1427_v24, %v830_v8  ;;  %v835_v55 = vadd.f32 %v1426_v9, %v810_v6 }
 0x354   :  { %v1430_v23 = vmul.f32 -1.442695, %v836_v4 }
 0x355   :  { %v1525_v13 = vpop.eup %1524 }
 0x356   :  { %v1527_v22 = vpop.eup %1526  ;;  %v840_v21 = vadd.f32 1.0, %v1525_v13  ;;  %1528 = vpow2.f32 %v1430_v23 }
 0x357   :  { %v859_v19 = vadd.f32 1.0, %v1527_v22 }
 0x358   :  { %1530 = vrcp.f32 %v840_v21  ;;  %v852_v17 = vand.u32 2147483648, %v840_v21  ;;  %v850_v14 = vand.u32 2147483647, %v840_v21  ;;  %vm846_vm12 = vweird.f32 %v840_v21 }
 0x359   :  { %1532 = vrcp.f32 %v859_v19  ;;  %v871_v18 = vand.u32 2147483648, %v859_v19  ;;  %v869_v7 = vand.u32 2147483647, %v859_v19  ;;  %vm865_vm13 = vweird.f32 %v859_v19 }
 0x35a   :  { %v853_v9 = vor.u32 1.1754944e-38, %v852_v17  ;;  %vm851_vm0 = vcmp.eq.f32.partialorder %v850_v14, 8.507059e+37  ;;  %v906_v14 = vpop.permute.xlu2 %905 }
 0x35b   :  { %vm870_vm1 = vcmp.eq.f32.partialorder %v869_v7, 8.507059e+37  ;;  %vm907_vm6 = vcmp.eq.s32.totalorder %v906_v14, 1 }
 0x35c   :  { %v1529_v20 = vpop.eup %1528 }
 0x35d   :  { %v879_v24 = vadd.f32 1.0, %v1529_v20 }
 0x35e   :  { %v1531_v8 = vpop.eup %1530 }
 0x35f   :  { %v1533_v25 = vpop.eup %1532  ;;  %v842_v13 = vmul.f32 %v1531_v8, %v840_v21  ;;  %1534 = vrcp.f32 %v879_v24  ;;  %vm847_vm10 = vweird.f32 %v1531_v8  ;;  %vm885_vm3 = vweird.f32 %v879_v24 }
 0x360   :  { %v861_v22 = vmul.f32 %v1533_v25, %v859_v19  ;;  %1536 = vtanh.f32 %v835_v55  ;;  %vm866_vm11 = vweird.f32 %v1533_v25  ;;  %vm848_vm14 = vmor %vm846_vm12, %vm847_vm10  ;;  %v889_v17 = vand.u32 2147483647, %v879_v24 }
 0x361   :  { %v843_v23 = vsub.f32 1.0, %v842_v13  ;;  %vm867_vm15 = vmor %vm865_vm13, %vm866_vm11  ;;  %v872_v13 = vor.u32 1.1754944e-38, %v871_v18 }
 0x362   :  { %v862_v4 = vsub.f32 1.0, %v861_v22  ;;  %vm890_vm5 = vcmp.eq.f32.partialorder %v889_v17, 8.507059e+37 }
 0x363   :  { %v844_v15 = vmul.f32 %v1531_v8, %v843_v23 }
 0x364   :  { %v863_v12 = vmul.f32 %v1533_v25, %v862_v4 }
 0x365   :  { %v1535_v5 = vpop.eup %1534  ;;  %v845_v11 = vadd.f32 %v1531_v8, %v844_v15 }
 0x366   :  { %v864_v6 = vadd.f32 %v1533_v25, %v863_v12  ;;  %v881_v20 = vmul.f32 %v1535_v5, %v879_v24  ;;  %v1537_v55 = vpop.eup %1536  ;;  %vm886_vm2 = vweird.f32 %v1535_v5  ;;  %v891_v12 = vand.u32 2147483648, %v879_v24 }
 0x367   :  { %v849_v22 = vsel %vm848_vm14, %v1531_v8, %v845_v11  ;;  %vm887_vm4 = vmor %vm885_vm3, %vm886_vm2  ;;  %v2950_v11 = vld [vmem:[#allocation24_spill] sm:$0xff] }
 0x368   :  { %v854_v3 = vsel %vm851_vm0, %v853_v9, %v849_v22  ;;  %v868_v23 = vsel %vm867_vm15, %v1533_v25, %v864_v6  ;;  %v882_v2 = vsub.f32 1.0, %v881_v20  ;;  %v892_v8 = vor.u32 1.1754944e-38, %v891_v12  ;;  %v1433_v9 = vld [vmem:[%s2657_s1 + $0xb0] sm:$0xff] }
 0x369   :  { %v873_v4 = vsel %vm870_vm1, %v872_v13, %v868_v23  ;;  %v896_v1 = vmul.f32 %v1537_v55, %v854_v3  ;;  %vm1224_vm7 = vcmp.eq.s32.totalorder %v2950_v11, 6  ;;  %v2951_v20 = vmov 0  }
 0x36a   :  { %v895_v52 = vmul.f32 %v873_v4, %v2442_v10  ;;  %v883_v15 = vmul.f32 %v1535_v5, %v882_v2  ;;  %v1225_v13 = vsel %vm1224_vm7, 1, %v2951_v20 }
 0x36b   :  { %1227 = vperm.xlu0 %1457, %v1225_v13  }
 0x36c   :  { %v2527_v21 = vadd.f32 %v896_v1, %v895_v52  ;;  %v884_v19 = vadd.f32 %v1535_v5, %v883_v15 }
 0x36e   :  { %1538 = vtanh.f32 %v2527_v21  ;;  %v888_v18 = vsel %vm887_vm4, %v1535_v5, %v884_v19 }
 0x36f   :  { %v893_v25 = vsel %vm890_vm5, %v892_v8, %v888_v18  ;;  %vm1385_vm5 = vcmp.eq.s32.totalorder %v2950_v11, 7 }
 0x374   :  { %v1539_v7 = vpop.eup %1538 }
 0x375   :  { %v899_v3 = vmul.f32 %v1539_v7, %v893_v25 }
 0x377   :  { %v2531_v10 = vsel %vm907_vm6, %v899_v3, %v2446_v16  ;;  %930 = vmatmul.f32.vlgmr.msrb.gmra.mxu0 %v899_v3  ;;  %950 = vmatmul.f32.vlgmr.msrb.gmra.mxu1 %v899_v3 }
 0x378   :  { %970 = vmatmul.f32.vlgmr.msrb.gmra.mxu2 %v899_v3  ;;  %990 = vmatmul.f32.vlgmr.msrb.gmra.mxu3 %v899_v3 }
 0x379   :  { %1236 = vmatpush.msrb.mxu0 %v2230_v26  ;;  %1256 = vmatpush.msrb.mxu1 %v2233_v27  ;;  %v2923_v26 = vld [vmem:[#allocation7_spill] sm:$0xff]  ;;  %v2924_v27 = vld [vmem:[#allocation21_spill] sm:$0xff] }
 0x37a   :  { %1276 = vmatpush.msrb.mxu2 %v2236_v28  ;;  %1296 = vmatpush.msrb.mxu3 %v2239_v29  ;;  %v2925_v28 = vld [vmem:[#allocation8_spill] sm:$0xff]  ;;  %v2926_v29 = vld [vmem:[#allocation9_spill] sm:$0xff] }
 0x37b   :  { %1237 = vmatpush.msrb.mxu0 %v2242_v34  ;;  %1257 = vmatpush.msrb.mxu1 %v2245_v30  ;;  %v2927_v34 = vld [vmem:[#allocation10_spill] sm:$0xff] }
 0x37c   :  { %1277 = vmatpush.msrb.mxu2 %v2248_v31  ;;  %1297 = vmatpush.msrb.mxu3 %v2251_v32  ;;  %v2928_v30 = vld [vmem:[#allocation26_spill] sm:$0xff]  ;;  %v2929_v31 = vld [vmem:[#allocation11_spill] sm:$0xff]  ;;  %v2930_v32 = vld [vmem:[#allocation12_spill] sm:$0xff] }
 0x37d   :  { %1238 = vmatpush.msrb.mxu0 %v2254_v35  ;;  %1258 = vmatpush.msrb.mxu1 %v2257_v39  ;;  %v2931_v35 = vld [vmem:[#allocation13_spill] sm:$0xff]  ;;  %v2932_v39 = vld [vmem:[#allocation30_spill] sm:$0xff] }
 0x37e   :  { %1278 = vmatpush.msrb.mxu2 %v2260_v43  ;;  %1298 = vmatpush.msrb.mxu3 %v2263_v47  ;;  %v2933_v43 = vld [vmem:[#allocation14_spill] sm:$0xff]  ;;  %v2934_v47 = vld [vmem:[#allocation15_spill] sm:$0xff] }
 0x37f   :  { %1239 = vmatpush.msrb.mxu0 %v2266_v48  ;;  %1259 = vmatpush.msrb.mxu1 %v2269_v36  ;;  %v2935_v48 = vld [vmem:[#allocation16_spill] sm:$0xff]  ;;  %v2936_v36 = vld [vmem:[#allocation31_spill] sm:$0xff] }
 0x380   :  { %1279 = vmatpush.msrb.mxu2 %v2272_v38  ;;  %1299 = vmatpush.msrb.mxu3 %v2275_v54  ;;  %v2937_v38 = vld [vmem:[#allocation17_spill] sm:$0xff]  ;;  %v2938_v54 = vld [vmem:[#allocation18_spill] sm:$0xff] }
 0x381   :  { %1240 = vmatpush.msrb.mxu0 %v2278_v40  ;;  %1260 = vmatpush.msrb.mxu1 %v2281_v46  ;;  %v2939_v40 = vld [vmem:[#allocation19_spill] sm:$0xff]  ;;  %v2940_v46 = vld [vmem:[#allocation32_spill] sm:$0xff] }
 0x382   :  { %1280 = vmatpush.msrb.mxu2 %v2284_v61  ;;  %1300 = vmatpush.msrb.mxu3 %v2287_v60  ;;  %v2941_v61 = vld [vmem:[#allocation20_spill] sm:$0xff]  ;;  %v2942_v60 = vld [vmem:[#allocation22_spill] sm:$0xff] }
 0x383   :  { %1241 = vmatpush.msrb.mxu0 %v2290_v57  ;;  %1261 = vmatpush.msrb.mxu1 %v2293_v50  ;;  %v2943_v57 = vld [vmem:[#allocation23_spill] sm:$0xff]  ;;  %v2944_v50 = vld [vmem:[#allocation33_spill] sm:$0xff] }
 0x384   :  { %1281 = vmatpush.msrb.mxu2 %v2296_v58  ;;  %1301 = vmatpush.msrb.mxu3 %v2299_v56  ;;  %v2945_v58 = vld [vmem:[#allocation25_spill] sm:$0xff]  ;;  %v2946_v56 = vld [vmem:[#allocation27_spill] sm:$0xff] }
 0x385   :  { %1242 = vmatpush.msrb.mxu0 %v2302_v62  ;;  %1262 = vmatpush.msrb.mxu1 %v2305_v53  ;;  %v2947_v62 = vld [vmem:[#allocation28_spill] sm:$0xff]  ;;  %v2948_v53 = vld [vmem:[#allocation34_spill] sm:$0xff] }
 0x386   :  { %1282 = vmatpush.msrb.mxu2 %v2308_v63  ;;  %1302 = vmatpush.msrb.mxu3 %v2311_v51  ;;  %v2949_v63 = vld [vmem:[#allocation29_spill] sm:$0xff]  ;;  %v1431_v51 = vld [vmem:[%s2657_s1 + $0xa0] sm:$0xff] }
 0x387   :  { %1243 = vmatpush.msrb.mxu0 %v2314_v49  ;;  %1263 = vmatpush.msrb.mxu1 %v2317_v44  ;;  %v1432_v49 = vld [vmem:[%s2657_s1 + $0xa8] sm:$0xff] }
 0x388   :  { %1283 = vmatpush.msrb.mxu2 %v2320_v45  ;;  %1303 = vmatpush.msrb.mxu3 %v2323_v42 }
 0x389   :  { %1244 = vmatpush.msrb.mxu0 %v2326_v59  ;;  %1264 = vmatpush.msrb.mxu1 %v2329_v37 }
 0x38a   :  { %1284 = vmatpush.msrb.mxu2 %v2332_v41  ;;  %1304 = vmatpush.msrb.mxu3 %v2335_v33  ;;  %v1434_v33 = vld [vmem:[%s2657_s1 + $0xb8] sm:$0xff] }
 0x38b   :  { %1245 = vmatpush.msrb.mxu0 %v2338_v0  ;;  %1265 = vmatpush.msrb.mxu1 %v2923_v26 }
 0x38c   :  { %1285 = vmatpush.msrb.mxu2 %v2924_v27  ;;  %1305 = vmatpush.msrb.mxu3 %v2925_v28 }
 0x38d   :  { %1246 = vmatpush.msrb.mxu0 %v2926_v29  ;;  %1266 = vmatpush.msrb.mxu1 %v2927_v34 }
 0x38e   :  { %1286 = vmatpush.msrb.mxu2 %v2928_v30  ;;  %1306 = vmatpush.msrb.mxu3 %v2929_v31 }
 0x38f   :  { %1247 = vmatpush.msrb.mxu0 %v2930_v32  ;;  %1267 = vmatpush.msrb.mxu1 %v2931_v35 }
 0x390   :  { %1287 = vmatpush.msrb.mxu2 %v2932_v39  ;;  %1307 = vmatpush.msrb.mxu3 %v2933_v43 }
 0x391   :  { %1248 = vmatpush.msrb.mxu0 %v2934_v47  ;;  %1268 = vmatpush.msrb.mxu1 %v2935_v48 }
 0x392   :  { %1288 = vmatpush.msrb.mxu2 %v2936_v36  ;;  %1308 = vmatpush.msrb.mxu3 %v2937_v38 }
 0x393   :  { %1249 = vmatpush.msrb.mxu0 %v2938_v54  ;;  %1269 = vmatpush.msrb.mxu1 %v2939_v40 }
 0x394   :  { %1289 = vmatpush.msrb.mxu2 %v2940_v46  ;;  %1309 = vmatpush.msrb.mxu3 %v2941_v61 }
 0x395   :  { %1250 = vmatpush.msrb.mxu0 %v2942_v60  ;;  %1270 = vmatpush.msrb.mxu1 %v2943_v57 }
 0x396   :  { %1290 = vmatpush.msrb.mxu2 %v2944_v50  ;;  %1310 = vmatpush.msrb.mxu3 %v2945_v58 }
 0x397   :  { %1251 = vmatpush.msrb.mxu0 %v2946_v56  ;;  %1271 = vmatpush.msrb.mxu1 %v2947_v62 }
 0x398   :  { %1291 = vmatpush.msrb.mxu2 %v2948_v53  ;;  %1311 = vmatpush.msrb.mxu3 %v2949_v63  ;;  %v1438_v63 = vld [vmem:[%s2657_s1 + $0xc0] sm:$0xff] }
 0x3a8   :  { %v1067_v57 = vpop.permute.xlu2 %1066 }
 0x3a9   :  { %vm1068_vm4 = vcmp.eq.s32.totalorder %v1067_v57, 1 }
 0x3f4   :  { %v931_v44 = vpop.f32.mrf.mxu0  ;;  %v951_v45 = vpop.f32.mrf.mxu1 }
 0x3f5   :  { %v994_v42 = vadd.f32 %v1431_v51, %v931_v44  ;;  %v995_v59 = vadd.f32 %v1432_v49, %v951_v45  ;;  %v1439_v51 = vld [vmem:[%s2657_s1 + $0xc8] sm:$0xff] }
 0x3f7   :  { %v1435_v37 = vmul.f32 -1.442695, %v994_v42  ;;  %v1436_v41 = vmul.f32 -1.442695, %v995_v59 }
 0x3f9   :  { %1540 = vpow2.f32 %v1435_v37 }
 0x3fa   :  { %1542 = vpow2.f32 %v1436_v41 }
 0x3fb   :  { %v991_v0 = vpop.f32.mrf.mxu3  ;;  %v971_v6 = vpop.f32.mrf.mxu2 }
 0x3fc   :  { %v997_v16 = vadd.f32 %v1434_v33, %v991_v0  ;;  %v996_v4 = vadd.f32 %v1433_v9, %v971_v6  ;;  %v1386_v9 = vsel %vm1385_vm5, 1, %v2951_v20 }
 0x3fd   :  { %1388 = vperm.xlu1 %1458, %v1386_v9  }
 0x3fe   :  { %v1437_v52 = vmul.f32 -1.442695, %v997_v16 }
 0x3ff   :  { %v1541_v1 = vpop.eup %1540 }
 0x400   :  { %v1543_v2 = vpop.eup %1542  ;;  %v1001_v5 = vadd.f32 1.0, %v1541_v1  ;;  %1544 = vpow2.f32 %v1437_v52 }
 0x401   :  { %v1020_v24 = vadd.f32 1.0, %v1543_v2 }
 0x402   :  { %1546 = vrcp.f32 %v1001_v5  ;;  %v1013_v18 = vand.u32 2147483648, %v1001_v5  ;;  %v1011_v25 = vand.u32 2147483647, %v1001_v5  ;;  %vm1007_vm10 = vweird.f32 %v1001_v5 }
 0x403   :  { %1548 = vrcp.f32 %v1020_v24  ;;  %v1032_v8 = vand.u32 2147483648, %v1020_v24  ;;  %v1030_v26 = vand.u32 2147483647, %v1020_v24  ;;  %vm1026_vm11 = vweird.f32 %v1020_v24 }
 0x404   :  { %v1014_v29 = vor.u32 1.1754944e-38, %v1013_v18  ;;  %vm1012_vm14 = vcmp.eq.f32.partialorder %v1011_v25, 8.507059e+37 }
 0x405   :  { %v1033_v31 = vor.u32 1.1754944e-38, %v1032_v8  ;;  %vm1031_vm15 = vcmp.eq.f32.partialorder %v1030_v26, 8.507059e+37 }
 0x406   :  { %v1545_v22 = vpop.eup %1544 }
 0x407   :  { %v1040_v55 = vadd.f32 1.0, %v1545_v22 }
 0x408   :  { %v1547_v23 = vpop.eup %1546 }
 0x409   :  { %v1549_v15 = vpop.eup %1548  ;;  %v1003_v19 = vmul.f32 %v1547_v23, %v1001_v5  ;;  %1550 = vrcp.f32 %v1040_v55  ;;  %vm1008_vm8 = vweird.f32 %v1547_v23  ;;  %v1052_v61 = vand.u32 2147483648, %v1040_v55  ;;  %v1440_v5 = vld [vmem:[%s2657_s1 + $0xd0] sm:$0xff] }
 0x40a   :  { %v1022_v12 = vmul.f32 %v1549_v15, %v1020_v24  ;;  %1552 = vtanh.f32 %v996_v4  ;;  %vm1027_vm9 = vweird.f32 %v1549_v15  ;;  %vm1009_vm12 = vmor %vm1007_vm10, %vm1008_vm8  ;;  %vm1046_vm1 = vweird.f32 %v1040_v55 }
 0x40b   :  { %v1004_v17 = vsub.f32 1.0, %v1003_v19  ;;  %vm1028_vm13 = vmor %vm1026_vm11, %vm1027_vm9  ;;  %v1050_v60 = vand.u32 2147483647, %v1040_v55  ;;  %v1053_v58 = vor.u32 1.1754944e-38, %v1052_v61 }
 0x40c   :  { %v1023_v14 = vsub.f32 1.0, %v1022_v12 }
 0x40d   :  { %v1005_v7 = vmul.f32 %v1547_v23, %v1004_v17  ;;  %vm1051_vm3 = vcmp.eq.f32.partialorder %v1050_v60, 8.507059e+37 }
 0x40e   :  { %v1024_v3 = vmul.f32 %v1549_v15, %v1023_v14 }
 0x40f   :  { %v1551_v27 = vpop.eup %1550  ;;  %v1006_v28 = vadd.f32 %v1547_v23, %v1005_v7 }
 0x410   :  { %v1025_v34 = vadd.f32 %v1549_v15, %v1024_v3  ;;  %v1042_v30 = vmul.f32 %v1551_v27, %v1040_v55  ;;  %v1553_v35 = vpop.eup %1552  ;;  %vm1047_vm0 = vweird.f32 %v1551_v27 }
 0x411   :  { %v1010_v32 = vsel %vm1009_vm12, %v1547_v23, %v1006_v28  ;;  %vm1048_vm2 = vmor %vm1046_vm1, %vm1047_vm0 }
 0x412   :  { %v1015_v39 = vsel %vm1012_vm14, %v1014_v29, %v1010_v32  ;;  %v1029_v43 = vsel %vm1028_vm13, %v1549_v15, %v1025_v34  ;;  %v1043_v47 = vsub.f32 1.0, %v1042_v30 }
 0x413   :  { %v1034_v48 = vsel %vm1031_vm15, %v1033_v31, %v1029_v43  ;;  %v1057_v36 = vmul.f32 %v1553_v35, %v1015_v39 }
 0x414   :  { %v1056_v38 = vmul.f32 %v1034_v48, %v2527_v21  ;;  %v1044_v54 = vmul.f32 %v1551_v27, %v1043_v47 }
 0x416   :  { %v2612_v40 = vadd.f32 %v1057_v36, %v1056_v38  ;;  %v1045_v46 = vadd.f32 %v1551_v27, %v1044_v54 }
 0x418   :  { %1554 = vtanh.f32 %v2612_v40  ;;  %v1049_v50 = vsel %vm1048_vm2, %v1551_v27, %v1045_v46  ;;  %v1228_v46 = vpop.permute.xlu0 %1227 }
 0x419   :  { %v1054_v62 = vsel %vm1051_vm3, %v1053_v58, %v1049_v50  ;;  %vm1229_vm2 = vcmp.eq.s32.totalorder %v1228_v46, 1 }
 0x41e   :  { %v1555_v56 = vpop.eup %1554 }
 0x41f   :  { %v1060_v53 = vmul.f32 %v1555_v56, %v1054_v62  ;;  %v1445_v56 = vld [vmem:[%s2657_s1 + $0xe0] sm:$0xff]  ;;  %v1446_v62 = vld [vmem:[%s2657_s1 + $0xe8] sm:$0xff] }
 0x421   :  { %v2616_v21 = vsel %vm1068_vm4, %v1060_v53, %v2531_v10  ;;  %1091 = vmatmul.f32.vlgmr.msra.gmra.mxu0 %v1060_v53  ;;  %1111 = vmatmul.f32.vlgmr.msra.gmra.mxu1 %v1060_v53  ;;  %v1441_v10 = vld [vmem:[%s2657_s1 + $0xd8] sm:$0xff] }
 0x422   :  { %1131 = vmatmul.f32.vlgmr.msra.gmra.mxu2 %v1060_v53  ;;  %1151 = vmatmul.f32.vlgmr.msra.gmra.mxu3 %v1060_v53 }
 0x49e   :  { %v1092_v49 = vpop.f32.mrf.mxu0  ;;  %v1112_v44 = vpop.f32.mrf.mxu1 }
 0x49f   :  { %v1155_v45 = vadd.f32 %v1438_v63, %v1092_v49  ;;  %v1156_v42 = vadd.f32 %v1439_v51, %v1112_v44 }
 0x4a1   :  { %v1442_v59 = vmul.f32 -1.442695, %v1155_v45  ;;  %v1443_v37 = vmul.f32 -1.442695, %v1156_v42 }
 0x4a3   :  { %1556 = vpow2.f32 %v1442_v59 }
 0x4a4   :  { %1558 = vpow2.f32 %v1443_v37 }
 0x4a5   :  { %v1152_v41 = vpop.f32.mrf.mxu3  ;;  %v1132_v24 = vpop.f32.mrf.mxu2 }
 0x4a6   :  { %v1158_v33 = vadd.f32 %v1441_v10, %v1152_v41  ;;  %v1157_v55 = vadd.f32 %v1440_v5, %v1132_v24 }
 0x4a8   :  { %v1444_v0 = vmul.f32 -1.442695, %v1158_v33 }
 0x4a9   :  { %v1557_v16 = vpop.eup %1556 }
 0x4aa   :  { %v1559_v52 = vpop.eup %1558  ;;  %v1162_v1 = vadd.f32 1.0, %v1557_v16  ;;  %1560 = vpow2.f32 %v1444_v0  ;;  %v1447_v16 = vld [vmem:[%s2657_s1 + $0xf0] sm:$0xff] }
 0x4ab   :  { %v1181_v2 = vadd.f32 1.0, %v1559_v52 }
 0x4ac   :  { %1562 = vrcp.f32 %v1162_v1  ;;  %v1174_v17 = vand.u32 2147483648, %v1162_v1  ;;  %v1172_v18 = vand.u32 2147483647, %v1162_v1  ;;  %vm1168_vm8 = vweird.f32 %v1162_v1 }
 0x4ad   :  { %1564 = vrcp.f32 %v1181_v2  ;;  %v1193_v11 = vand.u32 2147483648, %v1181_v2  ;;  %v1191_v20 = vand.u32 2147483647, %v1181_v2  ;;  %vm1187_vm9 = vweird.f32 %v1181_v2 }
 0x4ae   :  { %v1175_v3 = vor.u32 1.1754944e-38, %v1174_v17  ;;  %vm1173_vm12 = vcmp.eq.f32.partialorder %v1172_v18, 8.507059e+37 }
 0x4af   :  { %v1194_v28 = vor.u32 1.1754944e-38, %v1193_v11  ;;  %vm1192_vm13 = vcmp.eq.f32.partialorder %v1191_v20, 8.507059e+37 }
 0x4b0   :  { %v1561_v6 = vpop.eup %1560 }
 0x4b1   :  { %v1201_v13 = vadd.f32 1.0, %v1561_v6 }
 0x4b2   :  { %v1563_v22 = vpop.eup %1562 }
 0x4b3   :  { %v1565_v23 = vpop.eup %1564  ;;  %v1164_v4 = vmul.f32 %v1563_v22, %v1162_v1  ;;  %1566 = vrcp.f32 %v1201_v13  ;;  %vm1169_vm6 = vweird.f32 %v1563_v22  ;;  %v1213_v38 = vand.u32 2147483648, %v1201_v13 }
 0x4b4   :  { %v1183_v15 = vmul.f32 %v1565_v23, %v1181_v2  ;;  %1568 = vtanh.f32 %v1157_v55  ;;  %vm1188_vm7 = vweird.f32 %v1565_v23  ;;  %vm1170_vm10 = vmor %vm1168_vm8, %vm1169_vm6  ;;  %vm1207_vm15 = vweird.f32 %v1201_v13 }
 0x4b5   :  { %v1165_v19 = vsub.f32 1.0, %v1164_v4  ;;  %vm1189_vm11 = vmor %vm1187_vm9, %vm1188_vm7  ;;  %v1211_v54 = vand.u32 2147483647, %v1201_v13  ;;  %v1214_v60 = vor.u32 1.1754944e-38, %v1213_v38  ;;  %v1389_v38 = vpop.permute.xlu1 %1388 }
 0x4b6   :  { %v1184_v12 = vsub.f32 1.0, %v1183_v15 }
 0x4b7   :  { %v1166_v14 = vmul.f32 %v1563_v22, %v1165_v19  ;;  %vm1212_vm1 = vcmp.eq.f32.partialorder %v1211_v54, 8.507059e+37 }
 0x4b8   :  { %v1185_v8 = vmul.f32 %v1565_v23, %v1184_v12 }
 0x4b9   :  { %v1567_v7 = vpop.eup %1566  ;;  %v1167_v25 = vadd.f32 %v1563_v22, %v1166_v14 }
 0x4ba   :  { %v1186_v26 = vadd.f32 %v1565_v23, %v1185_v8  ;;  %v1203_v27 = vmul.f32 %v1567_v7, %v1201_v13  ;;  %v1569_v34 = vpop.eup %1568  ;;  %vm1208_vm14 = vweird.f32 %v1567_v7 }
 0x4bb   :  { %v1171_v29 = vsel %vm1170_vm10, %v1563_v22, %v1167_v25  ;;  %vm1209_vm0 = vmor %vm1207_vm15, %vm1208_vm14  ;;  %vm1390_vm15 = vcmp.eq.s32.totalorder %v1389_v38, 1 }
 0x4bc   :  { %v1176_v30 = vsel %vm1173_vm12, %v1175_v3, %v1171_v29  ;;  %v1190_v31 = vsel %vm1189_vm11, %v1565_v23, %v1186_v26  ;;  %v1204_v32 = vsub.f32 1.0, %v1203_v27 }
 0x4bd   :  { %v1195_v35 = vsel %vm1192_vm13, %v1194_v28, %v1190_v31  ;;  %v1218_v39 = vmul.f32 %v1569_v34, %v1176_v30 }
 0x4be   :  { %v1217_v43 = vmul.f32 %v1195_v35, %v2612_v40  ;;  %v1205_v47 = vmul.f32 %v1567_v7, %v1204_v32 }
 0x4c0   :  { %v2633_v48 = vadd.f32 %v1218_v39, %v1217_v43  ;;  %v1206_v36 = vadd.f32 %v1567_v7, %v1205_v47 }
 0x4c2   :  { %1570 = vtanh.f32 %v2633_v48  ;;  %v1210_v61 = vsel %vm1209_vm0, %v1567_v7, %v1206_v36 }
 0x4c3   :  { %v1215_v50 = vsel %vm1212_vm1, %v1214_v60, %v1210_v61 }
 0x4c8   :  { %v1571_v57 = vpop.eup %1570 }
 0x4c9   :  { %v1221_v58 = vmul.f32 %v1571_v57, %v1215_v50 }
 0x4cb   :  { %v2637_v40 = vsel %vm1229_vm2, %v1221_v58, %v2616_v21  ;;  %1252 = vmatmul.f32.vlgmr.msrb.gmra.mxu0 %v1221_v58  ;;  %1272 = vmatmul.f32.vlgmr.msrb.gmra.mxu1 %v1221_v58  ;;  %v1448_v21 = vld [vmem:[%s2657_s1 + $0xf8] sm:$0xff] }
 0x4cc   :  { %1292 = vmatmul.f32.vlgmr.msrb.gmra.mxu2 %v1221_v58  ;;  %1312 = vmatmul.f32.vlgmr.msrb.gmra.mxu3 %v1221_v58 }
 0x548   :  { %v1253_v53 = vpop.f32.mrf.mxu0  ;;  %v1273_v63 = vpop.f32.mrf.mxu1 }
 0x549   :  { %v1316_v51 = vadd.f32 %v1445_v56, %v1253_v53  ;;  %v1317_v49 = vadd.f32 %v1446_v62, %v1273_v63 }
 0x54b   :  { %v1449_v44 = vmul.f32 -1.442695, %v1316_v51  ;;  %v1450_v45 = vmul.f32 -1.442695, %v1317_v49 }
 0x54d   :  { %1572 = vpow2.f32 %v1449_v44 }
 0x54e   :  { %1574 = vpow2.f32 %v1450_v45 }
 0x54f   :  { %v1313_v42 = vpop.f32.mrf.mxu3  ;;  %v1293_v52 = vpop.f32.mrf.mxu2 }
 0x550   :  { %v1319_v59 = vadd.f32 %v1448_v21, %v1313_v42  ;;  %v1318_v24 = vadd.f32 %v1447_v16, %v1293_v52 }
 0x552   :  { %v1451_v37 = vmul.f32 -1.442695, %v1319_v59 }
 0x553   :  { %v1573_v10 = vpop.eup %1572 }
 0x554   :  { %v1575_v41 = vpop.eup %1574  ;;  %v1323_v33 = vadd.f32 1.0, %v1573_v10  ;;  %1576 = vpow2.f32 %v1451_v37 }
 0x555   :  { %v1342_v0 = vadd.f32 1.0, %v1575_v41 }
 0x556   :  { %1578 = vrcp.f32 %v1323_v33  ;;  %v1335_v23 = vand.u32 2147483648, %v1323_v33  ;;  %v1333_v19 = vand.u32 2147483647, %v1323_v33  ;;  %vm1329_vm5 = vweird.f32 %v1323_v33 }
 0x557   :  { %1580 = vrcp.f32 %v1342_v0  ;;  %v1354_v4 = vand.u32 2147483648, %v1342_v0  ;;  %v1352_v17 = vand.u32 2147483647, %v1342_v0  ;;  %vm1348_vm6 = vweird.f32 %v1342_v0 }
 0x558   :  { %v1336_v18 = vor.u32 1.1754944e-38, %v1335_v23  ;;  %vm1334_vm9 = vcmp.eq.f32.partialorder %v1333_v19, 8.507059e+37 }
 0x559   :  { %v1355_v7 = vor.u32 1.1754944e-38, %v1354_v4  ;;  %vm1353_vm10 = vcmp.eq.f32.partialorder %v1352_v17, 8.507059e+37 }
 0x55a   :  { %v1577_v1 = vpop.eup %1576 }
 0x55b   :  { %v1362_v2 = vadd.f32 1.0, %v1577_v1 }
 0x55c   :  { %v1579_v5 = vpop.eup %1578 }
 0x55d   :  { %v1581_v9 = vpop.eup %1580  ;;  %v1325_v6 = vmul.f32 %v1579_v5, %v1323_v33  ;;  %1582 = vrcp.f32 %v1362_v2  ;;  %vm1330_vm3 = vweird.f32 %v1579_v5  ;;  %v1374_v39 = vand.u32 2147483648, %v1362_v2 }
 0x55e   :  { %v1344_v13 = vmul.f32 %v1581_v9, %v1342_v0  ;;  %1584 = vtanh.f32 %v1318_v24  ;;  %vm1349_vm4 = vweird.f32 %v1581_v9  ;;  %vm1331_vm7 = vmor %vm1329_vm5, %vm1330_vm3  ;;  %vm1368_vm12 = vweird.f32 %v1362_v2 }
 0x55f   :  { %v1326_v22 = vsub.f32 1.0, %v1325_v6  ;;  %vm1350_vm8 = vmor %vm1348_vm6, %vm1349_vm4  ;;  %v1372_v43 = vand.u32 2147483647, %v1362_v2  ;;  %v1375_v36 = vor.u32 1.1754944e-38, %v1374_v39 }
 0x560   :  { %v1345_v55 = vsub.f32 1.0, %v1344_v13 }
 0x561   :  { %v1327_v15 = vmul.f32 %v1579_v5, %v1326_v22  ;;  %vm1373_vm14 = vcmp.eq.f32.partialorder %v1372_v43, 8.507059e+37 }
 0x562   :  { %v1346_v12 = vmul.f32 %v1581_v9, %v1345_v55 }
 0x563   :  { %v1583_v11 = vpop.eup %1582  ;;  %v1328_v14 = vadd.f32 %v1579_v5, %v1327_v15 }
 0x564   :  { %v1347_v8 = vadd.f32 %v1581_v9, %v1346_v12  ;;  %v1364_v20 = vmul.f32 %v1583_v11, %v1362_v2  ;;  %v1585_v3 = vpop.eup %1584  ;;  %vm1369_vm11 = vweird.f32 %v1583_v11 }
 0x565   :  { %v1332_v25 = vsel %vm1331_vm7, %v1579_v5, %v1328_v14  ;;  %vm1370_vm13 = vmor %vm1368_vm12, %vm1369_vm11 }
 0x566   :  { %v1337_v26 = vsel %vm1334_vm9, %v1336_v18, %v1332_v25  ;;  %v1351_v27 = vsel %vm1350_vm8, %v1581_v9, %v1347_v8  ;;  %v1365_v28 = vsub.f32 1.0, %v1364_v20 }
 0x567   :  { %v1356_v29 = vsel %vm1353_vm10, %v1355_v7, %v1351_v27  ;;  %v1379_v34 = vmul.f32 %v1585_v3, %v1337_v26 }
 0x568   :  { %v1378_v30 = vmul.f32 %v1356_v29, %v2633_v48  ;;  %v1366_v31 = vmul.f32 %v1583_v11, %v1365_v28 }
 0x56a   :  { %v1380_v32 = vadd.f32 %v1379_v34, %v1378_v30  ;;  %v1367_v35 = vadd.f32 %v1583_v11, %v1366_v31 }
 0x56c   :  { %1586 = vtanh.f32 %v1380_v32  ;;  %v1371_v47 = vsel %vm1370_vm13, %v1583_v11, %v1367_v35 }
 0x56d   :  { %v1376_v46 = vsel %vm1373_vm14, %v1375_v36, %v1371_v47 }
 0x572   :  { %v1587_v54 = vpop.eup %1586 }
 0x573   :  { %v1382_v61 = vmul.f32 %v1587_v54, %v1376_v46 }
 0x575   :  { %v1391_v60 = vsel %vm1390_vm15, %v1382_v61, %v2637_v40 }
 0x576   :  { %1394 = vst [vmem:[%s2659_s3] sm:$0xff] %v1391_v60 }
 0x577   :  { %1399 = vsyncpa [#allocation5], 1 }

</bundles_post_ra>
